<compile_context>
chip_gen: v7x
topology: tpu7x:2x2x1
jax: 0.10.0
libtpu: 0.0.40
codegen_flags: <defaults>
</compile_context>

<pallas_src>
import functools
from collections import OrderedDict

import jax
import jax.numpy as jnp
from jax.experimental import pallas as pl
from jax.experimental.pallas import tpu as pltpu

NAMES = {
    'vgg11': ['conv1_1', 'relu1_1', 'pool1', 'conv2_1', 'relu2_1', 'pool2', 'conv3_1', 'relu3_1', 'conv3_2',
              'relu3_2', 'pool3', 'conv4_1', 'relu4_1', 'conv4_2', 'relu4_2', 'pool4', 'conv5_1', 'relu5_1',
              'conv5_2', 'relu5_2', 'pool5'],
    'vgg13': ['conv1_1', 'relu1_1', 'conv1_2', 'relu1_2', 'pool1', 'conv2_1', 'relu2_1', 'conv2_2', 'relu2_2',
              'pool2', 'conv3_1', 'relu3_1', 'conv3_2', 'relu3_2', 'pool3', 'conv4_1', 'relu4_1', 'conv4_2',
              'relu4_2', 'pool4', 'conv5_1', 'relu5_1', 'conv5_2', 'relu5_2', 'pool5'],
    'vgg16': ['conv1_1', 'relu1_1', 'conv1_2', 'relu1_2', 'pool1', 'conv2_1', 'relu2_1', 'conv2_2', 'relu2_2',
              'pool2', 'conv3_1', 'relu3_1', 'conv3_2', 'relu3_2', 'conv3_3', 'relu3_3', 'pool3', 'conv4_1',
              'relu4_1', 'conv4_2', 'relu4_2', 'conv4_3', 'relu4_3', 'pool4', 'conv5_1', 'relu5_1', 'conv5_2',
              'relu5_2', 'conv5_3', 'relu5_3', 'pool5'],
    'vgg19': ['conv1_1', 'relu1_1', 'conv1_2', 'relu1_2', 'pool1', 'conv2_1', 'relu2_1', 'conv2_2', 'relu2_2',
              'pool2', 'conv3_1', 'relu3_1', 'conv3_2', 'relu3_2', 'conv3_3', 'relu3_3', 'conv3_4', 'relu3_4',
              'pool3', 'conv4_1', 'relu4_1', 'conv4_2', 'relu4_2', 'conv4_3', 'relu4_3', 'conv4_4', 'relu4_4',
              'pool4', 'conv5_1', 'relu5_1', 'conv5_2', 'relu5_2', 'conv5_3', 'relu5_3', 'conv5_4', 'relu5_4',
              'pool5'],
}

# (in_channels, out_channels) for every VGG19 conv layer (all 3x3, pad 1, stride 1)
VGG19_CONV_CHANNELS = {
    'conv1_1': (3, 64), 'conv1_2': (64, 64),
    'conv2_1': (64, 128), 'conv2_2': (128, 128),
    'conv3_1': (128, 256), 'conv3_2': (256, 256), 'conv3_3': (256, 256), 'conv3_4': (256, 256),
    'conv4_1': (256, 512), 'conv4_2': (512, 512), 'conv4_3': (512, 512), 'conv4_4': (512, 512),
    'conv5_1': (512, 512), 'conv5_2': (512, 512), 'conv5_3': (512, 512), 'conv5_4': (512, 512),
}

_ACT_DTYPE = jnp.bfloat16          # bf16 activations/weights, f32 accumulation
_TILE_CO = 256                     # Cout tile (matches v6e/v7x 256-wide MXU)
_VMEM_LIMIT = 64 * 1024 * 1024


# ----------------------------------------------------------------------------
# In-kernel helpers
# ----------------------------------------------------------------------------

def _maxpool2x2_from_flat(yflat, h, w, c, tmp_ref):
    """2x2 / stride-2 max pool of a (h*w, c) row-major activation tile in VMEM.

    Floors odd h/w exactly like nn.MaxPool2d(kernel_size=2, stride=2).
    tmp_ref is a VMEM scratch of shape (h//2, 2*(w//2), c) and yflat's dtype.
    """
    ho, wo = h // 2, w // 2
    if h != 2 * ho or w != 2 * wo:
        y3 = yflat.reshape(h, w, c)[:2 * ho, :2 * wo, :]
        yflat = y3.reshape(2 * ho * 2 * wo, c)
        w = 2 * wo
    # Row pairs: reshape so the two spatial rows of each pooling window become
    # the two contiguous halves of one sublane row (lane dim untouched).
    yr = yflat.reshape(ho, 2 * w, c)
    tmp_ref[...] = jnp.maximum(yr[:, 0:w, :], yr[:, w:2 * w, :])
    # Column pairs: strided sublane reads of the VMEM scratch (stride-2).
    return jnp.maximum(tmp_ref[:, pl.ds(0, wo, 2), :],
                       tmp_ref[:, pl.ds(1, wo, 2), :])


# ----------------------------------------------------------------------------
# Pallas kernels
# ----------------------------------------------------------------------------

def _conv3x3_fused_kernel(*refs, fuse_norm, relu_input, apply_relu, fuse_pool):
    """Fused 3x3 conv (+ per-channel input affine) (+ input ReLU) + bias (+ReLU) (+2x2 maxpool)."""
    n_in = 5 if fuse_norm else 3
    x_ref = refs[0]
    scale_ref = refs[1] if fuse_norm else None
    shift_ref = refs[2] if fuse_norm else None
    w_ref, b_ref = refs[n_in - 2], refs[n_in - 1]
    o_ref = refs[n_in]
    xpad_ref, acc_ref = refs[n_in + 1], refs[n_in + 2]
    ptmp_ref = refs[n_in + 3] if fuse_pool else None

    _, h, w, cin = x_ref.shape
    ct = w_ref.shape[-1]                       # Cout tile handled by this grid step

    x = x_ref[0]
    if fuse_norm:                              # normalization folded into conv1_1
        x = x.astype(jnp.float32) * scale_ref[...] + shift_ref[...]
    if relu_input:                             # ReLU of the previous layer, folded in
        x = jnp.maximum(x, 0)
    x = x.astype(xpad_ref.dtype)

    # Zero-padded input tile lives only in VMEM (replaces a wrapper-side jnp.pad
    # that would cost a full extra HBM read+write of every conv input).
    xpad_ref[...] = jnp.zeros_like(xpad_ref)
    xpad_ref[1:h + 1, 1:w + 1, :] = x

    # 3x3 conv as 9 MXU dots accumulated into an explicit VMEM f32 scratch.
    # First tap assigns (no memset), remaining taps accumulate.
    first = True
    for kh in range(3):
        for kw in range(3):
            patch = xpad_ref[kh:kh + h, kw:kw + w, :].reshape(h * w, cin)
            d = jnp.dot(patch, w_ref[kh, kw], preferred_element_type=jnp.float32)
            if first:
                acc_ref[...] = d
                first = False
            else:
                acc_ref[...] += d

    y = acc_ref[...] + b_ref[...]              # (h*w, ct) f32, bias broadcast
    if apply_relu:
        y = jnp.maximum(y, 0.0)
    if fuse_pool:
        o_ref[0] = _maxpool2x2_from_flat(y, h, w, ct, ptmp_ref).astype(o_ref.dtype)
    else:
        o_ref[0] = y.reshape(h, w, ct).astype(o_ref.dtype)


def _relu_kernel(x_ref, o_ref):
    # Only used when the ReLU output itself is a requested feature and the
    # preceding conv's pre-ReLU output is also requested.
    o_ref[0] = jnp.maximum(x_ref[0], 0.0)


def _maxpool2x2_kernel(x_ref, o_ref, tmp_ref, *, apply_relu):
    # Standalone pool; optionally applies a folded ReLU (max-pool and ReLU commute,
    # so applying it on the pooled result is cheapest and exact).
    _, h, w, c = x_ref.shape
    yflat = x_ref[0].reshape(h * w, c)
    pooled = _maxpool2x2_from_flat(yflat, h, w, c, tmp_ref)
    if apply_relu:
        pooled = jnp.maximum(pooled, 0)
    o_ref[0] = pooled.astype(o_ref.dtype)


# ----------------------------------------------------------------------------
# pallas_call wrappers
# ----------------------------------------------------------------------------

def conv3x3_bias_act(x, w, b, *, scale=None, shift=None, relu_input=False,
                     apply_relu=True, fuse_pool=False):
    """x: (N,H,W,Cin) bf16, w: (3,3,Cin,Cout) bf16 HWIO, b: (1,Cout) f32."""
    n, h, wd, cin = x.shape
    cout = w.shape[-1]
    tco = min(_TILE_CO, cout)
    assert cout % tco == 0
    n_co = cout // tco
    ho, wo = h // 2, wd // 2
    fuse_norm = scale is not None

    # Grid = (Cout_tiles, batch): the (large) weight slab for conv4/5 layers is
    # fetched once per Cout tile and reused across the batch axis.
    if fuse_pool:
        assert apply_relu
        out_shape = jax.ShapeDtypeStruct((n, ho, wo, cout), x.dtype)
        out_spec = pl.BlockSpec((1, ho, wo, tco), lambda j, i: (i, 0, 0, j))
    else:
        out_shape = jax.ShapeDtypeStruct((n, h, wd, cout), x.dtype)
        out_spec = pl.BlockSpec((1, h, wd, tco), lambda j, i: (i, 0, 0, j))

    args = [x]
    in_specs = [pl.BlockSpec((1, h, wd, cin), lambda j, i: (i, 0, 0, 0))]
    if fuse_norm:
        args += [scale, shift]
        in_specs += [pl.BlockSpec((1, cin), lambda j, i: (0, 0)),
                     pl.BlockSpec((1, cin), lambda j, i: (0, 0))]
    args += [w, b]
    in_specs += [pl.BlockSpec((3, 3, cin, tco), lambda j, i: (0, 0, 0, j)),
                 pl.BlockSpec((1, tco), lambda j, i: (0, j))]

    scratch_shapes = [pltpu.VMEM((h + 2, wd + 2, cin), x.dtype),  # zero-padded input tile
                      pltpu.VMEM((h * wd, tco), jnp.float32)]     # f32 accumulator
    if fuse_pool:
        scratch_shapes.append(pltpu.VMEM((ho, 2 * wo, tco), jnp.float32))

    kernel = functools.partial(_conv3x3_fused_kernel, fuse_norm=fuse_norm,
                               relu_input=relu_input, apply_relu=apply_relu,
                               fuse_pool=fuse_pool)
    return pl.pallas_call(
        kernel,
        out_shape=out_shape,
        grid=(n_co, n),
        in_specs=in_specs,
        out_specs=out_spec,
        scratch_shapes=scratch_shapes,
        compiler_params=pltpu.CompilerParams(
            dimension_semantics=("parallel", "parallel"),
            vmem_limit_bytes=_VMEM_LIMIT),
    )(*args)


def relu_pallas(x):
    n, h, w, c = x.shape
    return pl.pallas_call(
        _relu_kernel,
        out_shape=jax.ShapeDtypeStruct(x.shape, x.dtype),
        grid=(n,),
        in_specs=[pl.BlockSpec((1, h, w, c), lambda i: (i, 0, 0, 0))],
        out_specs=pl.BlockSpec((1, h, w, c), lambda i: (i, 0, 0, 0)),
        compiler_params=pltpu.CompilerParams(
            dimension_semantics=("parallel",),
            vmem_limit_bytes=_VMEM_LIMIT),
    )(x)


def maxpool2x2_pallas(x, *, apply_relu=False):
    n, h, w, c = x.shape
    ho, wo = h // 2, w // 2
    kernel = functools.partial(_maxpool2x2_kernel, apply_relu=apply_relu)
    return pl.pallas_call(
        kernel,
        out_shape=jax.ShapeDtypeStruct((n, ho, wo, c), x.dtype),
        grid=(n,),
        in_specs=[pl.BlockSpec((1, h, w, c), lambda i: (i, 0, 0, 0))],
        out_specs=pl.BlockSpec((1, ho, wo, c), lambda i: (i, 0, 0, 0)),
        scratch_shapes=[pltpu.VMEM((ho, 2 * wo, c), x.dtype)],
        compiler_params=pltpu.CompilerParams(
            dimension_semantics=("parallel",),
            vmem_limit_bytes=_VMEM_LIMIT),
    )(x)


def _to_nchw_f32(x_nhwc):
    return jnp.transpose(x_nhwc, (0, 3, 1, 2)).astype(jnp.float32)


# ----------------------------------------------------------------------------
# Module-equivalent wrapper
# ----------------------------------------------------------------------------

class VGGFeatureExtractorPallas:
    def __init__(self, layer_name_list, vgg_type='vgg19', use_input_norm=True,
                 range_norm=False, requires_grad=False, remove_pooling=False,
                 pooling_stride=2, seed=0):
        del requires_grad  # inference-only JAX port
        self.layer_name_list = list(layer_name_list)
        self.use_input_norm = use_input_norm
        self.range_norm = range_norm
        self.names = NAMES[vgg_type.replace('_bn', '')]
        assert pooling_stride == 2, "only pooling_stride=2 supported"

        max_idx = max(self.names.index(v) for v in self.layer_name_list)
        self.active_layers = [k for k in self.names[:max_idx + 1]
                              if not ('pool' in k and remove_pooling)]

        # Deterministic synthetic parameters (no torchvision checkpoint load).
        key = jax.random.PRNGKey(seed)
        self.params = OrderedDict()
        for k in self.active_layers:
            if k.startswith('conv'):
                cin, cout = VGG19_CONV_CHANNELS[k]
                key, kw_, kb_ = jax.random.split(key, 3)
                w = (jax.random.normal(kw_, (3, 3, cin, cout), jnp.float32)
                     * (2.0 / (9 * cin)) ** 0.5).astype(_ACT_DTYPE)
                b = jax.random.normal(kb_, (1, cout), jnp.float32) * 0.01
                self.params[k] = (w, b, cin, cout)

        # Normalization folded into conv1_1 as a per-input-channel affine.
        mean = jnp.array([0.485, 0.456, 0.406], jnp.float32)
        std = jnp.array([0.229, 0.224, 0.225], jnp.float32)
        if use_input_norm and range_norm:
            scale, shift = 0.5 / std, (0.5 - mean) / std
        elif use_input_norm:
            scale, shift = 1.0 / std, -mean / std
        elif range_norm:
            scale, shift = 0.5 * jnp.ones(3, jnp.float32), 0.5 * jnp.ones(3, jnp.float32)
        else:
            scale = shift = None
        self.in_scale = None if scale is None else scale.reshape(1, 3)
        self.in_shift = None if shift is None else shift.reshape(1, 3)

    def __call__(self, x_nchw):
        x = jnp.transpose(x_nchw, (0, 2, 3, 1)).astype(_ACT_DTYPE)  # NCHW f32 -> NHWC bf16
        out = {}
        L = self.active_layers
        req = set(self.layer_name_list)
        pending_relu = False   # a ReLU that was not materialized; folded into the consumer
        i = 0
        while i < len(L):
            name = L[i]
            if name.startswith('conv'):
                w, b, _, _ = self.params[name]
                conv_requested = name in req
                has_relu = i + 1 < len(L) and L[i + 1].startswith('relu')
                relu_name = L[i + 1] if has_relu else None
                has_pool = has_relu and i + 2 < len(L) and L[i + 2].startswith('pool')
                pool_name = L[i + 2] if has_pool else None
                fuse_relu = has_relu and not conv_requested
                fuse_pool = fuse_relu and has_pool and relu_name not in req
                scale = shift = None
                if name == 'conv1_1' and self.in_scale is not None:
                    scale, shift = self.in_scale, self.in_shift
                x = conv3x3_bias_act(x, w, b, scale=scale, shift=shift,
                                     relu_input=pending_relu,
                                     apply_relu=fuse_relu, fuse_pool=fuse_pool)
                pending_relu = False
                if fuse_pool:
                    if pool_name in req:
                        out[pool_name] = _to_nchw_f32(x)
                    i += 3
                elif fuse_relu:
                    if relu_name in req:
                        out[relu_name] = _to_nchw_f32(x)
                    i += 2
                else:
                    if conv_requested:
                        out[name] = _to_nchw_f32(x)
                    i += 1
            elif name.startswith('relu'):
                if name in req:
                    # The ReLU output itself is a requested feature: materialize it.
                    x = relu_pallas(x)
                    out[name] = _to_nchw_f32(x)
                    pending_relu = False
                else:
                    # Fold into the next consumer (conv input or max-pool kernel).
                    pending_relu = True
                i += 1
            else:  # pool*
                x = maxpool2x2_pallas(x, apply_relu=pending_relu)
                pending_relu = False
                if name in req:
                    out[name] = _to_nchw_f32(x)
                i += 1
        # A trailing un-requested ReLU cannot be an active layer (the last active
        # layer is always requested), so no fold can be left dangling.
        assert not pending_relu
        return out


# ----------------------------------------------------------------------------
# Pure-JAX reference (same synthetic bf16 parameters) for a correctness check.
# ----------------------------------------------------------------------------

def _reference_forward(ex, x_nchw):
    x = jnp.transpose(x_nchw, (0, 2, 3, 1)).astype(_ACT_DTYPE)
    if ex.in_scale is not None:
        x = (x.astype(jnp.float32) * ex.in_scale.reshape(1, 1, 1, -1)
             + ex.in_shift.reshape(1, 1, 1, -1)).astype(_ACT_DTYPE)
    out = {}
    for k in ex.active_layers:
        if k.startswith('conv'):
            w, b, _, _ = ex.params[k]
            y = jax.lax.conv_general_dilated(
                x, w, (1, 1), 'SAME',
                dimension_numbers=('NHWC', 'HWIO', 'NHWC'),
                preferred_element_type=jnp.float32)
            x = (y + b.reshape(1, 1, 1, -1)).astype(_ACT_DTYPE)
        elif k.startswith('relu'):
            x = jnp.maximum(x, 0)
        else:
            n_, hh, ww, cc = x.shape
            ho, wo = hh // 2, ww // 2
            x = jnp.max(x[:, :2 * ho, :2 * wo, :].reshape(n_, ho, 2, wo, 2, cc),
                        axis=(2, 4))
        if k in ex.layer_name_list:
            out[k] = jnp.transpose(x, (0, 3, 1, 2)).astype(jnp.float32)
    return out


if __name__ == "__main__":
    key = jax.random.PRNGKey(0)
    # Small NCHW input consistent with the module (3 input channels for VGG).
    x = jax.random.uniform(key, (2, 3, 16, 16), jnp.float32)

    def check(layer_names, **kwargs):
        ex = VGGFeatureExtractorPallas(layer_name_list=layer_names,
                                       vgg_type='vgg19', **kwargs)
        got = jax.block_until_ready(ex(x))
        ref = jax.block_until_ready(_reference_forward(ex, x))
        assert set(got.keys()) == set(layer_names), (set(got.keys()), layer_names)
        for k in layer_names:
            assert got[k].shape == ref[k].shape, (k, got[k].shape, ref[k].shape)
            assert jnp.allclose(got[k], ref[k], atol=5e-2, rtol=5e-2), f"mismatch at {k}"

    # Exercises: norm folded into conv1_1, fused conv+bias+ReLU, fused
    # conv+bias+ReLU+2x2-maxpool, Cout-tiled grid.
    check(['relu1_1', 'relu2_1'], use_input_norm=True, range_norm=False)
    # Exercises: pre-ReLU conv capture, ReLU folded into the next conv's input,
    # standalone maxpool kernel, combined range_norm + input_norm folding.
    check(['conv1_1', 'relu1_2', 'pool1'], use_input_norm=True, range_norm=True)
    # Exercises: ReLU folded into the max-pool kernel, ReLU folded into a conv input,
    # fused conv+ReLU output, no-normalization conv1_1 path.
    check(['conv1_2', 'pool1', 'conv2_1', 'relu2_2'],
          use_input_norm=False, range_norm=False)

    print("KERNEL_OK")
</pallas_src>

<mosaic_0001>
module attributes {stable_mosaic.version = 11 : i64} {
  func.func @_conv3x3_fused_kernel(%arg0: i32, %arg1: i32, %arg2: memref<1x16x16x3xbf16, #tpu.memory_space<vmem>>, %arg3: memref<1x3xf32, #tpu.memory_space<vmem>>, %arg4: memref<1x3xf32, #tpu.memory_space<vmem>>, %arg5: memref<3x3x3x64xbf16, #tpu.memory_space<vmem>>, %arg6: memref<1x64xf32, #tpu.memory_space<vmem>>, %arg7: memref<1x16x16x64xbf16, #tpu.memory_space<vmem>>, %arg8: memref<18x18x3xbf16, #tpu.memory_space<vmem>>, %arg9: memref<256x64xf32, #tpu.memory_space<vmem>>) attributes {dimension_semantics = [#tpu.dimension_semantics<parallel>, #tpu.dimension_semantics<parallel>], iteration_bounds = array<i64: 1, 2>, scalar_prefetch = 0 : i64, scratch_operands = 2 : i64, tpu.core_type = #tpu.core_type<tc>, window_params = [{transform_indices = @transform_0, window_bounds = array<i64: 1, 16, 16, 3>}, {pipeline_mode = #tpu.pipeline_mode<synchronous>, transform_indices = @transform_1, window_bounds = array<i64: 1, 3>}, {pipeline_mode = #tpu.pipeline_mode<synchronous>, transform_indices = @transform_2, window_bounds = array<i64: 1, 3>}, {transform_indices = @transform_3, window_bounds = array<i64: 3, 3, 3, 64>}, {transform_indices = @transform_4, window_bounds = array<i64: 1, 64>}, {transform_indices = @transform_5, window_bounds = array<i64: 1, 16, 16, 64>}]} {
    %c0 = arith.constant 0 : index
    %c0_0 = arith.constant 0 : index
    %c0_1 = arith.constant 0 : index
    %c0_2 = arith.constant 0 : index
    %0 = vector.load %arg2[%c0, %c0_0, %c0_1, %c0_2] : memref<1x16x16x3xbf16, #tpu.memory_space<vmem>>, vector<1x16x16x3xbf16>
    %1 = vector.shape_cast %0 : vector<1x16x16x3xbf16> to vector<16x16x3xbf16>
    %2 = arith.extf %1 : vector<16x16x3xbf16> to vector<16x16x3xf32>
    %c0_3 = arith.constant 0 : index
    %c0_4 = arith.constant 0 : index
    %3 = vector.load %arg3[%c0_3, %c0_4] : memref<1x3xf32, #tpu.memory_space<vmem>>, vector<1x3xf32>
    %4 = vector.shape_cast %3 : vector<1x3xf32> to vector<1x1x3xf32>
    %5 = vector.broadcast %4 : vector<1x1x3xf32> to vector<16x16x3xf32>
    %6 = arith.mulf %2, %5 : vector<16x16x3xf32>
    %c0_5 = arith.constant 0 : index
    %c0_6 = arith.constant 0 : index
    %7 = vector.load %arg4[%c0_5, %c0_6] : memref<1x3xf32, #tpu.memory_space<vmem>>, vector<1x3xf32>
    %8 = vector.shape_cast %7 : vector<1x3xf32> to vector<1x1x3xf32>
    %9 = vector.broadcast %8 : vector<1x1x3xf32> to vector<16x16x3xf32>
    %10 = arith.addf %6, %9 : vector<16x16x3xf32>
    %11 = arith.truncf %10 : vector<16x16x3xf32> to vector<16x16x3xbf16>
    %cst = arith.constant 0.000000e+00 : bf16
    %12 = vector.broadcast %cst : bf16 to vector<18x18x3xbf16>
    %c0_7 = arith.constant 0 : index
    %c0_8 = arith.constant 0 : index
    %c0_9 = arith.constant 0 : index
    %13 = vector.load %arg8[%c0_7, %c0_8, %c0_9] : memref<18x18x3xbf16, #tpu.memory_space<vmem>>, vector<18x18x3xbf16>
    tpu.vector_store %arg8[%c0_7, %c0_8, %c0_9], %12 {strides = array<i32>} : memref<18x18x3xbf16, #tpu.memory_space<vmem>>, vector<18x18x3xbf16>,
    %c1 = arith.constant 1 : index
    %c1_10 = arith.constant 1 : index
    %c0_11 = arith.constant 0 : index
    %14 = vector.load %arg8[%c1, %c1_10, %c0_11] : memref<18x18x3xbf16, #tpu.memory_space<vmem>>, vector<16x16x3xbf16>
    tpu.vector_store %arg8[%c1, %c1_10, %c0_11], %11 {strides = array<i32>} : memref<18x18x3xbf16, #tpu.memory_space<vmem>>, vector<16x16x3xbf16>,
    %c0_12 = arith.constant 0 : index
    %c0_13 = arith.constant 0 : index
    %c0_14 = arith.constant 0 : index
    %15 = vector.load %arg8[%c0_12, %c0_13, %c0_14] : memref<18x18x3xbf16, #tpu.memory_space<vmem>>, vector<16x16x3xbf16>
    %16 = vector.shape_cast %15 : vector<16x16x3xbf16> to vector<256x3xbf16>
    %c0_15 = arith.constant 0 : index
    %c0_16 = arith.constant 0 : index
    %c0_17 = arith.constant 0 : index
    %c0_18 = arith.constant 0 : index
    %17 = vector.load %arg5[%c0_15, %c0_16, %c0_17, %c0_18] : memref<3x3x3x64xbf16, #tpu.memory_space<vmem>>, vector<1x1x3x64xbf16>
    %18 = vector.shape_cast %17 : vector<1x1x3x64xbf16> to vector<3x64xbf16>
    %cst_19 = arith.constant dense<0.000000e+00> : vector<256x64xf32>
    %19 = tpu.matmul %16, %18, %cst_19 {dimension_numbers = #tpu.dot_dimension_numbers<[1], [0], [0], [1], [0, 0, 1, 1], [], []>} : vector<256x3xbf16>, vector<3x64xbf16>, vector<256x64xf32> -> vector<256x64xf32>
    %c0_20 = arith.constant 0 : index
    %c0_21 = arith.constant 0 : index
    %20 = vector.load %arg9[%c0_20, %c0_21] : memref<256x64xf32, #tpu.memory_space<vmem>>, vector<256x64xf32>
    tpu.vector_store %arg9[%c0_20, %c0_21], %19 {strides = array<i32>} : memref<256x64xf32, #tpu.memory_space<vmem>>, vector<256x64xf32>,
    %c0_22 = arith.constant 0 : index
    %c1_23 = arith.constant 1 : index
    %c0_24 = arith.constant 0 : index
    %21 = vector.load %arg8[%c0_22, %c1_23, %c0_24] : memref<18x18x3xbf16, #tpu.memory_space<vmem>>, vector<16x16x3xbf16>
    %22 = vector.shape_cast %21 : vector<16x16x3xbf16> to vector<256x3xbf16>
    %c0_25 = arith.constant 0 : index
    %c1_26 = arith.constant 1 : index
    %c0_27 = arith.constant 0 : index
    %c0_28 = arith.constant 0 : index
    %23 = vector.load %arg5[%c0_25, %c1_26, %c0_27, %c0_28] : memref<3x3x3x64xbf16, #tpu.memory_space<vmem>>, vector<1x1x3x64xbf16>
    %24 = vector.shape_cast %23 : vector<1x1x3x64xbf16> to vector<3x64xbf16>
    %cst_29 = arith.constant dense<0.000000e+00> : vector<256x64xf32>
    %25 = tpu.matmul %22, %24, %cst_29 {dimension_numbers = #tpu.dot_dimension_numbers<[1], [0], [0], [1], [0, 0, 1, 1], [], []>} : vector<256x3xbf16>, vector<3x64xbf16>, vector<256x64xf32> -> vector<256x64xf32>
    %c0_30 = arith.constant 0 : index
    %c0_31 = arith.constant 0 : index
    %26 = vector.load %arg9[%c0_30, %c0_31] : memref<256x64xf32, #tpu.memory_space<vmem>>, vector<256x64xf32>
    %27 = arith.addf %26, %25 : vector<256x64xf32>
    %c0_32 = arith.constant 0 : index
    %c0_33 = arith.constant 0 : index
    %28 = vector.load %arg9[%c0_32, %c0_33] : memref<256x64xf32, #tpu.memory_space<vmem>>, vector<256x64xf32>
    tpu.vector_store %arg9[%c0_32, %c0_33], %27 {strides = array<i32>} : memref<256x64xf32, #tpu.memory_space<vmem>>, vector<256x64xf32>,
    %c0_34 = arith.constant 0 : index
    %c2 = arith.constant 2 : index
    %c0_35 = arith.constant 0 : index
    %29 = vector.load %arg8[%c0_34, %c2, %c0_35] : memref<18x18x3xbf16, #tpu.memory_space<vmem>>, vector<16x16x3xbf16>
    %30 = vector.shape_cast %29 : vector<16x16x3xbf16> to vector<256x3xbf16>
    %c0_36 = arith.constant 0 : index
    %c2_37 = arith.constant 2 : index
    %c0_38 = arith.constant 0 : index
    %c0_39 = arith.constant 0 : index
    %31 = vector.load %arg5[%c0_36, %c2_37, %c0_38, %c0_39] : memref<3x3x3x64xbf16, #tpu.memory_space<vmem>>, vector<1x1x3x64xbf16>
    %32 = vector.shape_cast %31 : vector<1x1x3x64xbf16> to vector<3x64xbf16>
    %cst_40 = arith.constant dense<0.000000e+00> : vector<256x64xf32>
    %33 = tpu.matmul %30, %32, %cst_40 {dimension_numbers = #tpu.dot_dimension_numbers<[1], [0], [0], [1], [0, 0, 1, 1], [], []>} : vector<256x3xbf16>, vector<3x64xbf16>, vector<256x64xf32> -> vector<256x64xf32>
    %c0_41 = arith.constant 0 : index
    %c0_42 = arith.constant 0 : index
    %34 = vector.load %arg9[%c0_41, %c0_42] : memref<256x64xf32, #tpu.memory_space<vmem>>, vector<256x64xf32>
    %35 = arith.addf %34, %33 : vector<256x64xf32>
    %c0_43 = arith.constant 0 : index
    %c0_44 = arith.constant 0 : index
    %36 = vector.load %arg9[%c0_43, %c0_44] : memref<256x64xf32, #tpu.memory_space<vmem>>, vector<256x64xf32>
    tpu.vector_store %arg9[%c0_43, %c0_44], %35 {strides = array<i32>} : memref<256x64xf32, #tpu.memory_space<vmem>>, vector<256x64xf32>,
    %c1_45 = arith.constant 1 : index
    %c0_46 = arith.constant 0 : index
    %c0_47 = arith.constant 0 : index
    %37 = vector.load %arg8[%c1_45, %c0_46, %c0_47] : memref<18x18x3xbf16, #tpu.memory_space<vmem>>, vector<16x16x3xbf16>
    %38 = vector.shape_cast %37 : vector<16x16x3xbf16> to vector<256x3xbf16>
    %c1_48 = arith.constant 1 : index
    %c0_49 = arith.constant 0 : index
    %c0_50 = arith.constant 0 : index
    %c0_51 = arith.constant 0 : index
    %39 = vector.load %arg5[%c1_48, %c0_49, %c0_50, %c0_51] : memref<3x3x3x64xbf16, #tpu.memory_space<vmem>>, vector<1x1x3x64xbf16>
    %40 = vector.shape_cast %39 : vector<1x1x3x64xbf16> to vector<3x64xbf16>
    %cst_52 = arith.constant dense<0.000000e+00> : vector<256x64xf32>
    %41 = tpu.matmul %38, %40, %cst_52 {dimension_numbers = #tpu.dot_dimension_numbers<[1], [0], [0], [1], [0, 0, 1, 1], [], []>} : vector<256x3xbf16>, vector<3x64xbf16>, vector<256x64xf32> -> vector<256x64xf32>
    %c0_53 = arith.constant 0 : index
    %c0_54 = arith.constant 0 : index
    %42 = vector.load %arg9[%c0_53, %c0_54] : memref<256x64xf32, #tpu.memory_space<vmem>>, vector<256x64xf32>
    %43 = arith.addf %42, %41 : vector<256x64xf32>
    %c0_55 = arith.constant 0 : index
    %c0_56 = arith.constant 0 : index
    %44 = vector.load %arg9[%c0_55, %c0_56] : memref<256x64xf32, #tpu.memory_space<vmem>>, vector<256x64xf32>
    tpu.vector_store %arg9[%c0_55, %c0_56], %43 {strides = array<i32>} : memref<256x64xf32, #tpu.memory_space<vmem>>, vector<256x64xf32>,
    %c1_57 = arith.constant 1 : index
    %c1_58 = arith.constant 1 : index
    %c0_59 = arith.constant 0 : index
    %45 = vector.load %arg8[%c1_57, %c1_58, %c0_59] : memref<18x18x3xbf16, #tpu.memory_space<vmem>>, vector<16x16x3xbf16>
    %46 = vector.shape_cast %45 : vector<16x16x3xbf16> to vector<256x3xbf16>
    %c1_60 = arith.constant 1 : index
    %c1_61 = arith.constant 1 : index
    %c0_62 = arith.constant 0 : index
    %c0_63 = arith.constant 0 : index
    %47 = vector.load %arg5[%c1_60, %c1_61, %c0_62, %c0_63] : memref<3x3x3x64xbf16, #tpu.memory_space<vmem>>, vector<1x1x3x64xbf16>
    %48 = vector.shape_cast %47 : vector<1x1x3x64xbf16> to vector<3x64xbf16>
    %cst_64 = arith.constant dense<0.000000e+00> : vector<256x64xf32>
    %49 = tpu.matmul %46, %48, %cst_64 {dimension_numbers = #tpu.dot_dimension_numbers<[1], [0], [0], [1], [0, 0, 1, 1], [], []>} : vector<256x3xbf16>, vector<3x64xbf16>, vector<256x64xf32> -> vector<256x64xf32>
    %c0_65 = arith.constant 0 : index
    %c0_66 = arith.constant 0 : index
    %50 = vector.load %arg9[%c0_65, %c0_66] : memref<256x64xf32, #tpu.memory_space<vmem>>, vector<256x64xf32>
    %51 = arith.addf %50, %49 : vector<256x64xf32>
    %c0_67 = arith.constant 0 : index
    %c0_68 = arith.constant 0 : index
    %52 = vector.load %arg9[%c0_67, %c0_68] : memref<256x64xf32, #tpu.memory_space<vmem>>, vector<256x64xf32>
    tpu.vector_store %arg9[%c0_67, %c0_68], %51 {strides = array<i32>} : memref<256x64xf32, #tpu.memory_space<vmem>>, vector<256x64xf32>,
    %c1_69 = arith.constant 1 : index
    %c2_70 = arith.constant 2 : index
    %c0_71 = arith.constant 0 : index
    %53 = vector.load %arg8[%c1_69, %c2_70, %c0_71] : memref<18x18x3xbf16, #tpu.memory_space<vmem>>, vector<16x16x3xbf16>
    %54 = vector.shape_cast %53 : vector<16x16x3xbf16> to vector<256x3xbf16>
    %c1_72 = arith.constant 1 : index
    %c2_73 = arith.constant 2 : index
    %c0_74 = arith.constant 0 : index
    %c0_75 = arith.constant 0 : index
    %55 = vector.load %arg5[%c1_72, %c2_73, %c0_74, %c0_75] : memref<3x3x3x64xbf16, #tpu.memory_space<vmem>>, vector<1x1x3x64xbf16>
    %56 = vector.shape_cast %55 : vector<1x1x3x64xbf16> to vector<3x64xbf16>
    %cst_76 = arith.constant dense<0.000000e+00> : vector<256x64xf32>
    %57 = tpu.matmul %54, %56, %cst_76 {dimension_numbers = #tpu.dot_dimension_numbers<[1], [0], [0], [1], [0, 0, 1, 1], [], []>} : vector<256x3xbf16>, vector<3x64xbf16>, vector<256x64xf32> -> vector<256x64xf32>
    %c0_77 = arith.constant 0 : index
    %c0_78 = arith.constant 0 : index
    %58 = vector.load %arg9[%c0_77, %c0_78] : memref<256x64xf32, #tpu.memory_space<vmem>>, vector<256x64xf32>
    %59 = arith.addf %58, %57 : vector<256x64xf32>
    %c0_79 = arith.constant 0 : index
    %c0_80 = arith.constant 0 : index
    %60 = vector.load %arg9[%c0_79, %c0_80] : memref<256x64xf32, #tpu.memory_space<vmem>>, vector<256x64xf32>
    tpu.vector_store %arg9[%c0_79, %c0_80], %59 {strides = array<i32>} : memref<256x64xf32, #tpu.memory_space<vmem>>, vector<256x64xf32>,
    %c2_81 = arith.constant 2 : index
    %c0_82 = arith.constant 0 : index
    %c0_83 = arith.constant 0 : index
    %61 = vector.load %arg8[%c2_81, %c0_82, %c0_83] : memref<18x18x3xbf16, #tpu.memory_space<vmem>>, vector<16x16x3xbf16>
    %62 = vector.shape_cast %61 : vector<16x16x3xbf16> to vector<256x3xbf16>
    %c2_84 = arith.constant 2 : index
    %c0_85 = arith.constant 0 : index
    %c0_86 = arith.constant 0 : index
    %c0_87 = arith.constant 0 : index
    %63 = vector.load %arg5[%c2_84, %c0_85, %c0_86, %c0_87] : memref<3x3x3x64xbf16, #tpu.memory_space<vmem>>, vector<1x1x3x64xbf16>
    %64 = vector.shape_cast %63 : vector<1x1x3x64xbf16> to vector<3x64xbf16>
    %cst_88 = arith.constant dense<0.000000e+00> : vector<256x64xf32>
    %65 = tpu.matmul %62, %64, %cst_88 {dimension_numbers = #tpu.dot_dimension_numbers<[1], [0], [0], [1], [0, 0, 1, 1], [], []>} : vector<256x3xbf16>, vector<3x64xbf16>, vector<256x64xf32> -> vector<256x64xf32>
    %c0_89 = arith.constant 0 : index
    %c0_90 = arith.constant 0 : index
    %66 = vector.load %arg9[%c0_89, %c0_90] : memref<256x64xf32, #tpu.memory_space<vmem>>, vector<256x64xf32>
    %67 = arith.addf %66, %65 : vector<256x64xf32>
    %c0_91 = arith.constant 0 : index
    %c0_92 = arith.constant 0 : index
    %68 = vector.load %arg9[%c0_91, %c0_92] : memref<256x64xf32, #tpu.memory_space<vmem>>, vector<256x64xf32>
    tpu.vector_store %arg9[%c0_91, %c0_92], %67 {strides = array<i32>} : memref<256x64xf32, #tpu.memory_space<vmem>>, vector<256x64xf32>,
    %c2_93 = arith.constant 2 : index
    %c1_94 = arith.constant 1 : index
    %c0_95 = arith.constant 0 : index
    %69 = vector.load %arg8[%c2_93, %c1_94, %c0_95] : memref<18x18x3xbf16, #tpu.memory_space<vmem>>, vector<16x16x3xbf16>
    %70 = vector.shape_cast %69 : vector<16x16x3xbf16> to vector<256x3xbf16>
    %c2_96 = arith.constant 2 : index
    %c1_97 = arith.constant 1 : index
    %c0_98 = arith.constant 0 : index
    %c0_99 = arith.constant 0 : index
    %71 = vector.load %arg5[%c2_96, %c1_97, %c0_98, %c0_99] : memref<3x3x3x64xbf16, #tpu.memory_space<vmem>>, vector<1x1x3x64xbf16>
    %72 = vector.shape_cast %71 : vector<1x1x3x64xbf16> to vector<3x64xbf16>
    %cst_100 = arith.constant dense<0.000000e+00> : vector<256x64xf32>
    %73 = tpu.matmul %70, %72, %cst_100 {dimension_numbers = #tpu.dot_dimension_numbers<[1], [0], [0], [1], [0, 0, 1, 1], [], []>} : vector<256x3xbf16>, vector<3x64xbf16>, vector<256x64xf32> -> vector<256x64xf32>
    %c0_101 = arith.constant 0 : index
    %c0_102 = arith.constant 0 : index
    %74 = vector.load %arg9[%c0_101, %c0_102] : memref<256x64xf32, #tpu.memory_space<vmem>>, vector<256x64xf32>
    %75 = arith.addf %74, %73 : vector<256x64xf32>
    %c0_103 = arith.constant 0 : index
    %c0_104 = arith.constant 0 : index
    %76 = vector.load %arg9[%c0_103, %c0_104] : memref<256x64xf32, #tpu.memory_space<vmem>>, vector<256x64xf32>
    tpu.vector_store %arg9[%c0_103, %c0_104], %75 {strides = array<i32>} : memref<256x64xf32, #tpu.memory_space<vmem>>, vector<256x64xf32>,
    %c2_105 = arith.constant 2 : index
    %c2_106 = arith.constant 2 : index
    %c0_107 = arith.constant 0 : index
    %77 = vector.load %arg8[%c2_105, %c2_106, %c0_107] : memref<18x18x3xbf16, #tpu.memory_space<vmem>>, vector<16x16x3xbf16>
    %78 = vector.shape_cast %77 : vector<16x16x3xbf16> to vector<256x3xbf16>
    %c2_108 = arith.constant 2 : index
    %c2_109 = arith.constant 2 : index
    %c0_110 = arith.constant 0 : index
    %c0_111 = arith.constant 0 : index
    %79 = vector.load %arg5[%c2_108, %c2_109, %c0_110, %c0_111] : memref<3x3x3x64xbf16, #tpu.memory_space<vmem>>, vector<1x1x3x64xbf16>
    %80 = vector.shape_cast %79 : vector<1x1x3x64xbf16> to vector<3x64xbf16>
    %cst_112 = arith.constant dense<0.000000e+00> : vector<256x64xf32>
    %81 = tpu.matmul %78, %80, %cst_112 {dimension_numbers = #tpu.dot_dimension_numbers<[1], [0], [0], [1], [0, 0, 1, 1], [], []>} : vector<256x3xbf16>, vector<3x64xbf16>, vector<256x64xf32> -> vector<256x64xf32>
    %c0_113 = arith.constant 0 : index
    %c0_114 = arith.constant 0 : index
    %82 = vector.load %arg9[%c0_113, %c0_114] : memref<256x64xf32, #tpu.memory_space<vmem>>, vector<256x64xf32>
    %83 = arith.addf %82, %81 : vector<256x64xf32>
    %c0_115 = arith.constant 0 : index
    %c0_116 = arith.constant 0 : index
    %84 = vector.load %arg9[%c0_115, %c0_116] : memref<256x64xf32, #tpu.memory_space<vmem>>, vector<256x64xf32>
    tpu.vector_store %arg9[%c0_115, %c0_116], %83 {strides = array<i32>} : memref<256x64xf32, #tpu.memory_space<vmem>>, vector<256x64xf32>,
    %c0_117 = arith.constant 0 : index
    %c0_118 = arith.constant 0 : index
    %85 = vector.load %arg9[%c0_117, %c0_118] : memref<256x64xf32, #tpu.memory_space<vmem>>, vector<256x64xf32>
    %c0_119 = arith.constant 0 : index
    %c0_120 = arith.constant 0 : index
    %86 = vector.load %arg6[%c0_119, %c0_120] : memref<1x64xf32, #tpu.memory_space<vmem>>, vector<1x64xf32>
    %87 = vector.broadcast %86 : vector<1x64xf32> to vector<256x64xf32>
    %88 = arith.addf %85, %87 : vector<256x64xf32>
    %cst_121 = arith.constant 0.000000e+00 : f32
    %89 = vector.broadcast %cst_121 : f32 to vector<256x64xf32>
    %90 = arith.maximumf %88, %89 : vector<256x64xf32>
    %91 = vector.shape_cast %90 : vector<256x64xf32> to vector<16x16x64xf32>
    %92 = arith.truncf %91 : vector<16x16x64xf32> to vector<16x16x64xbf16>
    %c0_122 = arith.constant 0 : index
    %c0_123 = arith.constant 0 : index
    %c0_124 = arith.constant 0 : index
    %c0_125 = arith.constant 0 : index
    %93 = vector.load %arg7[%c0_122, %c0_123, %c0_124, %c0_125] : memref<1x16x16x64xbf16, #tpu.memory_space<vmem>>, vector<1x16x16x64xbf16>
    %94 = vector.shape_cast %93 : vector<1x16x16x64xbf16> to vector<16x16x64xbf16>
    %95 = vector.shape_cast %92 : vector<16x16x64xbf16> to vector<1x16x16x64xbf16>
    tpu.vector_store %arg7[%c0_122, %c0_123, %c0_124, %c0_125], %95 {strides = array<i32>} : memref<1x16x16x64xbf16, #tpu.memory_space<vmem>>, vector<1x16x16x64xbf16>,
    return
  }
  func.func @transform_0(%arg0: i32, %arg1: i32) -> (i32, i32, i32, i32) {
    %c0_i32 = arith.constant 0 : i32
    %c0_i32_0 = arith.constant 0 : i32
    %c0_i32_1 = arith.constant 0 : i32
    %c0_i32_2 = arith.constant 0 : i32
    return %arg1, %c0_i32, %c0_i32_0, %c0_i32_1 : i32, i32, i32, i32
  }
  func.func @transform_1(%arg0: i32, %arg1: i32) -> (i32, i32) {
    %c0_i32 = arith.constant 0 : i32
    %c0_i32_0 = arith.constant 0 : i32
    %c0_i32_1 = arith.constant 0 : i32
    return %c0_i32, %c0_i32_0 : i32, i32
  }
  func.func @transform_2(%arg0: i32, %arg1: i32) -> (i32, i32) {
    %c0_i32 = arith.constant 0 : i32
    %c0_i32_0 = arith.constant 0 : i32
    %c0_i32_1 = arith.constant 0 : i32
    return %c0_i32, %c0_i32_0 : i32, i32
  }
  func.func @transform_3(%arg0: i32, %arg1: i32) -> (i32, i32, i32, i32) {
    %c0_i32 = arith.constant 0 : i32
    %c0_i32_0 = arith.constant 0 : i32
    %c0_i32_1 = arith.constant 0 : i32
    %c0_i32_2 = arith.constant 0 : i32
    return %c0_i32, %c0_i32_0, %c0_i32_1, %arg0 : i32, i32, i32, i32
  }
  func.func @transform_4(%arg0: i32, %arg1: i32) -> (i32, i32) {
    %c0_i32 = arith.constant 0 : i32
    %c0_i32_0 = arith.constant 0 : i32
    return %c0_i32, %arg0 : i32, i32
  }
  func.func @transform_5(%arg0: i32, %arg1: i32) -> (i32, i32, i32, i32) {
    %c0_i32 = arith.constant 0 : i32
    %c0_i32_0 = arith.constant 0 : i32
    %c0_i32_1 = arith.constant 0 : i32
    return %arg1, %c0_i32, %c0_i32_0, %arg0 : i32, i32, i32, i32
  }
}

</mosaic_0001>

<bundles_post_ra>
// kernel: tpu_custom_call.1
= control target key start
LH: loop header
LB: loop body
LE: loop exit
PB: predicated region body
PF: predicated region fallthrough
CT: control target
= control target key end

     0   :  { %s10389_s0 = inlined_call_operand.hbm [shape: bf16[2,16,16,3], index: 0, kind: input, shape index: {}]   ;;  %s10390_s1 = inlined_call_operand.hbm [shape: f32[1,3], index: 1, kind: input, shape index: {}]   ;;  %s10391_s2 = inlined_call_operand.hbm [shape: f32[1,3], index: 2, kind: input, shape index: {}]   ;;  %s10392_s3 = inlined_call_operand.hbm [shape: bf16[3,3,3,64], index: 3, kind: input, shape index: {}]   ;;  %s10393_s4 = inlined_call_operand.hbm [shape: f32[1,64], index: 4, kind: input, shape index: {}]   ;;  %s10394_s5 = inlined_call_operand.hbm [shape: bf16[2,16,16,64], index: 5, kind: output, shape index: {}]  }
   0x1   :  { %10399 = sst [smem:[#allocation18_spill]] %s10390_s1 }
   0x2   :  { %10 = vsyncpa [#allocation5], 0 }
   0x3   :  { %12 = vsyncpa [#allocation5 + $0x1], 0 }
   0x4   :  { %13 = vsyncpa [#allocation8], 0 }
   0x5   :  { %14 = vsyncpa [#allocation11], 0 }
   0x6   :  { %15 = vsyncpa [#allocation6], 0 }
   0x7   :  { %17 = vsyncpa [#allocation6 + $0x1], 0  ;;  %s8216_s18 = smov 0   ;;  %s8218_s19 = smov 0  }
   0x8   :  { %s8220_s20 = smov 0   ;;  %s8222_s21 = smov 0  }
   0x9   :  { %s8224_s22 = smov 0   ;;  %s8226_s23 = smov 0  }
   0xa LB: > { %s6745_s24 = sadd.s32 4294967295, %s8170_s23   ;;  %s6746_s25 = sadd.s32 4294967294, %s8170_s23   ;;  %s8170_s23 = sphi %s8226_s23, %s23_s23   ;;  %s8166_s22 = sphi %s8224_s22, %s10436_s22   ;;  %s8162_s21 = sphi %s8222_s21, %s10435_s21   ;;  %s8158_s20 = sphi %s8220_s20, %s10434_s20   ;;  %s8154_s19 = sphi %s8218_s19, %s10433_s19   ;;  %s8150_s18 = sphi %s8216_s18, %s10432_s18  }
   0xb   : > { %p55_p0 = scmp.ne.s32.totalorder %s8154_s19, %s8150_s18  ;;  %p8250_p1 = scmp.eq.s32.totalorder %s6745_s24, 0 }
   0xc   : > { %p8254_p2 = scmp.eq.s32.totalorder %s6745_s24, 1  ;;  %p181_p3 = scmp.eq.s32.totalorder %s6746_s25, 1 }
   0xd   : > { %s10400_s26 = scalar_select %p8250_p1, 1, 0 }
   0xe   : > { %s10401_s27 = scalar_select %p8254_p2, 1, 0 }
   0xf   : > { %p8260_p4 = por %p8250_p1, %p55_p0  ;;  %p6747_p5 = scmp.ge.s32.totalorder %s8170_s23, 1 }
  0x10   : > { %p8265_p6 = por %p181_p3, %p55_p0  ;;  %p188_p7 = scmp.lt.s32.totalorder %s8170_s23, 3 }
  0x11   : > { %s10402_s28 = scalar_select %p8260_p4, 1, 0 }
  0x12   : > { %s10403_s29 = scalar_select %p8265_p6, 1, 0 }
  0x13   : > { %p8270_p8 = pnand %p6747_p5, %p188_p7  ;;  %s8172_s6 = smov [#allocation7]  }
  0x14   : > { %s201_s7 = sshll.u32 %s8172_s6, 4  ;;  %s8173_s8 = smov [#allocation10]   ;;  %s202_s7 = int_to_ptr.vmem [resolvable:$true] %s201_s7 }
  0x15   : > { %s10404_s30 = scalar_select %p8270_p8, 1, 0 }
  0x16   : > { %p7797_p10 = pneg %p8270_p8  ;;  %s224_s9 = sshll.u32 %s8173_s8, 4  ;;  %s8283_s9 = int_to_ptr.vmem [resolvable:$true] %s224_s9 }
  0x17   : > { %s8174_s11 = smov [#allocation9]   ;;  %s10406_s1 = sld [smem:[#allocation18_spill]] }
  0x18   : > { %p8279_p11 = pnand %p7797_p10, %p8250_p1  ;;  %s8285_s12 = sshll.u32 %s8174_s11, 4  ;;  %s213_s12 = int_to_ptr.vmem [resolvable:$true] %s8285_s12 }
  0x1a   : > { %p8295_p13 = pneg %p8279_p11 }
  0x1d   : > { %s7938_s15 = scalar_lea.hbm %s10406_s1, 16 }
  0x1e   : > { %p7939_p12 = scmp.ne.s32.totalorder %s10406_s1, %s7938_s15  ;;  %p7945_p5 = scmp.lt.u32.totalorder %s7938_s15, %s10406_s1 }
  0x20   : > { %p7941_p0 = pnand %p8295_p13, %p7939_p12 }
  0x22   : > { %p7942_p3 = pneg %p7941_p0 }
  0x24   : > { %p7947_p7 = pnand %p7945_p5, %p7942_p3 }
  0x26   : > { %7950 = shalt.err (!%p7947_p7)
}
  0x27   : > { %s7951_s8 = scalar_lea.vmem %s202_s7, 16  ;;  %s7958_s11 = scalar_lea.vmem %s202_s7, 32 }
  0x28   : > { %p7952_p10 = scmp.ne.s32.totalorder %s202_s7, %s7951_s8  ;;  %p7959_p1 = scmp.lt.s32.totalorder %s202_s7, %s202_s7 }
  0x29   : > { %p7960_p4 = scmp.lt.s32.totalorder %s7958_s11, %s7951_s8 }
  0x2a   : > { %p7954_p9 = pnand %p7952_p10, %p8295_p13 }
  0x2b   : > { %p7961_p8 = por %p7960_p4, %p7959_p1 }
  0x2c   : > { %p7955_p6 = pneg %p7954_p9 }
  0x2e   : > { %p7962_p2 = pnand %p7961_p8, %p7955_p6 }
  0x30   : > { %7965 = shalt.err (!%p7962_p2)
}
  0x31   : > { %7800 = dma.hbm_to_vmem [thread:$0]  (!%p8279_p11), %s10406_s1, 16, %s202_s7, [#allocation8]  }
  0x32   : > { %s7966_s17 = scalar_lea.hbm %s10392_s3, 288 }
  0x33   : > { %p7967_p9 = scmp.ne.s32.totalorder %s10392_s3, %s7966_s17  ;;  %p7973_p2 = scmp.lt.u32.totalorder %s7966_s17, %s10392_s3 }
  0x35   : > { %p7969_p12 = pnand %p7967_p9, %p8295_p13 }
  0x37   : > { %p7970_p1 = pneg %p7969_p12 }
  0x39   : > { %p7975_p4 = pnand %p7973_p2, %p7970_p1 }
  0x3b   : > { %7978 = shalt.err (!%p7975_p4)
}
  0x3c   : > { %s7979_s7 = scalar_lea.vmem %s8283_s9, 288  ;;  %p7987_p3 = scmp.lt.s32.totalorder %s8283_s9, %s8283_s9 }
  0x3d   : > { %p7980_p6 = scmp.ne.s32.totalorder %s8283_s9, %s7979_s7  ;;  %p7988_p5 = scmp.lt.s32.totalorder %s7979_s7, %s7979_s7 }
  0x3f   : > { %p7982_p8 = pnand %p7980_p6, %p8295_p13  ;;  %p7989_p7 = por %p7988_p5, %p7987_p3 }
  0x41   : > { %p7983_p0 = pneg %p7982_p8 }
  0x43   : > { %p7990_p10 = pnand %p7989_p7, %p7983_p0 }
  0x45   : > { %7993 = shalt.err (!%p7990_p10)
}
  0x46   : > { %s8175_s13 = smov 32   ;;  %s8176_s14 = smov 2  }
  0x47   : > { %7806 = dma.hbm_to_vmem [thread:$0]  (!%p8279_p11), %s10392_s3, 288, %s8283_s9, [#allocation11], %s8175_s13, %s8175_s13, %s8176_s14  }
  0x48   : > { %s7994_s6 = scalar_lea.hbm %s10391_s2, 16 }
  0x49   : > { %p7995_p9 = scmp.ne.s32.totalorder %s10391_s2, %s7994_s6  ;;  %p8001_p2 = scmp.lt.u32.totalorder %s7994_s6, %s10391_s2 }
  0x4b   : > { %p7997_p12 = pnand %p7995_p9, %p8295_p13 }
  0x4d   : > { %p7998_p1 = pneg %p7997_p12 }
  0x4f   : > { %p8003_p4 = pnand %p8001_p2, %p7998_p1 }
  0x51   : > { %8006 = shalt.err (!%p8003_p4)
}
  0x52   : > { %s8007_s15 = scalar_lea.vmem %s213_s12, 16  ;;  %s8014_s9 = scalar_lea.vmem %s213_s12, 32 }
  0x53   : > { %p8008_p6 = scmp.ne.s32.totalorder %s213_s12, %s8007_s15  ;;  %p8015_p3 = scmp.lt.s32.totalorder %s213_s12, %s213_s12 }
  0x54   : > { %p8016_p5 = scmp.lt.s32.totalorder %s8014_s9, %s8007_s15 }
  0x55   : > { %p8010_p8 = pnand %p8008_p6, %p8295_p13 }
  0x56   : > { %p8017_p7 = por %p8016_p5, %p8015_p3 }
  0x57   : > { %p8011_p0 = pneg %p8010_p8 }
  0x59   : > { %p8018_p10 = pnand %p8017_p7, %p8011_p0 }
  0x5b   : > { %8021 = shalt.err (!%p8018_p10)
}
  0x5c   : > { %7803 = dma.hbm_to_vmem [thread:$0]  (!%p8279_p11), %s10391_s2, 16, %s213_s12, [#allocation8]  }
  0x5d   : > { %s8177_s1 = smov [#allocation12]   ;;  %s8022_s6 = scalar_lea.hbm %s10393_s4, 16 }
  0x5e   : > { %s240_s16 = sshll.u32 %s8177_s1, 4  ;;  %p8023_p9 = scmp.ne.s32.totalorder %s10393_s4, %s8022_s6  ;;  %s241_s16 = int_to_ptr.vmem [resolvable:$true] %s240_s16 }
  0x5f   : > { %p8029_p2 = scmp.lt.u32.totalorder %s8022_s6, %s10393_s4 }
  0x60   : > { %p8025_p12 = pnand %p8023_p9, %p8295_p13 }
  0x62   : > { %p8026_p1 = pneg %p8025_p12 }
  0x64   : > { %p8031_p4 = pnand %p8029_p2, %p8026_p1 }
  0x66   : > { %8034 = shalt.err (!%p8031_p4)
}
  0x67   : > { %s8035_s12 = scalar_lea.vmem %s241_s16, 16  ;;  %s8042_s9 = scalar_lea.vmem %s241_s16, 32 }
  0x68   : > { %p8036_p6 = scmp.ne.s32.totalorder %s241_s16, %s8035_s12  ;;  %p8043_p3 = scmp.lt.s32.totalorder %s241_s16, %s241_s16 }
  0x69   : > { %p8044_p5 = scmp.lt.s32.totalorder %s8042_s9, %s8035_s12 }
  0x6a   : > { %p8038_p8 = pnand %p8036_p6, %p8295_p13 }
  0x6b   : > { %p8045_p7 = por %p8044_p5, %p8043_p3 }
  0x6c   : > { %p8039_p0 = pneg %p8038_p8 }
  0x6e   : > { %p8046_p10 = pnand %p8045_p7, %p8039_p0 }
  0x70   : > { %8049 = shalt.err (!%p8046_p10)
}
  0x71   : > { %7809 = dma.hbm_to_vmem [thread:$0]  (!%p8279_p11), %s10393_s4, 16, %s241_s16, [#allocation11]  }
  0x72   : > { %s32_s24 = sadd.s32 1, %s8166_s22  ;;  %s42_s1 = sadd.s32 1, %s8158_s20 }
  0x73   : > { %p33_p13 = scmp.ge.s32.totalorder %s32_s24, 2  ;;  %p49_p9 = scmp.ne.s32.totalorder %s8158_s20, %s8154_s19 }
  0x74   : > { %p50_p12 = scmp.eq.s32.totalorder %s8170_s23, 0  ;;  %p7822_p1 = scmp.lt.s32.totalorder %s8170_s23, 2 }
  0x75   : > { %s10438_s24 = smov (%p33_p13, %s32_s24), 0  ;;  %p10408_p4 = scmp.ne.s32.totalorder %s10401_s27, 0 }
  0x76   : > { %p51_p2 = por %p50_p12, %p49_p9  ;;  %s39_s17 = ssub.s32 %s8166_s22, %s10438_s24 }
  0x77   : > { %p8381_p6 = por %p10408_p4, %p49_p9  ;;  %s251_s25 = sand.u32 1, %s8158_s20  }
  0x78   : > { %p40_p8 = scmp.eq.s32.totalorder %s39_s17, 0  ;;  %s6753_s16 = sshll.u32 %s251_s25, 7 }
  0x79   : > { %s7171_s6 = sshll.u32 %s8166_s22, 11  ;;  %s255_s27 = scalar_lea.vmem [#allocation4], %s6753_s16 }
  0x7a   : > { %s8390_s8 = scalar_select %p40_p8, %s8158_s20, %s42_s1  }
  0x7b   : > { %s8395_s15 = scalar_lea.hbm %s10389_s0, %s7171_s6  ;;  %s262_s12 = sshll.u32 %s255_s27, 4  ;;  %s8403_s12 = int_to_ptr.vmem [resolvable:$true] %s262_s12 }
  0x7c   : > { %p8399_p11 = pnand %p7822_p1, %p51_p2  ;;  %s8405_s13 = scalar_lea.sflag [#allocation5], %s251_s25 }
  0x7d   : > { %s8050_s14 = scalar_lea.hbm %s8395_s15, 2048  ;;  %s8055_s16 = scalar_lea.hbm %s10389_s0, 4096 }
  0x7e   : > { %p8051_p0 = scmp.ne.s32.totalorder %s8395_s15, %s8050_s14  ;;  %p8052_p3 = pneg %p8399_p11 }
  0x7f   : > { %p8056_p10 = scmp.lt.u32.totalorder %s8395_s15, %s10389_s0  ;;  %p8057_p13 = scmp.lt.u32.totalorder %s8055_s16, %s8050_s14 }
  0x80   : > { %p8053_p5 = pnand %p8052_p3, %p8051_p0  ;;  %p8059_p12 = scmp.lt.u32.totalorder %s8050_s14, %s8395_s15 }
  0x81   : > { %p8058_p9 = por %p8057_p13, %p8056_p10 }
  0x82   : > { %p8054_p7 = pneg %p8053_p5 }
  0x83   : > { %p8060_p1 = por %p8059_p12, %p8058_p9 }
  0x85   : > { %p8061_p2 = pnand %p8060_p1, %p8054_p7 }
  0x87   : > { %8064 = shalt.err (!%p8061_p2)
}
  0x88   : > { %s8065_s25 = scalar_lea.vmem %s8403_s12, 2048  ;;  %s8178_s7 = smov [#allocation4]  }
  0x89   : > { %p8066_p4 = scmp.ne.s32.totalorder %s8403_s12, %s8065_s25  ;;  %s8070_s27 = sshll.u32 %s8178_s7, 4  ;;  %s8071_s27 = int_to_ptr.vmem [resolvable:$false] %s8070_s27 }
  0x8a   : > { %s8072_s1 = scalar_lea.vmem %s8071_s27, 4096  ;;  %p8073_p5 = scmp.lt.s32.totalorder %s8403_s12, %s8071_s27 }
  0x8b   : > { %p8068_p8 = pnand %p8066_p4, %p8052_p3  ;;  %p8074_p10 = scmp.lt.s32.totalorder %s8072_s1, %s8065_s25 }
  0x8d   : > { %p8069_p0 = pneg %p8068_p8  ;;  %p8075_p13 = por %p8074_p10, %p8073_p5 }
  0x8f   : > { %p8076_p9 = pnand %p8075_p13, %p8069_p0 }
  0x91   : > { %8079 = shalt.err (!%p8076_p9)
}
  0x92   : > { %s8179_s14 = smov 64   ;;  %s8180_s17 = smov 4  }
  0x93   : > { %7813 = dma.hbm_to_vmem [thread:$0]  (!%p8399_p11), %s8395_s15, 2048, %s8403_s12, %s8405_s13, %s8179_s14, %s8179_s14, %s8180_s17  }
  0x94   : > { %p10411_p3 = scmp.ne.s32.totalorder %s10404_s30, 0 }
  0x95   : > { %s8436_s16 = sand.u32 (!%p10411_p3), 1, %s8154_s19   ;;  %p10412_p7 = scmp.ne.s32.totalorder (!%p10411_p3), %s10402_s28, 0 }
  0x96   : > { %274 = sbr.rel (%p10411_p3) target bundleno = 822 (0x336), region = 40  ;;  %s6757_s6 = sshll.u32 (!%p10411_p3), %s8436_s16, 7 }
  0x97   : > { %s277_s11 = scalar_lea.sflag (!%p10411_p3), [#allocation5], %s8436_s16  ;;  %s8442_s25 = scalar_lea.vmem (!%p10411_p3), [#allocation4], %s6757_s6 }
  0x9d   : > { %8133 = dma.done.wait (%p10412_p7), %s277_s11, 2048  }
  0x9e   : > { %8135 = vsyncadd (%p10412_p7), %s277_s11, 4294965248  ;;  %p10413_p11 = scmp.ne.s32.totalorder %s10400_s26, 0 }
  0xa0   : > { %8137 = dma.done.wait (%p10413_p11), [#allocation8], 32  }
  0xa1   : > { %8139 = vsyncadd (%p10413_p11), [#allocation8], 4294967264 }
  0xa2   : > { %8141 = dma.done.wait (%p10413_p11), [#allocation11], 304  }
  0xa3   : > { %8143 = vsyncadd (%p10413_p11), [#allocation11], 4294966992  ;;  %vm1221_vm0 = vcmask 1040384   ;;  %vm482_vm1 = vcmask 19456   ;;  %vm485_vm2 = vcmask 16384   ;;  %vm1222_vm3 = vcmask 1041408  }
  0xa4   : > { %v8181_v0 = vmov 65535   ;;  %v8182_v2 = vmov 0   ;;  %v1091_v4 = vld [vmem:[#allocation10] sm:$0x3]  ;;  %v7307_v5 = vld [vmem:[%s8442_s25 + $0x38] sm:$0xff]   ;;  %vm1172_vm7 = vcmask 23552  }
  0xa5   : > { %v1223_v1 = vsel %vm1221_vm0, 4294967295, %v8181_v0  ;;  %508 = vst.msk [vmem:[#allocation2 + $0x60] sm:$0xf] %vm482_vm1, %v8182_v2  ;;  %509 = vst.msk [vmem:[#allocation2 + $0x64] sm:$0xf] %vm482_vm1, %v8182_v2  ;;  %v7267_v8 = vunpack.c.l.bf16 %v7307_v5  ;;  %v7268_v9 = vunpack.c.h.bf16 %v7307_v5  ;;  %v7308_v11 = vld [vmem:[%s8442_s25 + $0x40] sm:$0xff]  }
  0xa6   : > { %483 = vst.msk [vmem:[#allocation2] sm:$0xf] %vm482_vm1, %v8182_v2  ;;  %484 = vst.msk [vmem:[#allocation2 + $0x4] sm:$0xf] %vm482_vm1, %v8182_v2  ;;  %v8511_v3 = vsel %vm1222_vm3, %v1223_v1, 0  ;;  %v7271_v14 = vunpack.c.l.bf16 %v7308_v11  ;;  %v7272_v15 = vunpack.c.h.bf16 %v7308_v11  ;;  %v7238_v19 = vld [vmem:[%s8442_s25] sm:$0xff]  }
  0xa7   : > { %486 = vst.msk [vmem:[#allocation2 + $0x8] sm:$0x1] %vm485_vm2, %v8182_v2  ;;  %489 = vst.msk [vmem:[#allocation2 + $0x14] sm:$0x1] %vm485_vm2, %v8182_v2  ;;  %v8514_v6 = vld [vmem:[#allocation7] ss:$0 sm:$0xff]  ;;  %v1226_v7 = vand.u32 %v8511_v3, %v1091_v4  ;;  %v7239_v22 = vunpack.c.l.bf16 %v7238_v19  ;;  %v7240_v23 = vunpack.c.h.bf16 %v7238_v19 }
  0xa8   : > { %487 = vst.msk [vmem:[#allocation2 + $0xc] sm:$0xf] %vm482_vm1, %v8182_v2  ;;  %488 = vst.msk [vmem:[#allocation2 + $0x10] sm:$0xf] %vm482_vm1, %v8182_v2  ;;  %vm618_vm4 = vsmask.f32 256  ;;  %v409_v16 = vmul.f32 %v7267_v8, %v8514_v6  ;;  %v410_v17 = vmul.f32 %v7268_v9, %v8514_v6  ;;  %v411_v20 = vmul.f32 %v7271_v14, %v8514_v6 }
  0xa9   : > { %490 = vst.msk [vmem:[#allocation2 + $0x18] sm:$0xf] %vm482_vm1, %v8182_v2  ;;  %491 = vst.msk [vmem:[#allocation2 + $0x1c] sm:$0xf] %vm482_vm1, %v8182_v2  ;;  %vm619_vm5 = vsmask.f32 4368  ;;  %7775 = vmatprep.subr.bf16.mxu1 %v1226_v7  ;;  %7469 = vmatprep.subr.bf16.mxu0 %v1226_v7  ;;  %v412_v21 = vmul.f32 %v7272_v15, %v8514_v6  ;;  %v395_v31 = vmul.f32 %v7239_v22, %v8514_v6 }
  0xaa   : > { %492 = vst.msk [vmem:[#allocation2 + $0x20] sm:$0x1] %vm485_vm2, %v8182_v2  ;;  %495 = vst.msk [vmem:[#allocation2 + $0x2c] sm:$0x1] %vm485_vm2, %v8182_v2  ;;  %v1858_v10 = vld [vmem:[#allocation10 + $0x2] sm:$0x3]  ;;  %7776 = vmatpush3.bf16.msra.mxu1 %v1226_v7  ;;  %7470 = vmatpush3.bf16.msra.mxu0 %v1226_v7  ;;  %v396_v32 = vmul.f32 %v7240_v23, %v8514_v6 }
  0xab   : > { %493 = vst.msk [vmem:[#allocation2 + $0x24] sm:$0xf] %vm482_vm1, %v8182_v2  ;;  %494 = vst.msk [vmem:[#allocation2 + $0x28] sm:$0xf] %vm482_vm1, %v8182_v2  ;;  %v8518_v12 = vld [vmem:[#allocation9] ss:$0 sm:$0xff]  ;;  %v8521_v13 = vand.u32 %v1858_v10, %v8511_v3 }
  0xac   : > { %496 = vst.msk [vmem:[#allocation2 + $0x30] sm:$0xf] %vm482_vm1, %v8182_v2  ;;  %497 = vst.msk [vmem:[#allocation2 + $0x34] sm:$0xf] %vm482_vm1, %v8182_v2  ;;  %vm943_vm6 = vsmask.f32 7938  ;;  %v448_v25 = vadd.f32 %v8518_v12, %v409_v16  ;;  %v449_v26 = vadd.f32 %v8518_v12, %v410_v17  ;;  %v450_v29 = vadd.f32 %v8518_v12, %v411_v20 }
  0xad   : > { %498 = vst.msk [vmem:[#allocation2 + $0x38] sm:$0x1] %vm485_vm2, %v8182_v2  ;;  %501 = vst.msk [vmem:[#allocation2 + $0x44] sm:$0x1] %vm485_vm2, %v8182_v2  ;;  %v7890_v18 = vld [vmem:[#allocation2] sm:$0xff]   ;;  %7503 = vmatprep.subr.bf16.mxu1 %v8521_v13  ;;  %v451_v30 = vadd.f32 %v8518_v12, %v412_v21  ;;  %v434_v39 = vadd.f32 %v8518_v12, %v395_v31  ;;  %v435_v40 = vadd.f32 %v8518_v12, %v396_v32  ;;  %v7310_v7 = vld [vmem:[%s8442_s25 + $0x50] sm:$0xff]  }
  0xae   : > { %499 = vst.msk [vmem:[#allocation2 + $0x3c] sm:$0xf] %vm482_vm1, %v8182_v2  ;;  %500 = vst.msk [vmem:[#allocation2 + $0x40] sm:$0xf] %vm482_vm1, %v8182_v2  ;;  %v7309_v24 = vld [vmem:[%s8442_s25 + $0x48] sm:$0xff]   ;;  %7471 = vmatprep.mubr.msk.bf16.mxu0 %vm1172_vm7, %v7890_v18  ;;  %v7186_v33 = vpack.c.bf16 %v448_v25, %v448_v25  ;;  %v7187_v34 = vpack.c.bf16 %v449_v26, %v449_v26  ;;  %v7188_v37 = vpack.c.bf16 %v450_v29, %v450_v29  ;;  %vm2311_vm13 = vcmask 1042432  }
  0xaf   : > { %502 = vst.msk [vmem:[#allocation2 + $0x48] sm:$0xf] %vm482_vm1, %v8182_v2  ;;  %503 = vst.msk [vmem:[#allocation2 + $0x4c] sm:$0xf] %vm482_vm1, %v8182_v2  ;;  %v7275_v27 = vunpack.c.l.bf16 %v7309_v24  ;;  %v7276_v28 = vunpack.c.h.bf16 %v7309_v24  ;;  %v7189_v38 = vpack.c.bf16 %v451_v30, %v451_v30  ;;  %v7172_v52 = vpack.c.bf16 %v434_v39, %v434_v39  ;;  %v996_v55 = vld [vmem:[#allocation2 + $0x60] sm:$0xf] }
  0xb0   : > { %504 = vst.msk [vmem:[#allocation2 + $0x50] sm:$0x1] %vm485_vm2, %v8182_v2  ;;  %507 = vst.msk [vmem:[#allocation2 + $0x5c] sm:$0x1] %vm485_vm2, %v8182_v2  ;;  %v741_v41 = vshrl.u32 %v7186_v33, 16  ;;  %v744_v42 = vshll.u32 %v7186_v33, 16  ;;  %v7173_v53 = vpack.c.bf16 %v435_v40, %v435_v40  ;;  %v7279_v23 = vunpack.c.l.bf16 %v7310_v7 }
  0xb1   : > { %505 = vst.msk [vmem:[#allocation2 + $0x54] sm:$0xf] %vm482_vm1, %v8182_v2  ;;  %506 = vst.msk [vmem:[#allocation2 + $0x58] sm:$0xf] %vm482_vm1, %v8182_v2  ;;  %v413_v35 = vmul.f32 %v7275_v27, %v8514_v6  ;;  %v414_v36 = vmul.f32 %v7276_v28, %v8514_v6  ;;  %v749_v43 = vshrl.u32 %v7187_v34, 16  ;;  %v752_v44 = vshll.u32 %v7187_v34, 16 }
  0xb2   : > { %510 = vst.msk [vmem:[#allocation2 + $0x68] sm:$0x1] %vm485_vm2, %v8182_v2  ;;  %513 = vst.msk [vmem:[#allocation2 + $0x74] sm:$0x1] %vm485_vm2, %v8182_v2  ;;  %v758_v45 = vshrl.u32 %v7188_v37, 16  ;;  %v761_v46 = vshll.u32 %v7188_v37, 16  ;;  %v7280_v26 = vunpack.c.h.bf16 %v7310_v7 }
  0xb3   : > { %511 = vst.msk [vmem:[#allocation2 + $0x6c] sm:$0xf] %vm482_vm1, %v8182_v2  ;;  %512 = vst.msk [vmem:[#allocation2 + $0x70] sm:$0xf] %vm482_vm1, %v8182_v2  ;;  %v766_v47 = vshrl.u32 %v7189_v38, 16  ;;  %v769_v48 = vshll.u32 %v7189_v38, 16  ;;  %v452_v58 = vadd.f32 %v8518_v12, %v413_v35  ;;  %v453_v59 = vadd.f32 %v8518_v12, %v414_v36 }
  0xb4   : > { %514 = vst.msk [vmem:[#allocation2 + $0x78] sm:$0xf] %vm482_vm1, %v8182_v2  ;;  %515 = vst.msk [vmem:[#allocation2 + $0x7c] sm:$0xf] %vm482_vm1, %v8182_v2  ;;  %v743_v50 = vrot.slane %v741_v41, 7  ;;  %v8547_v51 = vrot.slane %v749_v43, 7  ;;  %v415_v41 = vmul.f32 %v7279_v23, %v8514_v6 }
  0xb5   : > { %516 = vst.msk [vmem:[#allocation2 + $0x80] sm:$0x1] %vm485_vm2, %v8182_v2  ;;  %519 = vst.msk [vmem:[#allocation2 + $0x8c] sm:$0x1] %vm485_vm2, %v8182_v2  ;;  %v760_v56 = vrot.slane %v758_v45, 7  ;;  %v8555_v57 = vrot.slane %v766_v47, 7  ;;  %v7190_v21 = vpack.c.bf16 %v452_v58, %v452_v58  ;;  %v7191_v22 = vpack.c.bf16 %v453_v59, %v453_v59 }
  0xb6   : > { %517 = vst.msk [vmem:[#allocation2 + $0x84] sm:$0xf] %vm482_vm1, %v8182_v2  ;;  %518 = vst.msk [vmem:[#allocation2 + $0x88] sm:$0xf] %vm482_vm1, %v8182_v2  ;;  %v746_v60 = vor.u32 %v744_v42, %v743_v50  ;;  %v747_v61 = vrot.slane %v743_v50, 4  ;;  %v754_v62 = vor.u32 %v752_v44, %v8547_v51  ;;  %v756_v63 = vrot.slane %v8547_v51, 4 }
  0xb7   : > { %520 = vst.msk [vmem:[#allocation2 + $0x90] sm:$0xf] %vm482_vm1, %v8182_v2  ;;  %521 = vst.msk [vmem:[#allocation2 + $0x94] sm:$0xf] %vm482_vm1, %v8182_v2  ;;  %v763_v1 = vor.u32 %v761_v46, %v760_v56  ;;  %v771_v4 = vor.u32 %v769_v48, %v8555_v57  ;;  %v773_v5 = vrot.slane %v8555_v57, 4  ;;  %v622_v10 = vshrl.u32 %v7172_v52, 16 }
  0xb8   : > { %522 = vst.msk [vmem:[#allocation2 + $0x98] sm:$0x1] %vm485_vm2, %v8182_v2  ;;  %525 = vst.msk [vmem:[#allocation2 + $0xa4] sm:$0x1] %vm485_vm2, %v8182_v2  ;;  %v625_v11 = vshll.u32 %v7172_v52, 16  ;;  %v7301_v15 = vld [vmem:[%s8442_s25 + $0x8] sm:$0xff]   ;;  %v416_v42 = vmul.f32 %v7280_v26, %v8514_v6 }
  0xb9   : > { %523 = vst.msk [vmem:[#allocation2 + $0x9c] sm:$0xf] %vm482_vm1, %v8182_v2  ;;  %524 = vst.msk [vmem:[#allocation2 + $0xa0] sm:$0xf] %vm482_vm1, %v8182_v2  ;;  %v2427_v14 = vld [vmem:[#allocation10 + $0x4] sm:$0x3]  ;;  %v7243_v28 = vunpack.c.l.bf16 %v7301_v15  ;;  %v7244_v47 = vunpack.c.h.bf16 %v7301_v15 }
  0xba   : > { %526 = vst.msk [vmem:[#allocation2 + $0xa8] sm:$0xf] %vm482_vm1, %v8182_v2  ;;  %527 = vst.msk [vmem:[#allocation2 + $0xac] sm:$0xf] %vm482_vm1, %v8182_v2  ;;  %v1003_v0 = vld [vmem:[#allocation2 + $0x6c] sm:$0xf]  ;;  %v8576_v27 = vand.u32 %v2427_v14, %v8511_v3 }
  0xbb   : > { %528 = vst.msk [vmem:[#allocation2 + $0xb0] sm:$0x1] %vm485_vm2, %v8182_v2  ;;  %531 = vst.msk [vmem:[#allocation2 + $0xbc] sm:$0x1] %vm485_vm2, %v8182_v2  ;;  %v630_v18 = vshrl.u32 %v7173_v53, 16  ;;  %v633_v19 = vshll.u32 %v7173_v53, 16 }
  0xbc   : > { %529 = vst.msk [vmem:[#allocation2 + $0xb4] sm:$0xf] %vm482_vm1, %v8182_v2  ;;  %530 = vst.msk [vmem:[#allocation2 + $0xb8] sm:$0xf] %vm482_vm1, %v8182_v2  ;;  %v624_v20 = vrot.slane %v622_v10, 7  ;;  %v775_v33 = vshrl.u32 %v7190_v21, 16  ;;  %7537 = vmatprep.subr.bf16.mxu0 %v8576_v27 }
  0xbd   : > { %532 = vst.msk [vmem:[#allocation2 + $0xc0] sm:$0xf] %vm482_vm1, %v8182_v2  ;;  %533 = vst.msk [vmem:[#allocation2 + $0xc4] sm:$0xf] %vm482_vm1, %v8182_v2  ;;  %v632_v24 = vrot.slane %v630_v18, 7  ;;  %v778_v34 = vshll.u32 %v7190_v21, 16 }
  0xbe   : > { %534 = vst.msk [vmem:[#allocation2 + $0xc8] sm:$0x1] %vm485_vm2, %v8182_v2  ;;  %537 = vst.msk [vmem:[#allocation2 + $0xd4] sm:$0x1] %vm485_vm2, %v8182_v2  ;;  %v945_v25 = vld [vmem:[#allocation2 + $0xc] sm:$0xf]  ;;  %v627_v30 = vor.u32 %v625_v11, %v624_v20 }
  0xbf   : > { %535 = vst.msk [vmem:[#allocation2 + $0xcc] sm:$0xf] %vm482_vm1, %v8182_v2  ;;  %536 = vst.msk [vmem:[#allocation2 + $0xd0] sm:$0xf] %vm482_vm1, %v8182_v2  ;;  %v764_v2 = vrot.slane %v760_v56, 4  ;;  %v628_v31 = vrot.slane %v624_v20, 4  ;;  %v635_v35 = vor.u32 %v633_v19, %v632_v24  ;;  %v455_v56 = vadd.f32 %v8518_v12, %v416_v42 }
  0xc0   : > { %vm8543_vm8 = vmor %vm618_vm4, %vm619_vm5  ;;  %v951_v32 = vld [vmem:[#allocation2 + $0x14] sm:$0x1]  ;;  %v637_v36 = vrot.slane %v632_v24, 4  ;;  %v783_v37 = vshrl.u32 %v7191_v22, 16  ;;  %v786_v38 = vshll.u32 %v7191_v22, 16  ;;  %v777_v40 = vrot.slane %v775_v33, 7 }
  0xc1   : > { %vm8551_vm9 = vmand %vm482_vm1, %vm943_vm6  ;;  %v755_v8 = vsel %vm8543_vm8, %v747_v61, %v754_v62  ;;  %v772_v16 = vsel %vm8543_vm8, %v764_v2, %v771_v4  ;;  %v636_v43 = vsel %vm8543_vm8, %v628_v31, %v635_v35  ;;  %v1010_v46 = vld [vmem:[#allocation2 + $0x78] sm:$0xf]  ;;  %v7302_v48 = vld [vmem:[%s8442_s25 + $0x10] sm:$0xff]   ;;  %v397_v61 = vmul.f32 %v7243_v28, %v8514_v6  ;;  %s10195_s26 = scalar_lea.vmem [#allocation13], %s6757_s6  ;;  %s7236_s28 = sshll.u32 %s8162_s21, 11 }
  0xc2   : > { %v997_v9 = vsel %vm8551_vm9, %v746_v60, %v996_v55  ;;  %999 = vst.msk [vmem:[#allocation2 + $0x64] sm:$0xf] %vm482_vm1, %v755_v8  ;;  %v1004_v17 = vsel %vm8551_vm9, %v763_v1, %v1003_v0  ;;  %1006 = vst.msk [vmem:[#allocation2 + $0x70] sm:$0xf] %vm482_vm1, %v772_v16  ;;  %v946_v39 = vsel %vm8551_vm9, %v627_v30, %v945_v25  ;;  %v8593_v45 = vrot.slane %v783_v37, 7  ;;  %v7311_v11 = vld [vmem:[%s8442_s25 + $0x58] sm:$0xff]   ;;  %s10332_s9 = scalar_lea.hbm %s10394_s5, %s7236_s28 }
  0xc3   : > { %998 = vst [vmem:[#allocation2 + $0x60] sm:$0xf] %v997_v9  ;;  %1005 = vst [vmem:[#allocation2 + $0x6c] sm:$0xf] %v1004_v17  ;;  %v780_v52 = vor.u32 %v778_v34, %v777_v40  ;;  %v781_v53 = vrot.slane %v777_v40, 4  ;;  %v454_v55 = vadd.f32 %v8518_v12, %v415_v41  ;;  %v398_v62 = vmul.f32 %v7244_v47, %v8514_v6  ;;  %v7312_v47 = vld [vmem:[%s8442_s25 + $0x60] sm:$0xff]  }
  0xc4   : > { %vm8580_vm10 = vmand %vm485_vm2, %vm618_vm4  ;;  %947 = vst [vmem:[#allocation2 + $0xc] sm:$0xf] %v946_v39  ;;  %v788_v59 = vor.u32 %v786_v38, %v8593_v45  ;;  %v790_v60 = vrot.slane %v8593_v45, 4  ;;  %v7193_v2 = vpack.c.bf16 %v455_v56, %v455_v56  ;;  %v7247_v4 = vunpack.c.l.bf16 %v7302_v48  ;;  %v1017_v24 = vld [vmem:[#allocation2 + $0x84] sm:$0xf]  ;;  %s6620_s30 = sshll.u32 %s10195_s26, 4  ;;  %s10334_s30 = int_to_ptr.vmem [resolvable:$true] %s6620_s30 }
  0xc5   : > { %v952_v44 = vsel %vm8580_vm10, %v637_v36, %v951_v32  ;;  %948 = vst.msk [vmem:[#allocation2 + $0x10] sm:$0xf] %vm482_vm1, %v636_v43  ;;  %v1011_v0 = vsel %vm8551_vm9, %v780_v52, %v1010_v46  ;;  %v7192_v1 = vpack.c.bf16 %v454_v55, %v454_v55  ;;  %v436_v8 = vadd.f32 %v8518_v12, %v397_v61  ;;  %v954_v43 = vld [vmem:[#allocation2 + $0x18] sm:$0xf]  ;;  %v7303_v61 = vld [vmem:[%s8442_s25 + $0x18] sm:$0xff]   ;;  %s6606_s21 = scalar_lea.sflag [#allocation6], %s8436_s16 }
  0xc6   : > { %953 = vst [vmem:[#allocation2 + $0x14] sm:$0x1] %v952_v44  ;;  %v789_v7 = vsel %vm8543_vm8, %v781_v53, %v788_v59  ;;  %1012 = vst [vmem:[#allocation2 + $0x78] sm:$0xf] %v1011_v0  ;;  %v437_v9 = vadd.f32 %v8518_v12, %v398_v62  ;;  %v7248_v10 = vunpack.c.h.bf16 %v7302_v48  ;;  %v800_v16 = vshrl.u32 %v7193_v2, 16  ;;  %s8080_s13 = scalar_lea.vmem %s10334_s30, 2048 }
  0xc7   : > { %1013 = vst.msk [vmem:[#allocation2 + $0x7c] sm:$0xf] %vm482_vm1, %v789_v7  ;;  %v792_v14 = vshrl.u32 %v7192_v1, 16  ;;  %v795_v15 = vshll.u32 %v7192_v1, 16  ;;  %v803_v17 = vshll.u32 %v7193_v2, 16  ;;  %v7174_v18 = vpack.c.bf16 %v436_v8, %v436_v8  ;;  %p8081_p12 = scmp.ne.s32.totalorder %s10334_s30, %s8080_s13  ;;  %s8183_s7 = smov [#allocation13]  }
  0xc8   : > { %v7175_v19 = vpack.c.bf16 %v437_v9, %v437_v9  ;;  %v399_v20 = vmul.f32 %v7247_v4, %v8514_v6  ;;  %v400_v21 = vmul.f32 %v7248_v10, %v8514_v6  ;;  %v8616_v23 = vrot.slane %v800_v16, 7  ;;  %v961_v10 = vld [vmem:[#allocation2 + $0x24] sm:$0xf]  ;;  %s8084_s27 = sshll.u32 %s8183_s7, 4  ;;  %s8085_s27 = int_to_ptr.vmem [resolvable:$false] %s8084_s27 }
  0xc9   : > { %v794_v22 = vrot.slane %v792_v14, 7  ;;  %v7283_v25 = vunpack.c.l.bf16 %v7311_v11  ;;  %v7284_v26 = vunpack.c.h.bf16 %v7311_v11  ;;  %v642_v30 = vshll.u32 %v7174_v18, 16  ;;  %p8082_p1 = pnand %p8081_p12, %p8381_p6  ;;  %s8086_s1 = scalar_lea.vmem %s8085_s27, 4096 }
  0xca   : > { %v7888_v50 = vld [vmem:[#allocation2 + $0x60] sm:$0xff]   ;;  %v7889_v58 = vld [vmem:[#allocation2 + $0x6c] sm:$0xff]   ;;  %v647_v31 = vshrl.u32 %v7175_v19, 16  ;;  %v438_v32 = vadd.f32 %v8518_v12, %v399_v20  ;;  %v805_v35 = vor.u32 %v803_v17, %v8616_v23  ;;  %v807_v36 = vrot.slane %v8616_v23, 4  ;;  %p8087_p4 = scmp.lt.s32.totalorder %s10334_s30, %s8085_s27  ;;  %p8088_p8 = scmp.lt.s32.totalorder %s8086_s1, %s8080_s13 }
  0xcb   : > { %7487 = vmatprep.mubr.msk.bf16.mxu1 %vm1172_vm7, %v7888_v50  ;;  %v797_v33 = vor.u32 %v795_v15, %v794_v22  ;;  %v798_v34 = vrot.slane %v794_v22, 4  ;;  %v650_v39 = vshll.u32 %v7175_v19, 16  ;;  %v439_v40 = vadd.f32 %v8518_v12, %v400_v21  ;;  %v7304_v21 = vld [vmem:[%s8442_s25 + $0x20] sm:$0xff]   ;;  %p8083_p2 = pneg %p8082_p1 }
  0xcc   : > { %7488 = vmatmul.mubr.msk.bf16.vlgmr.msra.gmra.mrb[0].mxu1 %vm1172_vm7, %v7889_v58  ;;  %v7891_v28 = vld [vmem:[#allocation2 + $0xc] sm:$0xff]   ;;  %v8622_v38 = vrot.slane %v647_v31, 7  ;;  %v7176_v44 = vpack.c.bf16 %v438_v32, %v438_v32  ;;  %v417_v46 = vmul.f32 %v7283_v25, %v8514_v6  ;;  %v7287_v2 = vunpack.c.l.bf16 %v7312_v47  ;;  %p8089_p0 = por %p8088_p8, %p8087_p4 }
  0xcd   : > { %7504 = vmatpush3.bf16.msra.mxu1 %v8521_v13  ;;  %v639_v13 = vshrl.u32 %v7174_v18, 16  ;;  %7472 = vmatmul.mubr.msk.bf16.vlgmr.msra.gmra.mrb[0].mxu0 %vm1172_vm7, %v7891_v28  ;;  %v806_v41 = vsel %vm8543_vm8, %v798_v34, %v805_v35  ;;  %v1018_v42 = vsel %vm8551_vm9, %v797_v33, %v1017_v24  ;;  %v7177_v56 = vpack.c.bf16 %v439_v40, %v439_v40  ;;  %v1024_v40 = vld [vmem:[#allocation2 + $0x90] sm:$0xf] }
  0xce   : > { %7538 = vmatpush3.bf16.msra.mxu0 %v8576_v27  ;;  %v7892_v48 = vld [vmem:[#allocation2 + $0x78] sm:$0xff]   ;;  %1019 = vst [vmem:[#allocation2 + $0x84] sm:$0xf] %v1018_v42  ;;  %1020 = vst.msk [vmem:[#allocation2 + $0x88] sm:$0xf] %vm482_vm1, %v806_v41  ;;  %v652_v53 = vor.u32 %v650_v39, %v8622_v38  ;;  %v654_v55 = vrot.slane %v8622_v38, 4  ;;  %v418_v27 = vmul.f32 %v7284_v26, %v8514_v6  ;;  %v7288_v14 = vunpack.c.h.bf16 %v7312_v47  ;;  %p8090_p5 = pnand %p8089_p0, %p8083_p2 }
  0xcf   : > { %v641_v37 = vrot.slane %v639_v13, 7  ;;  %v656_v58 = vshrl.u32 %v7176_v44, 16  ;;  %v659_v59 = vshll.u32 %v7176_v44, 16  ;;  %7491 = vmatprep.mubr.msk.bf16.mxu1 %vm1172_vm7, %v7892_v48  ;;  %v456_v1 = vadd.f32 %v8518_v12, %v417_v46 }
  0xd0   : > { %v664_v7 = vshrl.u32 %v7177_v56, 16  ;;  %v667_v8 = vshll.u32 %v7177_v56, 16  ;;  %v457_v9 = vadd.f32 %v8518_v12, %v418_v27  ;;  %v419_v15 = vmul.f32 %v7287_v2, %v8514_v6 }
  0xd1   : > { %v644_v50 = vor.u32 %v642_v30, %v641_v37  ;;  %v645_v52 = vrot.slane %v641_v37, 4  ;;  %v658_v4 = vrot.slane %v656_v58, 7  ;;  %v7194_v11 = vpack.c.bf16 %v456_v1, %v456_v1 }
  0xd2   : > { %v7251_v16 = vunpack.c.l.bf16 %v7303_v61  ;;  %v8646_v19 = vrot.slane %v664_v7, 7  ;;  %v7195_v20 = vpack.c.bf16 %v457_v9, %v457_v9  ;;  %v420_v25 = vmul.f32 %v7288_v14, %v8514_v6 }
  0xd3   : > { %v653_v62 = vsel %vm8543_vm8, %v645_v52, %v652_v53  ;;  %v955_v0 = vsel %vm8551_vm9, %v644_v50, %v954_v43  ;;  %v661_v17 = vor.u32 %v659_v59, %v658_v4  ;;  %v662_v18 = vrot.slane %v658_v4, 4  ;;  %v1031_v4 = vld [vmem:[#allocation2 + $0x9c] sm:$0xf] }
  0xd4   : > { %956 = vst [vmem:[#allocation2 + $0x18] sm:$0xf] %v955_v0  ;;  %957 = vst.msk [vmem:[#allocation2 + $0x1c] sm:$0xf] %vm482_vm1, %v653_v62  ;;  %v809_v22 = vshrl.u32 %v7194_v11, 16  ;;  %v812_v24 = vshll.u32 %v7194_v11, 16  ;;  %v458_v26 = vadd.f32 %v8518_v12, %v419_v15  ;;  %v669_v13 = vor.u32 %v667_v8, %v8646_v19 }
  0xd5   : > { %v7893_v28 = vld [vmem:[#allocation2 + $0x84] sm:$0xff]   ;;  %v671_v30 = vrot.slane %v8646_v19, 4  ;;  %v962_v31 = vsel %vm8551_vm9, %v661_v17, %v961_v10  ;;  %v7252_v32 = vunpack.c.h.bf16 %v7303_v61  ;;  %v817_v34 = vshrl.u32 %v7195_v20, 16 }
  0xd6   : > { %963 = vst [vmem:[#allocation2 + $0x24] sm:$0xf] %v962_v31  ;;  %v811_v33 = vrot.slane %v809_v22, 7  ;;  %v820_v35 = vshll.u32 %v7195_v20, 16  ;;  %v459_v37 = vadd.f32 %v8518_v12, %v420_v25  ;;  %7492 = vmatmul.mubr.msk.bf16.gmra.mrb[4].mxu1 %vm1172_vm7, %v7893_v28  ;;  %v670_v39 = vsel %vm8543_vm8, %v662_v18, %v669_v13  ;;  %v7313_v18 = vld [vmem:[%s8442_s25 + $0x68] sm:$0xff]  }
  0xd7   : > { %v7196_v41 = vpack.c.bf16 %v458_v26, %v458_v26  ;;  %v401_v42 = vmul.f32 %v7251_v16, %v8514_v6  ;;  %v402_v43 = vmul.f32 %v7252_v32, %v8514_v6  ;;  %964 = vst.msk [vmem:[#allocation2 + $0x28] sm:$0xf] %vm482_vm1, %v670_v39  ;;  %v7255_v50 = vunpack.c.l.bf16 %v7304_v21  ;;  %v7314_v39 = vld [vmem:[%s8442_s25 + $0x70] sm:$0xff]  }
  0xd8   : > { %v814_v46 = vor.u32 %v812_v24, %v811_v33  ;;  %v815_v47 = vrot.slane %v811_v33, 4  ;;  %v7197_v48 = vpack.c.bf16 %v459_v37, %v459_v37  ;;  %v8662_v52 = vrot.slane %v817_v34, 7  ;;  %v968_v34 = vld [vmem:[#allocation2 + $0x30] sm:$0xf] }
  0xd9   : > { %v826_v53 = vshrl.u32 %v7196_v41, 16  ;;  %v829_v56 = vshll.u32 %v7196_v41, 16  ;;  %v440_v58 = vadd.f32 %v8518_v12, %v401_v42  ;;  %v441_v62 = vadd.f32 %v8518_v12, %v402_v43 }
  0xda   : > { %v1025_v59 = vsel %vm8551_vm9, %v814_v46, %v1024_v40  ;;  %v834_v27 = vshrl.u32 %v7197_v48, 16  ;;  %v837_v61 = vshll.u32 %v7197_v48, 16  ;;  %v822_v0 = vor.u32 %v820_v35, %v8662_v52 }
  0xdb   : > { %v7894_v44 = vld [vmem:[#allocation2 + $0x18] sm:$0xff]   ;;  %v824_v1 = vrot.slane %v8662_v52, 4  ;;  %1026 = vst [vmem:[#allocation2 + $0x90] sm:$0xf] %v1025_v59  ;;  %v828_v2 = vrot.slane %v826_v53, 7  ;;  %v7178_v7 = vpack.c.bf16 %v440_v58, %v440_v58  ;;  %v7179_v9 = vpack.c.bf16 %v441_v62, %v441_v62  ;;  %v7305_v59 = vld [vmem:[%s8442_s25 + $0x28] sm:$0xff]  }
  0xdc   : > { %7475 = vmatprep.mubr.msk.bf16.mxu0 %vm1172_vm7, %v7894_v44  ;;  %v8671_v8 = vrot.slane %v834_v27, 7  ;;  %v7256_v10 = vunpack.c.h.bf16 %v7304_v21  ;;  %v403_v11 = vmul.f32 %v7255_v50, %v8514_v6  ;;  %v823_v14 = vsel %vm8543_vm8, %v815_v47, %v822_v0 }
  0xdd   : > { %v831_v15 = vor.u32 %v829_v56, %v828_v2  ;;  %v832_v16 = vrot.slane %v828_v2, 4  ;;  %v673_v17 = vshrl.u32 %v7178_v7, 16  ;;  %1027 = vst.msk [vmem:[#allocation2 + $0x94] sm:$0xf] %vm482_vm1, %v823_v14  ;;  %v676_v24 = vshll.u32 %v7178_v7, 16 }
  0xde   : > { %v839_v20 = vor.u32 %v837_v61, %v8671_v8  ;;  %v841_v22 = vrot.slane %v8671_v8, 4  ;;  %v681_v25 = vshrl.u32 %v7179_v9, 16  ;;  %v7895_v26 = vld [vmem:[#allocation2 + $0x24] sm:$0xff]   ;;  %v684_v13 = vshll.u32 %v7179_v9, 16 }
  0xdf   : > { %v1032_v21 = vsel %vm8551_vm9, %v831_v15, %v1031_v4  ;;  %v675_v28 = vrot.slane %v673_v17, 7  ;;  %v404_v31 = vmul.f32 %v7256_v10, %v8514_v6  ;;  %v442_v35 = vadd.f32 %v8518_v12, %v403_v11  ;;  %7476 = vmatmul.mubr.msk.bf16.gmra.mrb[4].mxu0 %vm1172_vm7, %v7895_v26 }
  0xe0   : > { %v840_v32 = vsel %vm8543_vm8, %v832_v16, %v839_v20  ;;  %1033 = vst [vmem:[#allocation2 + $0x9c] sm:$0xf] %v1032_v21  ;;  %v8685_v33 = vrot.slane %v681_v25, 7  ;;  %v7291_v37 = vunpack.c.l.bf16 %v7313_v18  ;;  %v7292_v43 = vunpack.c.h.bf16 %v7313_v18  ;;  %v975_v18 = vld [vmem:[#allocation2 + $0x3c] sm:$0xf] }
  0xe1   : > { %1034 = vst.msk [vmem:[#allocation2 + $0xa0] sm:$0xf] %vm482_vm1, %v840_v32  ;;  %v678_v40 = vor.u32 %v676_v24, %v675_v28  ;;  %v679_v41 = vrot.slane %v675_v28, 4  ;;  %v443_v42 = vadd.f32 %v8518_v12, %v404_v31  ;;  %v7180_v47 = vpack.c.bf16 %v442_v35, %v442_v35 }
  0xe2   : > { %v686_v44 = vor.u32 %v684_v13, %v8685_v33  ;;  %v688_v46 = vrot.slane %v8685_v33, 4  ;;  %v421_v48 = vmul.f32 %v7291_v37, %v8514_v6  ;;  %v422_v56 = vmul.f32 %v7292_v43, %v8514_v6 }
  0xe3   : > { %v969_v50 = vsel %vm8551_vm9, %v678_v40, %v968_v34  ;;  %v7181_v53 = vpack.c.bf16 %v443_v42, %v443_v42  ;;  %v7295_v58 = vunpack.c.l.bf16 %v7314_v39  ;;  %v690_v61 = vshrl.u32 %v7180_v47, 16 }
  0xe4   : > { %v687_v27 = vsel %vm8543_vm8, %v679_v41, %v686_v44  ;;  %970 = vst [vmem:[#allocation2 + $0x30] sm:$0xf] %v969_v50  ;;  %v693_v62 = vshll.u32 %v7180_v47, 16  ;;  %v460_v0 = vadd.f32 %v8518_v12, %v421_v48  ;;  %v7896_v2 = vld [vmem:[#allocation2 + $0x90] sm:$0xff]   ;;  %v461_v9 = vadd.f32 %v8518_v12, %v422_v56  ;;  %v1038_v47 = vld [vmem:[#allocation2 + $0xa8] sm:$0xf] }
  0xe5   : > { %971 = vst.msk [vmem:[#allocation2 + $0x34] sm:$0xf] %vm482_vm1, %v687_v27  ;;  %v698_v4 = vshrl.u32 %v7181_v53, 16  ;;  %v701_v7 = vshll.u32 %v7181_v53, 16  ;;  %v7296_v10 = vunpack.c.h.bf16 %v7314_v39  ;;  %v692_v11 = vrot.slane %v690_v61, 7  ;;  %7495 = vmatprep.mubr.msk.bf16.mxu1 %vm1172_vm7, %v7896_v2 }
  0xe6   : > { %v7198_v14 = vpack.c.bf16 %v460_v0, %v460_v0  ;;  %v423_v15 = vmul.f32 %v7295_v58, %v8514_v6  ;;  %v7259_v16 = vunpack.c.l.bf16 %v7305_v59  ;;  %v7199_v20 = vpack.c.bf16 %v461_v9, %v461_v9 }
  0xe7   : > { %v8706_v17 = vrot.slane %v698_v4, 7  ;;  %v424_v24 = vmul.f32 %v7296_v10, %v8514_v6  ;;  %v7260_v25 = vunpack.c.h.bf16 %v7305_v59  ;;  %v695_v21 = vor.u32 %v693_v62, %v692_v11  ;;  %v7306_v4 = vld [vmem:[%s8442_s25 + $0x30] sm:$0xff]  }
  0xe8   : > { %v7897_v26 = vld [vmem:[#allocation2 + $0x9c] sm:$0xff]   ;;  %v696_v28 = vrot.slane %v692_v11, 4  ;;  %v843_v13 = vshrl.u32 %v7198_v14, 16  ;;  %v846_v31 = vshll.u32 %v7198_v14, 16  ;;  %v851_v35 = vshrl.u32 %v7199_v20, 16 }
  0xe9   : > { %v703_v32 = vor.u32 %v701_v7, %v8706_v17  ;;  %v705_v34 = vrot.slane %v8706_v17, 4  ;;  %v854_v37 = vshll.u32 %v7199_v20, 16  ;;  %7496 = vmatmul.mubr.msk.bf16.gmra.mrb[8].mxu1 %vm1172_vm7, %v7897_v26  ;;  %v976_v39 = vsel %vm8551_vm9, %v695_v21, %v975_v18 }
  0xea   : > { %v845_v40 = vrot.slane %v843_v13, 7  ;;  %v462_v41 = vadd.f32 %v8518_v12, %v423_v15  ;;  %v463_v42 = vadd.f32 %v8518_v12, %v424_v24  ;;  %977 = vst [vmem:[#allocation2 + $0x3c] sm:$0xf] %v976_v39  ;;  %v8718_v44 = vrot.slane %v851_v35, 7  ;;  %v1422_v35 = vld [vmem:[#allocation2] sm:$0xf] }
  0xeb   : > { %v704_v43 = vsel %vm8543_vm8, %v696_v28, %v703_v32  ;;  %v405_v48 = vmul.f32 %v7259_v16, %v8514_v6  ;;  %v406_v50 = vmul.f32 %v7260_v25, %v8514_v6  ;;  %v1045_v16 = vld [vmem:[#allocation2 + $0xb4] sm:$0xf]  ;;  %vm1470_vm11 = vsmask.f32 3328 }
  0xec   : > { %v7898_v53 = vld [vmem:[#allocation2 + $0x30] sm:$0xff]   ;;  %978 = vst.msk [vmem:[#allocation2 + $0x40] sm:$0xf] %vm482_vm1, %v704_v43  ;;  %v848_v56 = vor.u32 %v846_v31, %v845_v40  ;;  %v849_v58 = vrot.slane %v845_v40, 4  ;;  %v7200_v59 = vpack.c.bf16 %v462_v41, %v462_v41  ;;  %v7201_v27 = vpack.c.bf16 %v463_v42, %v463_v42 }
  0xed   : > { %v856_v61 = vor.u32 %v854_v37, %v8718_v44  ;;  %v858_v62 = vrot.slane %v8718_v44, 4  ;;  %v444_v0 = vadd.f32 %v8518_v12, %v405_v48  ;;  %v445_v2 = vadd.f32 %v8518_v12, %v406_v50  ;;  %7479 = vmatprep.mubr.msk.bf16.mxu0 %vm1172_vm7, %v7898_v53 }
  0xee   : > { %v1039_v7 = vsel %vm8551_vm9, %v848_v56, %v1038_v47  ;;  %v860_v9 = vshrl.u32 %v7200_v59, 16  ;;  %v863_v10 = vshll.u32 %v7200_v59, 16  ;;  %v868_v11 = vshrl.u32 %v7201_v27, 16  ;;  %v1423_v59 = vld [vmem:[#allocation2 + $0x4] sm:$0xf] }
  0xef   : > { %v857_v14 = vsel %vm8543_vm8, %v849_v58, %v856_v61  ;;  %1040 = vst [vmem:[#allocation2 + $0xa8] sm:$0xf] %v1039_v7  ;;  %v871_v15 = vshll.u32 %v7201_v27, 16  ;;  %v7182_v18 = vpack.c.bf16 %v444_v0, %v444_v0  ;;  %v7183_v20 = vpack.c.bf16 %v445_v2, %v445_v2  ;;  %v982_v58 = vld [vmem:[#allocation2 + $0x48] sm:$0xf] }
  0xf0   : > { %vm1471_vm12 = vsmask.f32 7440  ;;  %1041 = vst.msk [vmem:[#allocation2 + $0xac] sm:$0xf] %vm482_vm1, %v857_v14  ;;  %v862_v24 = vrot.slane %v860_v9, 7  ;;  %v8734_v25 = vrot.slane %v868_v11, 7  ;;  %v7263_v26 = vunpack.c.l.bf16 %v7306_v4 }
  0xf1   : > { %v7264_v21 = vunpack.c.h.bf16 %v7306_v4  ;;  %v707_v28 = vshrl.u32 %v7182_v18, 16  ;;  %v710_v13 = vshll.u32 %v7182_v18, 16  ;;  %v715_v31 = vshrl.u32 %v7183_v20, 16  ;;  %v1424_v7 = vld [vmem:[#allocation2 + $0x8] sm:$0x1]  ;;  %vm8766_vm15 = vmor %vm1470_vm11, %vm1471_vm12 }
  0xf2   : > { %v718_v32 = vshll.u32 %v7183_v20, 16  ;;  %v865_v37 = vor.u32 %v863_v10, %v862_v24  ;;  %v866_v39 = vrot.slane %v862_v24, 4  ;;  %v873_v40 = vor.u32 %v871_v15, %v8734_v25  ;;  %v2817_v9 = vld [vmem:[#allocation10 + $0x6] sm:$0x3] }
  0xf3   : > { %v875_v41 = vrot.slane %v8734_v25, 4  ;;  %v7899_v42 = vld [vmem:[#allocation2 + $0x3c] sm:$0xff]   ;;  %v709_v43 = vrot.slane %v707_v28, 7  ;;  %v8738_v47 = vrot.slane %v715_v31, 7  ;;  %v407_v48 = vmul.f32 %v7263_v26, %v8514_v6 }
  0xf4   : > { %v408_v50 = vmul.f32 %v7264_v21, %v8514_v6  ;;  %v874_v53 = vsel %vm8543_vm8, %v866_v39, %v873_v40  ;;  %v1046_v56 = vsel %vm8551_vm9, %v865_v37, %v1045_v16  ;;  %v1474_v27 = vshrl.u32 %v1422_v35, 16  ;;  %7480 = vmatmul.mubr.msk.bf16.gmra.mrb[8].mxu0 %vm1172_vm7, %v7899_v42  ;;  %v8752_v16 = vld [vmem:[#allocation2 + $0xc] sm:$0xf] }
  0xf5   : > { %v1477_v61 = vshll.u32 %v1422_v35, 16  ;;  %1047 = vst [vmem:[#allocation2 + $0xb4] sm:$0xf] %v1046_v56  ;;  %1048 = vst.msk [vmem:[#allocation2 + $0xb8] sm:$0xf] %vm482_vm1, %v874_v53  ;;  %v712_v0 = vor.u32 %v710_v13, %v709_v43  ;;  %v713_v2 = vrot.slane %v709_v43, 4  ;;  %v720_v4 = vor.u32 %v718_v32, %v8738_v47 }
  0xf6   : > { %v722_v6 = vrot.slane %v8738_v47, 4  ;;  %v446_v10 = vadd.f32 %v8518_v12, %v407_v48  ;;  %v447_v11 = vadd.f32 %v8518_v12, %v408_v50  ;;  %v1476_v14 = vrot.slane %v1474_v27, 4  ;;  %v958_v32 = vld [vmem:[#allocation2 + $0x20] sm:$0x1]  ;;  %v965_v35 = vld [vmem:[#allocation2 + $0x2c] sm:$0x1] }
  0xf7   : > { %v1479_v15 = vrot.slane %v1477_v61, 5  ;;  %vm2312_vm14 = vcmask 1046532   ;;  %v7900_v18 = vld [vmem:[#allocation2 + $0xa8] sm:$0xff]   ;;  %v721_v20 = vsel %vm8543_vm8, %v713_v2, %v720_v4  ;;  %v983_v24 = vsel %vm8551_vm9, %v712_v0, %v982_v58  ;;  %v3639_v43 = vld [vmem:[#allocation10 + $0x8] sm:$0x3] }
  0xf8   : > { %v1483_v26 = vshll.u32 %v1423_v59, 16  ;;  %v1487_v21 = vshrl.u32 %v1423_v59, 16  ;;  %984 = vst [vmem:[#allocation2 + $0x48] sm:$0xf] %v983_v24  ;;  %985 = vst.msk [vmem:[#allocation2 + $0x4c] sm:$0xf] %vm482_vm1, %v721_v20  ;;  %v7184_v28 = vpack.c.bf16 %v446_v10, %v446_v10  ;;  %v7185_v12 = vpack.c.bf16 %v447_v11, %v447_v11  ;;  %7499 = vmatprep.mubr.msk.bf16.mxu1 %vm1172_vm7, %v7900_v18 }
  0xf9   : > { %v1480_v13 = vor.u32 %v1479_v15, %v1476_v14  ;;  %v1493_v31 = vshll.u32 %v1424_v7, 16  ;;  %v8761_v40 = vand.u32 %v2817_v9, %v8511_v3  ;;  %v1498_v42 = vshrl.u32 %v8752_v16, 16  ;;  %v1426_v59 = vld [vmem:[#allocation2 + $0x10] sm:$0xf]  ;;  %v972_v27 = vld [vmem:[#allocation2 + $0x38] sm:$0x1]  ;;  %vm8804_vm0 = vmor %vm2311_vm13, %vm2312_vm14 }
  0xfa   : > { %v1485_v37 = vrot.slane %v1483_v26, 5  ;;  %v1489_v39 = vrot.slane %v1487_v21, 4  ;;  %v724_v48 = vshrl.u32 %v7184_v28, 16  ;;  %v727_v50 = vshll.u32 %v7184_v28, 16  ;;  %v989_v61 = vld [vmem:[#allocation2 + $0x54] sm:$0xf] }
  0xfb   : > { %v732_v53 = vshrl.u32 %v7185_v12, 16  ;;  %v735_v56 = vshll.u32 %v7185_v12, 16  ;;  %v1481_v0 = vrot.slane %v1480_v13, 4  ;;  %v1495_v4 = vrot.slane %v1493_v31, 5  ;;  %7571 = vmatprep.subr.bf16.mxu1 %v8761_v40  ;;  %v2215_v11 = vld [vmem:[#allocation2] sm:$0xe] }
  0xfc   : > { %v1490_v2 = vor.u32 %v1489_v39, %v1485_v37  ;;  %v1500_v7 = vrot.slane %v1498_v42, 4  ;;  %v7901_v9 = vld [vmem:[#allocation2 + $0xb4] sm:$0xff]   ;;  %v726_v10 = vrot.slane %v724_v48, 7  ;;  %v959_v14 = vsel %vm8580_vm10, %v654_v55, %v958_v32  ;;  %v2216_v28 = vld [vmem:[#allocation2 + $0x4] sm:$0xf] }
  0xfd   : > { %v966_v15 = vsel %vm8580_vm10, %v671_v30, %v965_v35  ;;  %v8780_v18 = vand.u32 %v3639_v43, %v8511_v3  ;;  %v8782_v20 = vrot.slane %v732_v53, 7  ;;  %v1486_v24 = vsel %vm8766_vm15, %v1481_v0, %v1485_v37  ;;  %v1427_v21 = vld [vmem:[#allocation2 + $0x14] sm:$0x1]  ;;  %v2217_v12 = vld [vmem:[#allocation2 + $0x8] sm:$0x1]  ;;  %7500 = vmatmul.mubr.msk.bf16.gmra.mrb[12].mxu1 %vm1172_vm7, %v7901_v9 }
  0xfe   : > { %v1491_v26 = vrot.slane %v1490_v2, 4  ;;  %v1501_v38 = vshll.u32 %v8752_v16, 16  ;;  %960 = vst [vmem:[#allocation2 + $0x20] sm:$0x1] %v959_v14  ;;  %967 = vst [vmem:[#allocation2 + $0x2c] sm:$0x1] %v966_v15  ;;  %v729_v55 = vor.u32 %v727_v50, %v726_v10  ;;  %v973_v39 = vsel %vm8580_vm10, %v688_v46, %v972_v27 }
  0xff   : > { %v730_v19 = vrot.slane %v726_v10, 4  ;;  %v1507_v30 = vshll.u32 %v1426_v59, 16  ;;  %v1511_v13 = vshrl.u32 %v1426_v59, 16  ;;  %v1428_v31 = vld [vmem:[#allocation2 + $0x18] sm:$0xf]  ;;  %7605 = vmatprep.subr.bf16.mxu0 %v8780_v18  ;;  %v7902_v32 = vld [vmem:[#allocation2 + $0x48] sm:$0xff]   ;;  %v737_v35 = vor.u32 %v735_v56, %v8782_v20 }
 0x100   : > { %v739_v37 = vrot.slane %v8782_v20, 4  ;;  %v1496_v16 = vsel %vm8766_vm15, %v1491_v26, %v1495_v4  ;;  %v990_v42 = vsel %vm8551_vm9, %v729_v55, %v989_v61  ;;  %v1503_v48 = vrot.slane %v1501_v38, 5  ;;  %v1429_v53 = vld [vmem:[#allocation2 + $0x1c] sm:$0xf]  ;;  %974 = vst [vmem:[#allocation2 + $0x38] sm:$0x1] %v973_v39  ;;  %7483 = vmatprep.mubr.msk.bf16.mxu0 %vm1172_vm7, %v7902_v32 }
 0x101   : > { %v6829_v43 = vcombine.low %v1486_v24, %v1496_v16  ;;  %v1509_v50 = vrot.slane %v1507_v30, 5  ;;  %v738_v56 = vsel %vm8543_vm8, %v730_v19, %v737_v35  ;;  %991 = vst [vmem:[#allocation2 + $0x54] sm:$0xf] %v990_v42  ;;  %v1513_v59 = vrot.slane %v1511_v13, 4  ;;  %v2218_v9 = vld [vmem:[#allocation2 + $0xc] sm:$0xe] }
 0x102   : > { %v1517_v0 = vshll.u32 %v1427_v21, 16  ;;  %v6861_v46 = vrot.slane %v2215_v11, 9  ;;  %992 = vst.msk [vmem:[#allocation2 + $0x58] sm:$0xf] %vm482_vm1, %v738_v56  ;;  %v1504_v27 = vor.u32 %v1503_v48, %v1500_v7  ;;  %v2316_v61 = vrot.slane %v2216_v28, 5 }
 0x103   : > { %7505 = vmatprep.mubr.msk.bf16.mxu1 %vm1172_vm7, %v6829_v43  ;;  %v2319_v2 = vrot.slane %v2217_v12, 5  ;;  %v1522_v4 = vshrl.u32 %v1428_v31, 16  ;;  %v1514_v10 = vor.u32 %v1513_v59, %v1509_v50  ;;  %v1525_v15 = vshll.u32 %v1428_v31, 16  ;;  %v2219_v26 = vld [vmem:[#allocation2 + $0x10] sm:$0xf] }
 0x104   : > { %v1519_v14 = vrot.slane %v1517_v0, 5  ;;  %v1531_v24 = vshll.u32 %v1429_v53, 16  ;;  %v1505_v21 = vrot.slane %v1504_v27, 4  ;;  %v2317_v38 = vsel %vm8804_vm0, %v6861_v46, %v2316_v61  ;;  %v2220_v28 = vld [vmem:[#allocation2 + $0x14] sm:$0x1] }
 0x105   : > { %v2318_v55 = vrot.slane %v2316_v61, 4  ;;  %v1430_v11 = vld [vmem:[#allocation2 + $0x20] sm:$0x1]  ;;  %v1524_v19 = vrot.slane %v1522_v4, 4  ;;  %v1515_v30 = vrot.slane %v1514_v10, 4  ;;  %v1527_v13 = vrot.slane %v1525_v15, 5 }
 0x106   : > { %v1533_v32 = vrot.slane %v1531_v24, 5  ;;  %v1535_v7 = vshrl.u32 %v1429_v53, 16  ;;  %v1510_v12 = vsel %vm8766_vm15, %v1505_v21, %v1509_v50  ;;  %v1541_v35 = vshll.u32 %v1430_v11, 16  ;;  %v1431_v39 = vld [vmem:[#allocation2 + $0x24] sm:$0xf] }
 0x107   : > { %v2320_v31 = vsel %vm8804_vm0, %v2318_v55, %v2319_v2  ;;  %v6862_v16 = vrot.slane %v2218_v9, 9  ;;  %v1520_v42 = vsel %vm8766_vm15, %v1515_v30, %v1519_v14  ;;  %v1528_v48 = vor.u32 %v1527_v13, %v1524_v19  ;;  %v1432_v59 = vld [vmem:[#allocation2 + $0x28] sm:$0xf]  ;;  %v1433_v0 = vld [vmem:[#allocation2 + $0x2c] sm:$0x1] }
 0x108   : > { %v6877_v43 = vcombine.low %v2317_v38, %v2320_v31  ;;  %v1537_v56 = vrot.slane %v1535_v7, 4  ;;  %v6830_v46 = vcombine.low %v1510_v12, %v1520_v42  ;;  %v1543_v53 = vrot.slane %v1541_v35, 5  ;;  %v2221_v4 = vld [vmem:[#allocation2 + $0x18] sm:$0xe]  ;;  %v2222_v55 = vld [vmem:[#allocation2 + $0x1c] sm:$0xf] }
 0x109   : > { %v2323_v27 = vrot.slane %v2219_v26, 5  ;;  %v2326_v61 = vrot.slane %v2220_v28, 5  ;;  %v7903_v50 = vld [vmem:[#allocation2 + $0x54] sm:$0xff]   ;;  %v1529_v10 = vrot.slane %v1528_v48, 4  ;;  %v1546_v2 = vshrl.u32 %v1431_v39, 16 }
 0x10a   : > { %v1538_v15 = vor.u32 %v1537_v56, %v1533_v32  ;;  %v1549_v24 = vshll.u32 %v1431_v39, 16  ;;  %7506 = vmatmul.mubr.msk.bf16.vlgmr.msra.gmra.mrb[16].mxu1 %vm1172_vm7, %v6830_v46  ;;  %v1555_v21 = vshll.u32 %v1432_v59, 16  ;;  %v1559_v38 = vshrl.u32 %v1432_v59, 16  ;;  %7484 = vmatmul.mubr.msk.bf16.gmra.mrb[12].mxu0 %vm1172_vm7, %v7903_v50  ;;  %v1434_v13 = vld [vmem:[#allocation2 + $0x30] sm:$0xf] }
 0x10b   : > { %v2324_v9 = vsel %vm8804_vm0, %v6862_v16, %v2323_v27  ;;  %v2325_v14 = vrot.slane %v2323_v27, 4  ;;  %7572 = vmatpush3.bf16.msra.mxu1 %v8761_v40  ;;  %v1534_v26 = vsel %vm8766_vm15, %v1529_v10, %v1533_v32  ;;  %v1548_v19 = vrot.slane %v1546_v2, 4  ;;  %7539 = vmatprep.mubr.msk.bf16.mxu0 %vm1172_vm7, %v6877_v43  ;;  %v2223_v35 = vld [vmem:[#allocation2 + $0x20] sm:$0x1]  ;;  %v1435_v32 = vld [vmem:[#allocation2 + $0x34] sm:$0xf] }
 0x10c   : > { %v1539_v11 = vrot.slane %v1538_v15, 4  ;;  %v1551_v30 = vrot.slane %v1549_v24, 5  ;;  %v1557_v28 = vrot.slane %v1555_v21, 5  ;;  %v1561_v12 = vrot.slane %v1559_v38, 4  ;;  %v1436_v27 = vld [vmem:[#allocation2 + $0x38] sm:$0x1] }
 0x10d   : > { %v2327_v7 = vsel %vm8804_vm0, %v2325_v14, %v2326_v61  ;;  %v1565_v31 = vshll.u32 %v1433_v0, 16  ;;  %v6863_v42 = vrot.slane %v2221_v4, 9  ;;  %v2330_v46 = vrot.slane %v2222_v55, 5  ;;  %v2224_v15 = vld [vmem:[#allocation2 + $0x24] sm:$0xe] }
 0x10e   : > { %v1544_v16 = vsel %vm8766_vm15, %v1539_v11, %v1543_v53  ;;  %v6878_v40 = vcombine.low %v2324_v9, %v2327_v7  ;;  %v1552_v39 = vor.u32 %v1551_v30, %v1548_v19  ;;  %v1562_v56 = vor.u32 %v1561_v12, %v1557_v28  ;;  %v2225_v4 = vld [vmem:[#allocation2 + $0x28] sm:$0xf]  ;;  %v979_v9 = vld [vmem:[#allocation2 + $0x44] sm:$0x1]  ;;  %v1437_v7 = vld [vmem:[#allocation2 + $0x3c] sm:$0xf] }
 0x10f   : > { %v6831_v48 = vcombine.low %v1534_v26, %v1544_v16  ;;  %v1567_v59 = vrot.slane %v1565_v31, 5  ;;  %v2333_v50 = vrot.slane %v2223_v35, 5  ;;  %v1570_v10 = vshrl.u32 %v1434_v13, 16  ;;  %v2226_v26 = vld [vmem:[#allocation2 + $0x2c] sm:$0x1] }
 0x110   : > { %v1553_v43 = vrot.slane %v1552_v39, 4  ;;  %v1573_v61 = vshll.u32 %v1434_v13, 16  ;;  %v1563_v0 = vrot.slane %v1562_v56, 4  ;;  %v2331_v53 = vsel %vm8804_vm0, %v6863_v42, %v2330_v46  ;;  %v2227_v56 = vld [vmem:[#allocation2 + $0x30] sm:$0xe] }
 0x111   : > { %7509 = vmatprep.mubr.msk.bf16.mxu1 %vm1172_vm7, %v6831_v48  ;;  %v2332_v2 = vrot.slane %v2330_v46, 4  ;;  %v1579_v24 = vshll.u32 %v1435_v32, 16  ;;  %v1572_v21 = vrot.slane %v1570_v10, 4  ;;  %v1583_v55 = vshrl.u32 %v1435_v32, 16  ;;  %v2229_v17 = vld [vmem:[#allocation2 + $0x38] sm:$0x1] }
 0x112   : > { %v1558_v14 = vsel %vm8766_vm15, %v1553_v43, %v1557_v28  ;;  %v1575_v38 = vrot.slane %v1573_v61, 5  ;;  %v1568_v11 = vsel %vm8766_vm15, %v1563_v0, %v1567_v59  ;;  %v1589_v13 = vshll.u32 %v1436_v27, 16  ;;  %7540 = vmatmul.mubr.msk.bf16.vlgmr.msra.gmra.mrb[16].mxu0 %vm1172_vm7, %v6878_v40  ;;  %v1438_v28 = vld [vmem:[#allocation2 + $0x40] sm:$0xf]  ;;  %v986_v43 = vld [vmem:[#allocation2 + $0x50] sm:$0x1] }
 0x113   : > { %v2334_v19 = vsel %vm8804_vm0, %v2332_v2, %v2333_v50  ;;  %v1581_v30 = vrot.slane %v1579_v24, 5  ;;  %v6832_v12 = vcombine.low %v1558_v14, %v1568_v11  ;;  %v1585_v16 = vrot.slane %v1583_v55, 4  ;;  %7606 = vmatpush3.bf16.msra.mxu0 %v8780_v18 }
 0x114   : > { %v6879_v31 = vcombine.low %v2331_v53, %v2334_v19  ;;  %v1576_v35 = vor.u32 %v1575_v38, %v1572_v21  ;;  %v1591_v39 = vrot.slane %v1589_v13, 5  ;;  %v6864_v42 = vrot.slane %v2224_v15, 9  ;;  %v2228_v15 = vld [vmem:[#allocation2 + $0x34] sm:$0xf]  ;;  %v1440_v21 = vld [vmem:[#allocation2 + $0x48] sm:$0xf] }
 0x115   : > { %v2337_v32 = vrot.slane %v2225_v4, 5  ;;  %v2340_v48 = vrot.slane %v2226_v26, 5  ;;  %7510 = vmatmul.mubr.msk.bf16.gmra.mrb[20].mxu1 %vm1172_vm7, %v6832_v12  ;;  %v1586_v46 = vor.u32 %v1585_v16, %v1581_v30  ;;  %v980_v40 = vsel %vm8580_vm10, %v705_v34, %v979_v9  ;;  %v993_v38 = vld [vmem:[#allocation2 + $0x5c] sm:$0x1]  ;;  %v1441_v13 = vld [vmem:[#allocation2 + $0x4c] sm:$0xf] }
 0x116   : > { %7543 = vmatprep.mubr.msk.bf16.mxu0 %vm1172_vm7, %v6879_v31  ;;  %v1577_v59 = vrot.slane %v1576_v35, 4  ;;  %v1594_v27 = vshrl.u32 %v1437_v7, 16  ;;  %981 = vst [vmem:[#allocation2 + $0x44] sm:$0x1] %v980_v40  ;;  %v1597_v10 = vshll.u32 %v1437_v7, 16  ;;  %v1603_v61 = vshll.u32 %v1438_v28, 16 }
 0x117   : > { %v2338_v18 = vsel %vm8804_vm0, %v6864_v42, %v2337_v32  ;;  %v2339_v50 = vrot.slane %v2337_v32, 4  ;;  %v1587_v53 = vrot.slane %v1586_v46, 4  ;;  %v1607_v24 = vshrl.u32 %v1438_v28, 16  ;;  %v2230_v35 = vld [vmem:[#allocation2 + $0x3c] sm:$0xe] }
 0x118   : > { %v1582_v0 = vsel %vm8766_vm15, %v1577_v59, %v1581_v30  ;;  %v1596_v2 = vrot.slane %v1594_v27, 4  ;;  %v1599_v4 = vrot.slane %v1597_v10, 5  ;;  %v1605_v9 = vrot.slane %v1603_v61, 5  ;;  %v2231_v16 = vld [vmem:[#allocation2 + $0x40] sm:$0xf] }
 0x119   : > { %v2341_v34 = vsel %vm8804_vm0, %v2339_v50, %v2340_v48  ;;  %v6865_v14 = vrot.slane %v2227_v56, 9  ;;  %v1592_v55 = vsel %vm8766_vm15, %v1587_v53, %v1591_v39  ;;  %v1609_v11 = vrot.slane %v1607_v24, 4  ;;  %v1443_v46 = vld [vmem:[#allocation2 + $0x54] sm:$0xf]  ;;  %v1444_v53 = vld [vmem:[#allocation2 + $0x58] sm:$0xf] }
 0x11a   : > { %v6880_v26 = vcombine.low %v2338_v18, %v2341_v34  ;;  %v2344_v19 = vrot.slane %v2228_v15, 5  ;;  %v6833_v30 = vcombine.low %v1582_v0, %v1592_v55  ;;  %v1600_v7 = vor.u32 %v1599_v4, %v1596_v2 }
 0x11b   : > { %v2347_v12 = vrot.slane %v2229_v17, 5  ;;  %v987_v31 = vsel %vm8580_vm10, %v722_v6, %v986_v43  ;;  %v1610_v28 = vor.u32 %v1609_v11, %v1605_v9  ;;  %v1618_v32 = vshrl.u32 %v1440_v21, 16  ;;  %v2234_v11 = vld [vmem:[#allocation2 + $0x4c] sm:$0xf] }
 0x11c   : > { %7544 = vmatmul.mubr.msk.bf16.gmra.mrb[20].mxu0 %vm1172_vm7, %v6880_v26  ;;  %v2345_v39 = vsel %vm8804_vm0, %v6865_v14, %v2344_v19  ;;  %v2346_v42 = vrot.slane %v2344_v19, 4  ;;  %988 = vst [vmem:[#allocation2 + $0x50] sm:$0x1] %v987_v31  ;;  %7513 = vmatprep.mubr.msk.bf16.mxu1 %vm1172_vm7, %v6833_v30  ;;  %v1601_v48 = vrot.slane %v1600_v7, 4  ;;  %v1621_v56 = vshll.u32 %v1440_v21, 16 }
 0x11d   : > { %v1627_v59 = vshll.u32 %v1441_v13, 16  ;;  %v1631_v47 = vshrl.u32 %v1441_v13, 16  ;;  %v1439_v40 = vld [vmem:[#allocation2 + $0x44] sm:$0x1]  ;;  %v1611_v6 = vrot.slane %v1610_v28, 4  ;;  %v1620_v43 = vrot.slane %v1618_v32, 4 }
 0x11e   : > { %v2348_v27 = vsel %vm8804_vm0, %v2346_v42, %v2347_v12  ;;  %v2232_v18 = vld [vmem:[#allocation2 + $0x44] sm:$0x1]  ;;  %v994_v50 = vsel %vm8580_vm10, %v739_v37, %v993_v38  ;;  %v1606_v10 = vsel %vm8766_vm15, %v1601_v48, %v1605_v9  ;;  %v1613_v61 = vshll.u32 %v1439_v40, 16  ;;  %v2233_v26 = vld [vmem:[#allocation2 + $0x48] sm:$0xe] }
 0x11f   : > { %v6881_v15 = vcombine.low %v2345_v39, %v2348_v27  ;;  %v1623_v0 = vrot.slane %v1621_v56, 5  ;;  %995 = vst [vmem:[#allocation2 + $0x5c] sm:$0x1] %v994_v50  ;;  %v1629_v2 = vrot.slane %v1627_v59, 5  ;;  %v1633_v24 = vrot.slane %v1631_v47, 4 }
 0x120   : > { %v6866_v17 = vrot.slane %v2230_v35, 9  ;;  %v2351_v34 = vrot.slane %v2231_v16, 5  ;;  %v1615_v4 = vrot.slane %v1613_v61, 5  ;;  %v2354_v20 = vrot.slane %v2232_v18, 5  ;;  %v1000_v19 = vld [vmem:[#allocation2 + $0x68] sm:$0x1] }
 0x121   : > { %7547 = vmatprep.mubr.msk.bf16.mxu0 %vm1172_vm7, %v6881_v15  ;;  %v1624_v14 = vor.u32 %v1623_v0, %v1620_v43  ;;  %v1642_v21 = vshrl.u32 %v1443_v46, 16  ;;  %v1634_v55 = vor.u32 %v1633_v24, %v1629_v2  ;;  %v1645_v38 = vshll.u32 %v1443_v46, 16  ;;  %v1446_v32 = vld [vmem:[#allocation2 + $0x60] sm:$0xf]  ;;  %v1447_v15 = vld [vmem:[#allocation2 + $0x64] sm:$0xf] }
 0x122   : > { %v2352_v37 = vsel %vm8804_vm0, %v6866_v17, %v2351_v34  ;;  %v2353_v9 = vrot.slane %v2351_v34, 4  ;;  %v1616_v13 = vsel %vm8766_vm15, %v1611_v6, %v1615_v4  ;;  %v1651_v31 = vshll.u32 %v1444_v53, 16  ;;  %v2236_v17 = vld [vmem:[#allocation2 + $0x54] sm:$0xe]  ;;  %v2237_v34 = vld [vmem:[#allocation2 + $0x58] sm:$0xf] }
 0x123   : > { %v1442_v30 = vld [vmem:[#allocation2 + $0x50] sm:$0x1]  ;;  %v1625_v7 = vrot.slane %v1624_v14, 4  ;;  %v1644_v12 = vrot.slane %v1642_v21, 4  ;;  %v6834_v35 = vcombine.low %v1606_v10, %v1616_v13  ;;  %v1635_v16 = vrot.slane %v1634_v55, 4 }
 0x124   : > { %v1637_v28 = vshll.u32 %v1442_v30, 16  ;;  %v2355_v39 = vsel %vm8804_vm0, %v2353_v9, %v2354_v20  ;;  %v2235_v42 = vld [vmem:[#allocation2 + $0x50] sm:$0x1]  ;;  %v1647_v59 = vrot.slane %v1645_v38, 5  ;;  %v1653_v47 = vrot.slane %v1651_v31, 5 }
 0x125   : > { %v1630_v48 = vsel %vm8766_vm15, %v1625_v7, %v1629_v2  ;;  %v6882_v56 = vcombine.low %v2352_v37, %v2355_v39  ;;  %7514 = vmatmul.mubr.msk.bf16.gmra.mrb[24].mxu1 %vm1172_vm7, %v6834_v35  ;;  %v1655_v6 = vshrl.u32 %v1444_v53, 16  ;;  %v6867_v27 = vrot.slane %v2233_v26, 9  ;;  %v1007_v4 = vld [vmem:[#allocation2 + $0x74] sm:$0x1]  ;;  %v1449_v30 = vld [vmem:[#allocation2 + $0x6c] sm:$0xf] }
 0x126   : > { %v1639_v46 = vrot.slane %v1637_v28, 5  ;;  %v1445_v40 = vld [vmem:[#allocation2 + $0x5c] sm:$0x1]  ;;  %v2358_v43 = vrot.slane %v2234_v11, 5  ;;  %v1648_v18 = vor.u32 %v1647_v59, %v1644_v12  ;;  %v2361_v10 = vrot.slane %v2235_v42, 5 }
 0x127   : > { %7548 = vmatmul.mubr.msk.bf16.gmra.mrb[24].mxu0 %vm1172_vm7, %v6882_v56  ;;  %v1661_v50 = vshll.u32 %v1445_v40, 16  ;;  %v1001_v61 = vsel %vm8580_vm10, %v756_v63, %v1000_v19  ;;  %v1657_v2 = vrot.slane %v1655_v6, 4  ;;  %v1666_v51 = vshrl.u32 %v1446_v32, 16  ;;  %v2238_v38 = vld [vmem:[#allocation2 + $0x5c] sm:$0x1] }
 0x128   : > { %v1640_v0 = vsel %vm8766_vm15, %v1635_v16, %v1639_v46  ;;  %v2359_v53 = vsel %vm8804_vm0, %v6867_v27, %v2358_v43  ;;  %v2360_v24 = vrot.slane %v2358_v43, 4  ;;  %1002 = vst [vmem:[#allocation2 + $0x68] sm:$0x1] %v1001_v61  ;;  %v1649_v20 = vrot.slane %v1648_v18, 4  ;;  %v2239_v46 = vld [vmem:[#allocation2 + $0x60] sm:$0xe] }
 0x129   : > { %v6835_v14 = vcombine.low %v1630_v48, %v1640_v0  ;;  %v1663_v21 = vrot.slane %v1661_v50, 5  ;;  %v1658_v55 = vor.u32 %v1657_v2, %v1653_v47  ;;  %v1669_v37 = vshll.u32 %v1446_v32, 16  ;;  %v1450_v32 = vld [vmem:[#allocation2 + $0x70] sm:$0xf]  ;;  %v2240_v40 = vld [vmem:[#allocation2 + $0x64] sm:$0xf] }
 0x12a   : > { %v2362_v63 = vsel %vm8804_vm0, %v2360_v24, %v2361_v10  ;;  %v1675_v9 = vshll.u32 %v1447_v15, 16  ;;  %v1654_v26 = vsel %vm8766_vm15, %v1649_v20, %v1653_v47  ;;  %v1668_v19 = vrot.slane %v1666_v51, 4  ;;  %v1014_v50 = vld [vmem:[#allocation2 + $0x80] sm:$0x1] }
 0x12b   : > { %7517 = vmatprep.mubr.msk.bf16.mxu1 %vm1172_vm7, %v6835_v14  ;;  %v6883_v11 = vcombine.low %v2359_v53, %v2362_v63  ;;  %v1679_v13 = vshrl.u32 %v1447_v15, 16  ;;  %v1659_v7 = vrot.slane %v1658_v55, 4  ;;  %v1671_v12 = vrot.slane %v1669_v37, 5  ;;  %v1452_v37 = vld [vmem:[#allocation2 + $0x78] sm:$0xf] }
 0x12c   : > { %v1677_v31 = vrot.slane %v1675_v9, 5  ;;  %v6868_v35 = vrot.slane %v2236_v17, 9  ;;  %v2365_v28 = vrot.slane %v2237_v34, 5  ;;  %v2368_v39 = vrot.slane %v2238_v38, 5 }
 0x12d   : > { %7551 = vmatprep.mubr.msk.bf16.mxu0 %vm1172_vm7, %v6883_v11  ;;  %v1681_v16 = vrot.slane %v1679_v13, 4  ;;  %v1008_v42 = vsel %vm8580_vm10, %v773_v5, %v1007_v4  ;;  %v1664_v48 = vsel %vm8766_vm15, %v1659_v7, %v1663_v21  ;;  %v1672_v56 = vor.u32 %v1671_v12, %v1668_v19  ;;  %v1453_v19 = vld [vmem:[#allocation2 + $0x7c] sm:$0xf]  ;;  %v2242_v13 = vld [vmem:[#allocation2 + $0x6c] sm:$0xe] }
 0x12e   : > { %1009 = vst [vmem:[#allocation2 + $0x74] sm:$0x1] %v1008_v42  ;;  %v1690_v59 = vshrl.u32 %v1449_v30, 16  ;;  %v1693_v47 = vshll.u32 %v1449_v30, 16  ;;  %v6836_v6 = vcombine.low %v1654_v26, %v1664_v48  ;;  %v2366_v18 = vsel %vm8804_vm0, %v6868_v35, %v2365_v28 }
 0x12f   : > { %v1448_v27 = vld [vmem:[#allocation2 + $0x68] sm:$0x1]  ;;  %v1682_v43 = vor.u32 %v1681_v16, %v1677_v31  ;;  %v2367_v57 = vrot.slane %v2365_v28, 4  ;;  %v1673_v10 = vrot.slane %v1672_v56, 4  ;;  %v1699_v24 = vshll.u32 %v1450_v32, 16 }
 0x130   : > { %v1685_v5 = vshll.u32 %v1448_v27, 16  ;;  %v1692_v61 = vrot.slane %v1690_v59, 4  ;;  %v1695_v15 = vrot.slane %v1693_v47, 5  ;;  %v2241_v0 = vld [vmem:[#allocation2 + $0x68] sm:$0x1]  ;;  %7518 = vmatmul.mubr.msk.bf16.gmra.mrb[28].mxu1 %vm1172_vm7, %v6836_v6  ;;  %v1703_v17 = vshrl.u32 %v1450_v32, 16 }
 0x131   : > { %v1683_v2 = vrot.slane %v1682_v43, 4  ;;  %v2369_v53 = vsel %vm8804_vm0, %v2367_v57, %v2368_v39  ;;  %v1678_v34 = vsel %vm8766_vm15, %v1673_v10, %v1677_v31  ;;  %v1701_v21 = vrot.slane %v1699_v24, 5  ;;  %v2243_v16 = vld [vmem:[#allocation2 + $0x70] sm:$0xf]  ;;  %v1021_v32 = vld [vmem:[#allocation2 + $0x8c] sm:$0x1] }
 0x132   : > { %v1687_v4 = vrot.slane %v1685_v5, 5  ;;  %v6884_v14 = vcombine.low %v2366_v18, %v2369_v53  ;;  %v1696_v20 = vor.u32 %v1695_v15, %v1692_v61  ;;  %v1705_v51 = vrot.slane %v1703_v17, 4  ;;  %v1455_v43 = vld [vmem:[#allocation2 + $0x84] sm:$0xf]  ;;  %v1456_v5 = vld [vmem:[#allocation2 + $0x88] sm:$0xf] }
 0x133   : > { %v6869_v55 = vrot.slane %v2239_v46, 9  ;;  %v2372_v63 = vrot.slane %v2240_v40, 5  ;;  %v2375_v26 = vrot.slane %v2241_v0, 5  ;;  %v1015_v11 = vsel %vm8580_vm10, %v790_v60, %v1014_v50  ;;  %v2245_v53 = vld [vmem:[#allocation2 + $0x78] sm:$0xe] }
 0x134   : > { %v1688_v9 = vsel %vm8766_vm15, %v1683_v2, %v1687_v4  ;;  %7552 = vmatmul.mubr.msk.bf16.gmra.mrb[28].mxu0 %vm1172_vm7, %v6884_v14  ;;  %v1697_v38 = vrot.slane %v1696_v20, 4  ;;  %v1706_v12 = vor.u32 %v1705_v51, %v1701_v21  ;;  %1016 = vst [vmem:[#allocation2 + $0x80] sm:$0x1] %v1015_v11  ;;  %v1714_v42 = vshrl.u32 %v1452_v37, 16  ;;  %v2246_v14 = vld [vmem:[#allocation2 + $0x7c] sm:$0xf] }
 0x135   : > { %v6837_v30 = vcombine.low %v1678_v34, %v1688_v9  ;;  %v1451_v7 = vld [vmem:[#allocation2 + $0x74] sm:$0x1]  ;;  %v2373_v31 = vsel %vm8804_vm0, %v6869_v55, %v2372_v63  ;;  %v2374_v35 = vrot.slane %v2372_v63, 4  ;;  %v1717_v45 = vshll.u32 %v1452_v37, 16  ;;  %v1028_v20 = vld [vmem:[#allocation2 + $0x98] sm:$0x1] }
 0x136   : > { %v1702_v28 = vsel %vm8766_vm15, %v1697_v38, %v1701_v21  ;;  %v1709_v39 = vshll.u32 %v1451_v7, 16  ;;  %v1707_v60 = vrot.slane %v1706_v12, 4  ;;  %v1723_v56 = vshll.u32 %v1453_v19, 16  ;;  %v2244_v47 = vld [vmem:[#allocation2 + $0x74] sm:$0x1] }
 0x137   : > { %7521 = vmatprep.mubr.msk.bf16.mxu1 %vm1172_vm7, %v6837_v30  ;;  %v2376_v48 = vsel %vm8804_vm0, %v2374_v35, %v2375_v26  ;;  %v1727_v59 = vshrl.u32 %v1453_v19, 16  ;;  %v1716_v6 = vrot.slane %v1714_v42, 4  ;;  %v1719_v27 = vrot.slane %v1717_v45, 5  ;;  %v1458_v7 = vld [vmem:[#allocation2 + $0x90] sm:$0xf] }
 0x138   : > { %v1711_v46 = vrot.slane %v1709_v39, 5  ;;  %v6885_v40 = vcombine.low %v2373_v31, %v2376_v48  ;;  %v1725_v18 = vrot.slane %v1723_v56, 5  ;;  %v6870_v50 = vrot.slane %v2242_v13, 9  ;;  %v1459_v56 = vld [vmem:[#allocation2 + $0x94] sm:$0xf] }
 0x139   : > { %v1729_v57 = vrot.slane %v1727_v59, 4  ;;  %v2379_v10 = vrot.slane %v2243_v16, 5  ;;  %v1720_v15 = vor.u32 %v1719_v27, %v1716_v6  ;;  %v2382_v0 = vrot.slane %v2244_v47, 5 }
 0x13a   : > { %v1712_v61 = vsel %vm8766_vm15, %v1707_v60, %v1711_v46  ;;  %7555 = vmatprep.mubr.msk.bf16.mxu0 %vm1172_vm7, %v6885_v40  ;;  %v1022_v2 = vsel %vm8580_vm10, %v807_v36, %v1021_v32  ;;  %v1738_v55 = vshrl.u32 %v1455_v43, 16  ;;  %v1741_v63 = vshll.u32 %v1455_v43, 16  ;;  %v2248_v32 = vld [vmem:[#allocation2 + $0x84] sm:$0xe]  ;;  %v2249_v46 = vld [vmem:[#allocation2 + $0x88] sm:$0xf] }
 0x13b   : > { %v6838_v24 = vcombine.low %v1702_v28, %v1712_v61  ;;  %v1730_v17 = vor.u32 %v1729_v57, %v1725_v18  ;;  %v2380_v34 = vsel %vm8804_vm0, %v6870_v50, %v2379_v10  ;;  %v2381_v4 = vrot.slane %v2379_v10, 4  ;;  %1023 = vst [vmem:[#allocation2 + $0x8c] sm:$0x1] %v1022_v2  ;;  %v1454_v21 = vld [vmem:[#allocation2 + $0x80] sm:$0x1] }
 0x13c   : > { %v1721_v51 = vrot.slane %v1720_v15, 4  ;;  %v1747_v37 = vshll.u32 %v1456_v5, 16  ;;  %v1733_v9 = vshll.u32 %v1454_v21, 16  ;;  %v1751_v38 = vshrl.u32 %v1456_v5, 16  ;;  %v2247_v26 = vld [vmem:[#allocation2 + $0x80] sm:$0x1] }
 0x13d   : > { %7522 = vmatmul.mubr.msk.bf16.gmra.mrb[32].mxu1 %vm1172_vm7, %v6838_v24  ;;  %v1731_v23 = vrot.slane %v1730_v17, 4  ;;  %v2383_v36 = vsel %vm8804_vm0, %v2381_v4, %v2382_v0  ;;  %v1740_v13 = vrot.slane %v1738_v55, 4  ;;  %v1743_v30 = vrot.slane %v1741_v63, 5  ;;  %v1461_v57 = vld [vmem:[#allocation2 + $0x9c] sm:$0xf] }
 0x13e   : > { %v1726_v11 = vsel %vm8766_vm15, %v1721_v51, %v1725_v18  ;;  %v6886_v19 = vcombine.low %v2380_v34, %v2383_v36  ;;  %v1735_v12 = vrot.slane %v1733_v9, 5  ;;  %v1749_v31 = vrot.slane %v1747_v37, 5  ;;  %v1035_v18 = vld [vmem:[#allocation2 + $0xa4] sm:$0x1]  ;;  %v2251_v55 = vld [vmem:[#allocation2 + $0x90] sm:$0xe] }
 0x13f   : > { %v1753_v35 = vrot.slane %v1751_v38, 4  ;;  %v6871_v16 = vrot.slane %v2245_v53, 9  ;;  %v1744_v28 = vor.u32 %v1743_v30, %v1740_v13  ;;  %v2386_v39 = vrot.slane %v2246_v14, 5  ;;  %v1462_v9 = vld [vmem:[#allocation2 + $0xa0] sm:$0xf] }
 0x140   : > { %7556 = vmatmul.mubr.msk.bf16.gmra.mrb[32].mxu0 %vm1172_vm7, %v6886_v19  ;;  %v2389_v42 = vrot.slane %v2247_v26, 5  ;;  %v1029_v45 = vsel %vm8580_vm10, %v824_v1, %v1028_v20  ;;  %v1736_v60 = vsel %vm8766_vm15, %v1731_v23, %v1735_v12  ;;  %v1762_v59 = vshrl.u32 %v1458_v7, 16  ;;  %v2252_v38 = vld [vmem:[#allocation2 + $0x94] sm:$0xf]  ;;  %v1464_v12 = vld [vmem:[#allocation2 + $0xa8] sm:$0xf] }
 0x141   : > { %v1754_v48 = vor.u32 %v1753_v35, %v1749_v31  ;;  %1030 = vst [vmem:[#allocation2 + $0x98] sm:$0x1] %v1029_v45  ;;  %v1765_v47 = vshll.u32 %v1458_v7, 16  ;;  %v6839_v40 = vcombine.low %v1726_v11, %v1736_v60  ;;  %v1745_v27 = vrot.slane %v1744_v28, 4  ;;  %v1042_v7 = vld [vmem:[#allocation2 + $0xb0] sm:$0x1] }
 0x142   : > { %v1457_v6 = vld [vmem:[#allocation2 + $0x8c] sm:$0x1]  ;;  %v2387_v43 = vsel %vm8804_vm0, %v6871_v16, %v2386_v39  ;;  %v2388_v52 = vrot.slane %v2386_v39, 4  ;;  %v1764_v10 = vrot.slane %v1762_v59, 4  ;;  %v1771_v2 = vshll.u32 %v1459_v56, 16 }
 0x143   : > { %v1755_v1 = vrot.slane %v1754_v48, 4  ;;  %v1757_v50 = vshll.u32 %v1457_v6, 16  ;;  %v1767_v5 = vrot.slane %v1765_v47, 5  ;;  %v2250_v61 = vld [vmem:[#allocation2 + $0x8c] sm:$0x1]  ;;  %7525 = vmatprep.mubr.msk.bf16.mxu1 %vm1172_vm7, %v6839_v40  ;;  %v1750_v15 = vsel %vm8766_vm15, %v1745_v27, %v1749_v31 }
 0x144   : > { %v2390_v0 = vsel %vm8804_vm0, %v2388_v52, %v2389_v42  ;;  %v1775_v53 = vshrl.u32 %v1459_v56, 16  ;;  %v6872_v4 = vrot.slane %v2248_v32, 9  ;;  %v1773_v14 = vrot.slane %v1771_v2, 5  ;;  %v1465_v6 = vld [vmem:[#allocation2 + $0xac] sm:$0xf] }
 0x145   : > { %v1759_v24 = vrot.slane %v1757_v50, 5  ;;  %v6887_v17 = vcombine.low %v2387_v43, %v2390_v0  ;;  %v1768_v34 = vor.u32 %v1767_v5, %v1764_v10  ;;  %v2393_v21 = vrot.slane %v2249_v46, 5  ;;  %v1467_v0 = vld [vmem:[#allocation2 + $0xb4] sm:$0xf] }
 0x146   : > { %v1777_v20 = vrot.slane %v1775_v53, 4  ;;  %v2396_v51 = vrot.slane %v2250_v61, 5  ;;  %v1036_v23 = vsel %vm8580_vm10, %v841_v22, %v1035_v18  ;;  %v1786_v36 = vshrl.u32 %v1461_v57, 16 }
 0x147   : > { %v1760_v63 = vsel %vm8766_vm15, %v1755_v1, %v1759_v24  ;;  %7559 = vmatprep.mubr.msk.bf16.mxu0 %vm1172_vm7, %v6887_v17  ;;  %v1769_v37 = vrot.slane %v1768_v34, 4  ;;  %v2394_v13 = vsel %vm8804_vm0, %v6872_v4, %v2393_v21  ;;  %v2395_v30 = vrot.slane %v2393_v21, 4  ;;  %1037 = vst [vmem:[#allocation2 + $0xa4] sm:$0x1] %v1036_v23  ;;  %v2255_v1 = vld [vmem:[#allocation2 + $0xa0] sm:$0xf] }
 0x148   : > { %v6840_v26 = vcombine.low %v1750_v15, %v1760_v63  ;;  %v1460_v11 = vld [vmem:[#allocation2 + $0x98] sm:$0x1]  ;;  %v1778_v19 = vor.u32 %v1777_v20, %v1773_v14  ;;  %v1788_v35 = vrot.slane %v1786_v36, 4  ;;  %v1789_v16 = vshll.u32 %v1461_v57, 16  ;;  %v2254_v57 = vld [vmem:[#allocation2 + $0x9c] sm:$0xe] }
 0x149   : > { %v1774_v31 = vsel %vm8766_vm15, %v1769_v37, %v1773_v14  ;;  %v1781_v8 = vshll.u32 %v1460_v11, 16  ;;  %v2253_v22 = vld [vmem:[#allocation2 + $0x98] sm:$0x1]  ;;  %v2397_v39 = vsel %vm8804_vm0, %v2395_v30, %v2396_v51  ;;  %v1795_v42 = vshll.u32 %v1462_v9, 16  ;;  %v1049_v15 = vld [vmem:[#allocation2 + $0xbc] sm:$0x1] }
 0x14a   : > { %7526 = vmatmul.mubr.msk.bf16.gmra.mrb[36].mxu1 %vm1172_vm7, %v6840_v26  ;;  %v1779_v28 = vrot.slane %v1778_v19, 4  ;;  %v1799_v45 = vshrl.u32 %v1462_v9, 16  ;;  %v6888_v60 = vcombine.low %v2394_v13, %v2397_v39  ;;  %v1791_v48 = vrot.slane %v1789_v16, 5  ;;  %v2257_v30 = vld [vmem:[#allocation2 + $0xa8] sm:$0xe] }
 0x14b   : > { %v1783_v32 = vrot.slane %v1781_v8, 5  ;;  %v6873_v56 = vrot.slane %v2251_v55, 9  ;;  %v1797_v59 = vrot.slane %v1795_v42, 5  ;;  %v2400_v46 = vrot.slane %v2252_v38, 5  ;;  %v1468_v38 = vld [vmem:[#allocation2 + $0xb8] sm:$0xf] }
 0x14c   : > { %v1801_v47 = vrot.slane %v1799_v45, 4  ;;  %v2403_v40 = vrot.slane %v2253_v22, 5  ;;  %7560 = vmatmul.mubr.msk.bf16.gmra.mrb[36].mxu0 %vm1172_vm7, %v6888_v60  ;;  %v1792_v43 = vor.u32 %v1791_v48, %v1788_v35  ;;  %v1043_v52 = vsel %vm8580_vm10, %v858_v62, %v1042_v7  ;;  %v2258_v35 = vld [vmem:[#allocation2 + $0xac] sm:$0xf]  ;;  %v2260_v16 = vld [vmem:[#allocation2 + $0xb4] sm:$0xe] }
 0x14d   : > { %v1784_v27 = vsel %vm8766_vm15, %v1779_v28, %v1783_v32  ;;  %v1810_v18 = vshrl.u32 %v1464_v12, 16  ;;  %v2401_v5 = vsel %vm8804_vm0, %v6873_v56, %v2400_v46  ;;  %v2402_v61 = vrot.slane %v2400_v46, 4  ;;  %1044 = vst [vmem:[#allocation2 + $0xb0] sm:$0x1] %v1043_v52 }
 0x14e   : > { %v6841_v50 = vcombine.low %v1774_v31, %v1784_v27  ;;  %v1802_v10 = vor.u32 %v1801_v47, %v1797_v59  ;;  %v1463_v2 = vld [vmem:[#allocation2 + $0xa4] sm:$0x1]  ;;  %v1793_v53 = vrot.slane %v1792_v43, 4  ;;  %v1813_v17 = vshll.u32 %v1464_v12, 16 }
 0x14f   : > { %v1812_v24 = vrot.slane %v1810_v18, 4  ;;  %v1819_v44 = vshll.u32 %v1465_v6, 16  ;;  %v1805_v34 = vshll.u32 %v1463_v2, 16  ;;  %v2404_v4 = vsel %vm8804_vm0, %v2402_v61, %v2403_v40  ;;  %v2256_v20 = vld [vmem:[#allocation2 + $0xa4] sm:$0x1] }
 0x150   : > { %7529 = vmatprep.mubr.msk.bf16.mxu1 %vm1172_vm7, %v6841_v50  ;;  %v1803_v62 = vrot.slane %v1802_v10, 4  ;;  %v1823_v14 = vshrl.u32 %v1465_v6, 16  ;;  %v1798_v21 = vsel %vm8766_vm15, %v1793_v53, %v1797_v59  ;;  %v6889_v51 = vcombine.low %v2401_v5, %v2404_v4  ;;  %v2261_v40 = vld [vmem:[#allocation2 + $0xb8] sm:$0xf]  ;;  %v4205_v6 = vld [vmem:[#allocation10 + $0xa] sm:$0x3] }
 0x151   : > { %v1815_v55 = vrot.slane %v1813_v17, 5  ;;  %v1821_v63 = vrot.slane %v1819_v44, 5  ;;  %v1807_v37 = vrot.slane %v1805_v34, 5  ;;  %v6874_v9 = vrot.slane %v2254_v57, 9  ;;  %v3206_v2 = vld [vmem:[#allocation2 + $0xc] sm:$0xf] }
 0x152   : > { %v1825_v23 = vrot.slane %v1823_v14, 4  ;;  %v2407_v36 = vrot.slane %v2255_v1, 5  ;;  %7563 = vmatprep.mubr.msk.bf16.mxu0 %vm1172_vm7, %v6889_v51  ;;  %v2410_v11 = vrot.slane %v2256_v20, 5  ;;  %v1050_v19 = vsel %vm8580_vm10, %v875_v41, %v1049_v15  ;;  %v3207_v53 = vld [vmem:[#allocation2 + $0x10] sm:$0xf] }
 0x153   : > { %v1816_v26 = vor.u32 %v1815_v55, %v1812_v24  ;;  %v1834_v13 = vshrl.u32 %v1467_v0, 16  ;;  %v1808_v7 = vsel %vm8766_vm15, %v1803_v62, %v1807_v37  ;;  %1051 = vst [vmem:[#allocation2 + $0xbc] sm:$0x1] %v1050_v19  ;;  %v1837_v42 = vshll.u32 %v1467_v0, 16  ;;  %v3208_v55 = vld [vmem:[#allocation2 + $0x14] sm:$0x1] }
 0x154   : > { %v1826_v12 = vor.u32 %v1825_v23, %v1821_v63  ;;  %v2408_v31 = vsel %vm8804_vm0, %v6874_v9, %v2407_v36  ;;  %v2409_v8 = vrot.slane %v2407_v36, 4  ;;  %v6842_v22 = vcombine.low %v1798_v21, %v1808_v7  ;;  %v1466_v28 = vld [vmem:[#allocation2 + $0xb0] sm:$0x1] }
 0x155   : > { %v1817_v39 = vrot.slane %v1816_v26, 4  ;;  %v1836_v25 = vrot.slane %v1834_v13, 4  ;;  %v1829_v41 = vshll.u32 %v1466_v28, 16  ;;  %v1843_v60 = vshll.u32 %v1468_v38, 16  ;;  %v2259_v48 = vld [vmem:[#allocation2 + $0xb0] sm:$0x1] }
 0x156   : > { %v1827_v45 = vrot.slane %v1826_v12, 4  ;;  %v2411_v32 = vsel %vm8804_vm0, %v2409_v8, %v2410_v11  ;;  %7530 = vmatmul.mubr.msk.bf16.gmra.mrb[40].mxu1 %vm1172_vm7, %v6842_v22  ;;  %v1839_v47 = vrot.slane %v1837_v42, 5  ;;  %v1847_v46 = vshrl.u32 %v1468_v38, 16  ;;  %v3210_v13 = vld [vmem:[#allocation2 + $0x1c] sm:$0xf]  ;;  %v7904_v7 = vld [vmem:[#allocation2 + $0xc] sm:$0xff]  }
 0x157   : > { %v1822_v56 = vsel %vm8766_vm15, %v1817_v39, %v1821_v63  ;;  %v6890_v59 = vcombine.low %v2408_v31, %v2411_v32  ;;  %v1831_v27 = vrot.slane %v1829_v41, 5  ;;  %v1845_v43 = vrot.slane %v1843_v60, 5  ;;  %v3209_v63 = vld [vmem:[#allocation2 + $0x18] sm:$0xf]  ;;  %v3211_v42 = vld [vmem:[#allocation2 + $0x20] sm:$0x1] }
 0x158   : > { %v6875_v52 = vrot.slane %v2257_v30, 9  ;;  %v2414_v18 = vrot.slane %v2258_v35, 5  ;;  %v1840_v57 = vor.u32 %v1839_v47, %v1836_v25  ;;  %v1849_v1 = vrot.slane %v1847_v46, 4  ;;  %v4596_v35 = vld [vmem:[#allocation10 + $0xc] sm:$0x3] }
 0x159   : > { %7564 = vmatmul.mubr.msk.bf16.gmra.mrb[40].mxu0 %vm1172_vm7, %v6890_v59  ;;  %v2417_v50 = vrot.slane %v2259_v48, 5  ;;  %v6876_v10 = vrot.slane %v2260_v16, 9  ;;  %v1832_v5 = vsel %vm8766_vm15, %v1827_v45, %v1831_v27  ;;  %v2421_v0 = vrot.slane %v2261_v40, 5  ;;  %v3212_v16 = vld [vmem:[#allocation2 + $0x24] sm:$0xf] }
 0x15a   : > { %v2415_v61 = vsel %vm8804_vm0, %v6875_v52, %v2414_v18  ;;  %v2416_v15 = vrot.slane %v2414_v18, 4  ;;  %v6843_v24 = vcombine.low %v1822_v56, %v1832_v5  ;;  %v1469_v17 = vld [vmem:[#allocation2 + $0xbc] sm:$0x1]  ;;  %v1841_v44 = vrot.slane %v1840_v57, 4  ;;  %v3214_v52 = vld [vmem:[#allocation2 + $0x2c] sm:$0x1] }
 0x15b   : > { %v1850_v62 = vor.u32 %v1849_v1, %v1845_v43  ;;  %v2262_v34 = vld [vmem:[#allocation2 + $0xbc] sm:$0x1]  ;;  %v8999_v4 = vand.u32 %v4205_v6, %v8511_v3  ;;  %v1853_v14 = vshll.u32 %v1469_v17, 16  ;;  %v2422_v21 = vsel %vm8804_vm0, %v6876_v10, %v2421_v0 }
 0x15c   : > { %v2418_v20 = vsel %vm8804_vm0, %v2416_v15, %v2417_v50  ;;  %v2423_v51 = vrot.slane %v2421_v0, 4  ;;  %7533 = vmatprep.mubr.msk.bf16.mxu1 %vm1172_vm7, %v6843_v24  ;;  %v1846_v37 = vsel %vm8766_vm15, %v1841_v44, %v1845_v43  ;;  %v2424_v36 = vrot.slane %v2262_v34, 5  ;;  %v3213_v43 = vld [vmem:[#allocation2 + $0x28] sm:$0xf]  ;;  %v7905_v0 = vld [vmem:[#allocation2 + $0x18] sm:$0xff]  }
 0x15d   : > { %v1851_v23 = vrot.slane %v1850_v62, 4  ;;  %v6891_v9 = vcombine.low %v2415_v61, %v2418_v20  ;;  %7639 = vmatprep.subr.bf16.mxu1 %v8999_v4  ;;  %v1855_v38 = vrot.slane %v1853_v14, 5  ;;  %v3255_v26 = vshrl.u32 %v3206_v2, 16  ;;  %v3215_v44 = vld [vmem:[#allocation2 + $0x30] sm:$0xf] }
 0x15e   : > { %v3258_v11 = vshll.u32 %v3206_v2, 16  ;;  %v3264_v19 = vshll.u32 %v3207_v53, 16  ;;  %v2425_v30 = vsel %vm8804_vm0, %v2423_v51, %v2424_v36  ;;  %v3268_v12 = vshrl.u32 %v3207_v53, 16 }
 0x15f   : > { %7567 = vmatprep.mubr.msk.bf16.mxu0 %vm1172_vm7, %v6891_v9  ;;  %v3274_v31 = vshll.u32 %v3208_v55, 16  ;;  %v3279_v8 = vshrl.u32 %v3209_v63, 16  ;;  %v1856_v22 = vsel %vm8766_vm15, %v1851_v23, %v1855_v38  ;;  %v6892_v28 = vcombine.low %v2422_v21, %v2425_v30  ;;  %v3216_v21 = vld [vmem:[#allocation2 + $0x34] sm:$0xf]  ;;  %v7906_v55 = vld [vmem:[#allocation2 + $0x24] sm:$0xff]  }
 0x160   : > { %v3257_v39 = vrot.slane %v3255_v26, 4  ;;  %v3260_v25 = vrot.slane %v3258_v11, 5  ;;  %v6844_v45 = vcombine.low %v1846_v37, %v1856_v22  ;;  %v3266_v41 = vrot.slane %v3264_v19, 5  ;;  %v3217_v26 = vld [vmem:[#allocation2 + $0x38] sm:$0x1] }
 0x161   : > { %v3270_v32 = vrot.slane %v3268_v12, 4  ;;  %v3276_v60 = vrot.slane %v3274_v31, 5  ;;  %7568 = vmatmul.mubr.msk.bf16.gmra.mrb[44].mxu0 %vm1172_vm7, %v6892_v28  ;;  %v3281_v56 = vrot.slane %v3279_v8, 4  ;;  %v3282_v59 = vshll.u32 %v3209_v63, 16  ;;  %v3218_v12 = vld [vmem:[#allocation2 + $0x3c] sm:$0xf] }
 0x162   : > { %v3261_v48 = vor.u32 %v3260_v25, %v3257_v39  ;;  %v3288_v47 = vshll.u32 %v3210_v13, 16  ;;  %7534 = vmatmul.mubr.msk.bf16.gmra.mrb[44].mxu1 %vm1172_vm7, %v6844_v45  ;;  %v3292_v40 = vshrl.u32 %v3210_v13, 16  ;;  %v3298_v6 = vshll.u32 %v3211_v42, 16  ;;  %v3219_v22 = vld [vmem:[#allocation2 + $0x40] sm:$0xf] }
 0x163   : > { %v3271_v46 = vor.u32 %v3270_v32, %v3266_v41  ;;  %v9017_v27 = vand.u32 %v4596_v35, %v8511_v3  ;;  %7573 = vmatprep.mubr.msk.bf16.mxu1 %vm1172_vm7, %v7904_v7  ;;  %v3284_v57 = vrot.slane %v3282_v59, 5  ;;  %v3303_v50 = vshrl.u32 %v3212_v16, 16 }
 0x164   : > { %v3262_v18 = vrot.slane %v3261_v48, 4  ;;  %v3290_v1 = vrot.slane %v3288_v47, 5  ;;  %v3294_v5 = vrot.slane %v3292_v40, 4  ;;  %v3300_v61 = vrot.slane %v3298_v6, 5  ;;  %v3221_v48 = vld [vmem:[#allocation2 + $0x48] sm:$0xf] }
 0x165   : > { %v3272_v10 = vrot.slane %v3271_v46, 4  ;;  %7673 = vmatprep.subr.bf16.mxu0 %v9017_v27  ;;  %v3306_v15 = vshll.u32 %v3212_v16, 16  ;;  %v3285_v53 = vor.u32 %v3284_v57, %v3281_v56  ;;  %v3305_v24 = vrot.slane %v3303_v50, 4  ;;  %v7907_v56 = vld [vmem:[#allocation2 + $0x30] sm:$0xff]   ;;  %v3220_v46 = vld [vmem:[#allocation2 + $0x44] sm:$0x1] }
 0x166   : > { %v3267_v2 = vsel %vm8766_vm15, %v3262_v18, %v3266_v41  ;;  %v3312_v17 = vshll.u32 %v3213_v43, 16  ;;  %v3295_v34 = vor.u32 %v3294_v5, %v3290_v1  ;;  %v3316_v20 = vshrl.u32 %v3213_v43, 16  ;;  %v7908_v43 = vld [vmem:[#allocation2 + $0x3c] sm:$0xff]  }
 0x167   : > { %v3277_v62 = vsel %vm8766_vm15, %v3272_v10, %v3276_v60  ;;  %v3308_v14 = vrot.slane %v3306_v15, 5  ;;  %v3286_v63 = vrot.slane %v3285_v53, 4  ;;  %v3322_v23 = vshll.u32 %v3214_v52, 16 }
 0x168   : > { %v6941_v51 = vcombine.low %v3267_v2, %v3277_v62  ;;  %v3314_v37 = vrot.slane %v3312_v17, 5  ;;  %v3296_v9 = vrot.slane %v3295_v34, 4  ;;  %v3318_v38 = vrot.slane %v3316_v20, 4  ;;  %v3223_v62 = vld [vmem:[#allocation2 + $0x50] sm:$0x1] }
 0x169   : > { %v3309_v36 = vor.u32 %v3308_v14, %v3305_v24  ;;  %v3327_v11 = vshrl.u32 %v3215_v44, 16  ;;  %v3291_v19 = vsel %vm8766_vm15, %v3286_v63, %v3290_v1  ;;  %v3324_v13 = vrot.slane %v3322_v23, 5  ;;  %v3222_v1 = vld [vmem:[#allocation2 + $0x4c] sm:$0xf]  ;;  %v3224_v24 = vld [vmem:[#allocation2 + $0x54] sm:$0xf] }
 0x16a   : > { %7607 = vmatprep.mubr.msk.bf16.mxu0 %vm1172_vm7, %v6941_v51  ;;  %v3330_v30 = vshll.u32 %v3215_v44, 16  ;;  %v3336_v7 = vshll.u32 %v3216_v21, 16  ;;  %7574 = vmatmul.mubr.msk.bf16.vlgmr.msra.gmra.mrb[48].mxu1 %vm1172_vm7, %v7905_v0  ;;  %v3301_v31 = vsel %vm8766_vm15, %v3296_v9, %v3300_v61  ;;  %v3319_v35 = vor.u32 %v3318_v38, %v3314_v37  ;;  %v3225_v14 = vld [vmem:[#allocation2 + $0x58] sm:$0xf]  ;;  %v7909_v38 = vld [vmem:[#allocation2 + $0x48] sm:$0xff]  }
 0x16b   : > { %v3310_v8 = vrot.slane %v3309_v36, 4  ;;  %v3329_v16 = vrot.slane %v3327_v11, 4  ;;  %7640 = vmatpush3.bf16.msra.mxu1 %v8999_v4  ;;  %7577 = vmatprep.mubr.msk.bf16.mxu1 %vm1172_vm7, %v7906_v55  ;;  %v6942_v28 = vcombine.low %v3291_v19, %v3301_v31  ;;  %v3340_v42 = vshrl.u32 %v3216_v21, 16  ;;  %v3226_v31 = vld [vmem:[#allocation2 + $0x5c] sm:$0x1] }
 0x16c   : > { %v3332_v39 = vrot.slane %v3330_v30, 5  ;;  %v3338_v25 = vrot.slane %v3336_v7, 5  ;;  %v3320_v41 = vrot.slane %v3319_v35, 4  ;;  %v3346_v32 = vshll.u32 %v3217_v26, 16  ;;  %v3228_v35 = vld [vmem:[#allocation2 + $0x64] sm:$0xf] }
 0x16d   : > { %v3315_v45 = vsel %vm8766_vm15, %v3310_v8, %v3314_v37  ;;  %v3351_v60 = vshrl.u32 %v3218_v12, 16  ;;  %7608 = vmatmul.mubr.msk.bf16.vlgmr.msra.gmra.mrb[48].mxu0 %vm1172_vm7, %v6942_v28  ;;  %v3342_v47 = vrot.slane %v3340_v42, 4  ;;  %v3354_v4 = vshll.u32 %v3218_v12, 16 }
 0x16e   : > { %v3333_v59 = vor.u32 %v3332_v39, %v3329_v16  ;;  %v3360_v40 = vshll.u32 %v3219_v22, 16  ;;  %7674 = vmatpush3.bf16.msra.mxu0 %v9017_v27  ;;  %v3325_v6 = vsel %vm8766_vm15, %v3320_v41, %v3324_v13  ;;  %v3348_v52 = vrot.slane %v3346_v32, 5  ;;  %v3227_v13 = vld [vmem:[#allocation2 + $0x60] sm:$0xf] }
 0x16f   : > { %v3353_v18 = vrot.slane %v3351_v60, 4  ;;  %v3364_v57 = vshrl.u32 %v3219_v22, 16  ;;  %v6943_v50 = vcombine.low %v3315_v45, %v3325_v6  ;;  %v3343_v5 = vor.u32 %v3342_v47, %v3338_v25  ;;  %v7910_v22 = vld [vmem:[#allocation2 + $0x54] sm:$0xff]   ;;  %v3230_v6 = vld [vmem:[#allocation2 + $0x6c] sm:$0xf] }
 0x170   : > { %v3334_v10 = vrot.slane %v3333_v59, 4  ;;  %v3356_v61 = vrot.slane %v3354_v4, 5  ;;  %v3362_v15 = vrot.slane %v3360_v40, 5  ;;  %v3370_v2 = vshll.u32 %v3220_v46, 16 }
 0x171   : > { %v3366_v0 = vrot.slane %v3364_v57, 4  ;;  %v3375_v53 = vshrl.u32 %v3221_v48, 16  ;;  %7611 = vmatprep.mubr.msk.bf16.mxu0 %vm1172_vm7, %v6943_v50  ;;  %v3344_v17 = vrot.slane %v3343_v5, 4  ;;  %v3378_v34 = vshll.u32 %v3221_v48, 16  ;;  %v3229_v57 = vld [vmem:[#allocation2 + $0x68] sm:$0x1] }
 0x172   : > { %v3339_v27 = vsel %vm8766_vm15, %v3334_v10, %v3338_v25  ;;  %v3357_v44 = vor.u32 %v3356_v61, %v3353_v18  ;;  %7578 = vmatmul.mubr.msk.bf16.gmra.mrb[52].mxu1 %vm1172_vm7, %v7907_v56  ;;  %v3372_v21 = vrot.slane %v3370_v2, 5  ;;  %v3384_v55 = vshll.u32 %v3222_v1, 16 }
 0x173   : > { %v3367_v20 = vor.u32 %v3366_v0, %v3362_v15  ;;  %v3377_v51 = vrot.slane %v3375_v53, 4  ;;  %7581 = vmatprep.mubr.msk.bf16.mxu1 %vm1172_vm7, %v7908_v43  ;;  %v3349_v63 = vsel %vm8766_vm15, %v3344_v17, %v3348_v52  ;;  %v3380_v23 = vrot.slane %v3378_v34, 5  ;;  %v7911_v34 = vld [vmem:[#allocation2 + $0x60] sm:$0xff]  }
 0x174   : > { %v3358_v37 = vrot.slane %v3357_v44, 4  ;;  %v3388_v9 = vshrl.u32 %v3222_v1, 16  ;;  %v6944_v36 = vcombine.low %v3339_v27, %v3349_v63  ;;  %v3386_v11 = vrot.slane %v3384_v55, 5  ;;  %v7912_v63 = vld [vmem:[#allocation2 + $0x6c] sm:$0xff]  }
 0x175   : > { %v3368_v26 = vrot.slane %v3367_v20, 4  ;;  %v3394_v19 = vshll.u32 %v3223_v62, 16  ;;  %v3381_v7 = vor.u32 %v3380_v23, %v3377_v51  ;;  %v3399_v8 = vshrl.u32 %v3224_v24, 16 }
 0x176   : > { %v3363_v30 = vsel %vm8766_vm15, %v3358_v37, %v3362_v15  ;;  %v3390_v12 = vrot.slane %v3388_v9, 4  ;;  %7612 = vmatmul.mubr.msk.bf16.gmra.mrb[52].mxu0 %vm1172_vm7, %v6944_v36  ;;  %v3402_v39 = vshll.u32 %v3224_v24, 16  ;;  %v3408_v25 = vshll.u32 %v3225_v14, 16  ;;  %v3231_v15 = vld [vmem:[#allocation2 + $0x70] sm:$0xf] }
 0x177   : > { %v3373_v16 = vsel %vm8766_vm15, %v3368_v26, %v3372_v21  ;;  %v3396_v28 = vrot.slane %v3394_v19, 5  ;;  %v3382_v45 = vrot.slane %v3381_v7, 4  ;;  %v3401_v32 = vrot.slane %v3399_v8, 4  ;;  %v3232_v21 = vld [vmem:[#allocation2 + $0x74] sm:$0x1] }
 0x178   : > { %v6945_v42 = vcombine.low %v3363_v30, %v3373_v16  ;;  %v3391_v41 = vor.u32 %v3390_v12, %v3386_v11  ;;  %v3404_v60 = vrot.slane %v3402_v39, 5  ;;  %v3410_v48 = vrot.slane %v3408_v25, 5  ;;  %v3234_v30 = vld [vmem:[#allocation2 + $0x7c] sm:$0xf] }
 0x179   : > { %v3412_v56 = vshrl.u32 %v3225_v14, 16  ;;  %v3418_v59 = vshll.u32 %v3226_v31, 16  ;;  %v3387_v47 = vsel %vm8766_vm15, %v3382_v45, %v3386_v11  ;;  %v3423_v4 = vshrl.u32 %v3227_v13, 16 }
 0x17a   : > { %7615 = vmatprep.mubr.msk.bf16.mxu0 %vm1172_vm7, %v6945_v42  ;;  %v3392_v46 = vrot.slane %v3391_v41, 4  ;;  %v3426_v40 = vshll.u32 %v3227_v13, 16  ;;  %7582 = vmatmul.mubr.msk.bf16.gmra.mrb[56].mxu1 %vm1172_vm7, %v7909_v38  ;;  %v3405_v43 = vor.u32 %v3404_v60, %v3401_v32  ;;  %v3432_v1 = vshll.u32 %v3228_v35, 16  ;;  %v3233_v38 = vld [vmem:[#allocation2 + $0x78] sm:$0xf] }
 0x17b   : > { %v3414_v52 = vrot.slane %v3412_v56, 4  ;;  %v3420_v18 = vrot.slane %v3418_v59, 5  ;;  %7585 = vmatprep.mubr.msk.bf16.mxu1 %vm1172_vm7, %v7910_v22  ;;  %v3425_v10 = vrot.slane %v3423_v4, 4  ;;  %v3436_v61 = vshrl.u32 %v3228_v35, 16  ;;  %v3235_v22 = vld [vmem:[#allocation2 + $0x80] sm:$0x1] }
 0x17c   : > { %v3397_v50 = vsel %vm8766_vm15, %v3392_v46, %v3396_v28  ;;  %v3428_v5 = vrot.slane %v3426_v40, 5  ;;  %v3406_v2 = vrot.slane %v3405_v43, 4  ;;  %v3434_v24 = vrot.slane %v3432_v1, 5  ;;  %v3236_v32 = vld [vmem:[#allocation2 + $0x84] sm:$0xf]  ;;  %v7913_v43 = vld [vmem:[#allocation2 + $0x78] sm:$0xff]  }
 0x17d   : > { %v6946_v0 = vcombine.low %v3387_v47, %v3397_v50  ;;  %v3415_v53 = vor.u32 %v3414_v52, %v3410_v48  ;;  %v3438_v17 = vrot.slane %v3436_v61, 4  ;;  %v3442_v44 = vshll.u32 %v3229_v57, 16  ;;  %v3237_v47 = vld [vmem:[#allocation2 + $0x88] sm:$0xf] }
 0x17e   : > { %v3429_v27 = vor.u32 %v3428_v5, %v3425_v10  ;;  %v3447_v62 = vshrl.u32 %v3230_v6, 16  ;;  %v3411_v14 = vsel %vm8766_vm15, %v3406_v2, %v3410_v48  ;;  %v3450_v51 = vshll.u32 %v3230_v6, 16  ;;  %v7914_v57 = vld [vmem:[#allocation2 + $0x84] sm:$0xff]   ;;  %v3239_v2 = vld [vmem:[#allocation2 + $0x90] sm:$0xf] }
 0x17f   : > { %7616 = vmatmul.mubr.msk.bf16.gmra.mrb[56].mxu0 %vm1172_vm7, %v6946_v0  ;;  %v3416_v20 = vrot.slane %v3415_v53, 4  ;;  %v3456_v55 = vshll.u32 %v3231_v15, 16  ;;  %v3439_v23 = vor.u32 %v3438_v17, %v3434_v24  ;;  %v3444_v9 = vrot.slane %v3442_v44, 5  ;;  %v3240_v44 = vld [vmem:[#allocation2 + $0x94] sm:$0xf] }
 0x180   : > { %v3430_v37 = vrot.slane %v3429_v27, 4  ;;  %v3449_v36 = vrot.slane %v3447_v62, 4  ;;  %v3452_v11 = vrot.slane %v3450_v51, 5  ;;  %v3460_v13 = vshrl.u32 %v3231_v15, 16  ;;  %v3238_v15 = vld [vmem:[#allocation2 + $0x8c] sm:$0x1] }
 0x181   : > { %v3421_v26 = vsel %vm8766_vm15, %v3416_v20, %v3420_v18  ;;  %v3458_v19 = vrot.slane %v3456_v55, 5  ;;  %v3440_v31 = vrot.slane %v3439_v23, 4  ;;  %v3466_v8 = vshll.u32 %v3232_v21, 16 }
 0x182   : > { %v6947_v7 = vcombine.low %v3411_v14, %v3421_v26  ;;  %v3435_v12 = vsel %vm8766_vm15, %v3430_v37, %v3434_v24  ;;  %7586 = vmatmul.mubr.msk.bf16.gmra.mrb[60].mxu1 %vm1172_vm7, %v7911_v34  ;;  %v3453_v35 = vor.u32 %v3452_v11, %v3449_v36  ;;  %v3462_v16 = vrot.slane %v3460_v13, 4  ;;  %v3242_v26 = vld [vmem:[#allocation2 + $0x9c] sm:$0xf] }
 0x183   : > { %v3471_v28 = vshrl.u32 %v3233_v38, 16  ;;  %v3474_v39 = vshll.u32 %v3233_v38, 16  ;;  %7589 = vmatprep.mubr.msk.bf16.mxu1 %vm1172_vm7, %v7912_v63  ;;  %v3445_v25 = vsel %vm8766_vm15, %v3440_v31, %v3444_v9  ;;  %v3468_v42 = vrot.slane %v3466_v8, 5  ;;  %v3241_v9 = vld [vmem:[#allocation2 + $0x98] sm:$0x1] }
 0x184   : > { %7619 = vmatprep.mubr.msk.bf16.mxu0 %vm1172_vm7, %v6947_v7  ;;  %v3480_v45 = vshll.u32 %v3234_v30, 16  ;;  %v3484_v41 = vshrl.u32 %v3234_v30, 16  ;;  %v6948_v60 = vcombine.low %v3435_v12, %v3445_v25  ;;  %v3454_v48 = vrot.slane %v3453_v35, 4  ;;  %v3243_v7 = vld [vmem:[#allocation2 + $0xa0] sm:$0xf] }
 0x185   : > { %v3463_v56 = vor.u32 %v3462_v16, %v3458_v19  ;;  %v3473_v59 = vrot.slane %v3471_v28, 4  ;;  %v3476_v46 = vrot.slane %v3474_v39, 5  ;;  %v3490_v6 = vshll.u32 %v3235_v22, 16  ;;  %v7915_v16 = vld [vmem:[#allocation2 + $0x90] sm:$0xff]  }
 0x186   : > { %v3482_v4 = vrot.slane %v3480_v45, 5  ;;  %v3486_v40 = vrot.slane %v3484_v41, 4  ;;  %v3459_v52 = vsel %vm8766_vm15, %v3454_v48, %v3458_v19  ;;  %v3495_v1 = vshrl.u32 %v3236_v32, 16  ;;  %v7916_v45 = vld [vmem:[#allocation2 + $0x9c] sm:$0xff]  }
 0x187   : > { %7620 = vmatmul.mubr.msk.bf16.gmra.mrb[60].mxu0 %vm1172_vm7, %v6948_v60  ;;  %v3464_v18 = vrot.slane %v3463_v56, 4  ;;  %v3498_v50 = vshll.u32 %v3236_v32, 16  ;;  %v3477_v10 = vor.u32 %v3476_v46, %v3473_v59  ;;  %v3492_v61 = vrot.slane %v3490_v6, 5  ;;  %v3244_v60 = vld [vmem:[#allocation2 + $0xa4] sm:$0x1] }
 0x188   : > { %v3487_v5 = vor.u32 %v3486_v40, %v3482_v4  ;;  %v3504_v0 = vshll.u32 %v3237_v47, 16  ;;  %v3497_v24 = vrot.slane %v3495_v1, 4  ;;  %v3508_v17 = vshrl.u32 %v3237_v47, 16 }
 0x189   : > { %v3469_v53 = vsel %vm8766_vm15, %v3464_v18, %v3468_v42  ;;  %v3500_v27 = vrot.slane %v3498_v50, 5  ;;  %v3478_v34 = vrot.slane %v3477_v10, 4  ;;  %v3514_v55 = vshll.u32 %v3238_v15, 16  ;;  %v3245_v42 = vld [vmem:[#allocation2 + $0xa8] sm:$0xf] }
 0x18a   : > { %v6949_v62 = vcombine.low %v3459_v52, %v3469_v53  ;;  %v3488_v14 = vrot.slane %v3487_v5, 4  ;;  %v3506_v20 = vrot.slane %v3504_v0, 5  ;;  %7590 = vmatmul.mubr.msk.bf16.gmra.mrb[64].mxu1 %vm1172_vm7, %v7913_v43  ;;  %v3510_v51 = vrot.slane %v3508_v17, 4  ;;  %v3246_v18 = vld [vmem:[#allocation2 + $0xac] sm:$0xf] }
 0x18b   : > { %v3501_v21 = vor.u32 %v3500_v27, %v3497_v24  ;;  %v3519_v63 = vshrl.u32 %v3239_v2, 16  ;;  %7593 = vmatprep.mubr.msk.bf16.mxu1 %vm1172_vm7, %v7914_v57  ;;  %v3483_v37 = vsel %vm8766_vm15, %v3478_v34, %v3482_v4  ;;  %v3522_v36 = vshll.u32 %v3239_v2, 16  ;;  %v3247_v0 = vld [vmem:[#allocation2 + $0xb0] sm:$0x1] }
 0x18c   : > { %7623 = vmatprep.mubr.msk.bf16.mxu0 %vm1172_vm7, %v6949_v62  ;;  %v3493_v23 = vsel %vm8766_vm15, %v3488_v14, %v3492_v61  ;;  %v3528_v38 = vshll.u32 %v3240_v44, 16  ;;  %v3511_v13 = vor.u32 %v3510_v51, %v3506_v20  ;;  %v3516_v30 = vrot.slane %v3514_v55, 5  ;;  %v7917_v55 = vld [vmem:[#allocation2 + $0xa8] sm:$0xff]  }
 0x18d   : > { %v6950_v11 = vcombine.low %v3483_v37, %v3493_v23  ;;  %v3502_v19 = vrot.slane %v3501_v21, 4  ;;  %v3521_v12 = vrot.slane %v3519_v63, 4  ;;  %v3524_v31 = vrot.slane %v3522_v36, 5  ;;  %v3248_v21 = vld [vmem:[#allocation2 + $0xb4] sm:$0xf] }
 0x18e   : > { %v3530_v8 = vrot.slane %v3528_v38, 5  ;;  %v3532_v35 = vshrl.u32 %v3240_v44, 16  ;;  %v3512_v28 = vrot.slane %v3511_v13, 4  ;;  %v3538_v39 = vshll.u32 %v3241_v9, 16  ;;  %v7315_v44 = vld [vmem:[%s8442_s25 + $0x78] sm:$0xff]  }
 0x18f   : > { %7624 = vmatmul.mubr.msk.bf16.gmra.mrb[64].mxu0 %vm1172_vm7, %v6950_v11  ;;  %v3507_v22 = vsel %vm8766_vm15, %v3502_v19, %v3506_v20  ;;  %v3543_v25 = vshrl.u32 %v3242_v26, 16  ;;  %v3525_v41 = vor.u32 %v3524_v31, %v3521_v12  ;;  %v3546_v48 = vshll.u32 %v3242_v26, 16  ;;  %v7918_v36 = vld [vmem:[#allocation2 + $0xb4] sm:$0xff]  }
 0x190   : > { %v3534_v32 = vrot.slane %v3532_v35, 4  ;;  %v3552_v56 = vshll.u32 %v3243_v7, 16  ;;  %v3517_v59 = vsel %vm8766_vm15, %v3512_v28, %v3516_v30  ;;  %v3540_v47 = vrot.slane %v3538_v39, 5  ;;  %v3249_v19 = vld [vmem:[#allocation2 + $0xb8] sm:$0xf] }
 0x191   : > { %v3545_v46 = vrot.slane %v3543_v25, 4  ;;  %v3556_v4 = vshrl.u32 %v3243_v7, 16  ;;  %v6951_v40 = vcombine.low %v3507_v22, %v3517_v59  ;;  %v3526_v6 = vrot.slane %v3525_v41, 4  ;;  %v3250_v28 = vld [vmem:[#allocation2 + $0xbc] sm:$0x1] }
 0x192   : > { %v3535_v43 = vor.u32 %v3534_v32, %v3530_v8  ;;  %v3548_v52 = vrot.slane %v3546_v48, 5  ;;  %7594 = vmatmul.mubr.msk.bf16.gmra.mrb[68].mxu1 %vm1172_vm7, %v7915_v16  ;;  %v3554_v57 = vrot.slane %v3552_v56, 5  ;;  %v3562_v50 = vshll.u32 %v3244_v60, 16  ;;  %v7936_v16 = vld [vmem:[#allocation7] ss:$0 sm:$0xff] }
 0x193   : > { %v3558_v1 = vrot.slane %v3556_v4, 4  ;;  %v3567_v10 = vshrl.u32 %v3245_v42, 16  ;;  %7627 = vmatprep.mubr.msk.bf16.mxu0 %vm1172_vm7, %v6951_v40  ;;  %7597 = vmatprep.mubr.msk.bf16.mxu1 %vm1172_vm7, %v7916_v45  ;;  %v3531_v5 = vsel %vm8766_vm15, %v3526_v6, %v3530_v8  ;;  %v3570_v2 = vshll.u32 %v3245_v42, 16  ;;  %v7937_v56 = vld [vmem:[#allocation9] ss:$0 sm:$0xff] }
 0x194   : > { %v3536_v61 = vrot.slane %v3535_v43, 4  ;;  %v3549_v15 = vor.u32 %v3548_v52, %v3545_v46  ;;  %v3564_v24 = vrot.slane %v3562_v50, 5  ;;  %v3576_v17 = vshll.u32 %v3246_v18, 16  ;;  %v3996_v46 = vld [vmem:[#allocation2 + $0xc] sm:$0xe] }
 0x195   : > { %v3559_v53 = vor.u32 %v3558_v1, %v3554_v57  ;;  %v3569_v27 = vrot.slane %v3567_v10, 4  ;;  %v3572_v14 = vrot.slane %v3570_v2, 5  ;;  %v3580_v20 = vshrl.u32 %v3246_v18, 16  ;;  %v3997_v10 = vld [vmem:[#allocation2 + $0x10] sm:$0xf] }
 0x196   : > { %v3541_v62 = vsel %vm8766_vm15, %v3536_v61, %v3540_v47  ;;  %v3550_v34 = vrot.slane %v3549_v15, 4  ;;  %v3578_v37 = vrot.slane %v3576_v17, 5  ;;  %v3586_v23 = vshll.u32 %v3247_v0, 16  ;;  %v9115_v0 = vld [vmem:[#allocation2 + $0x14] sm:$0x1] }
 0x197   : > { %v6952_v51 = vcombine.low %v3531_v5, %v3541_v62  ;;  %v3560_v63 = vrot.slane %v3559_v53, 4  ;;  %v3573_v38 = vor.u32 %v3572_v14, %v3569_v27  ;;  %v3582_v26 = vrot.slane %v3580_v20, 4  ;;  %v1052_v20 = vld [vmem:[#allocation2 + $0xc0] sm:$0xf] }
 0x198   : > { %v3555_v9 = vsel %vm8766_vm15, %v3550_v34, %v3554_v57  ;;  %v7299_v11 = vunpack.c.l.bf16 %v7315_v44  ;;  %v3588_v30 = vrot.slane %v3586_v23, 5  ;;  %v7300_v7 = vunpack.c.h.bf16 %v7315_v44  ;;  %v5418_v44 = vld [vmem:[#allocation10 + $0xe] sm:$0x3] }
 0x199   : > { %7628 = vmatmul.mubr.msk.bf16.gmra.mrb[68].mxu0 %vm1172_vm7, %v6952_v51  ;;  %v3565_v13 = vsel %vm8766_vm15, %v3560_v63, %v3564_v24  ;;  %v3591_v12 = vshrl.u32 %v3248_v21, 16  ;;  %v3574_v8 = vrot.slane %v3573_v38, 4  ;;  %v3583_v35 = vor.u32 %v3582_v26, %v3578_v37  ;;  %v4000_v63 = vld [vmem:[#allocation2 + $0x1c] sm:$0xf]  ;;  %v4001_v38 = vld [vmem:[#allocation2 + $0x20] sm:$0x1] }
 0x19a   : > { %v6953_v31 = vcombine.low %v3555_v9, %v3565_v13  ;;  %v425_v22 = vmul.f32 %v7936_v16, %v7299_v11  ;;  %7598 = vmatmul.mubr.msk.bf16.gmra.mrb[72].mxu1 %vm1172_vm7, %v7917_v55  ;;  %v426_v25 = vmul.f32 %v7936_v16, %v7300_v7  ;;  %v3594_v45 = vshll.u32 %v3248_v21, 16  ;;  %v3999_v55 = vld [vmem:[#allocation2 + $0x18] sm:$0xe]  ;;  %v4002_v26 = vld [vmem:[#allocation2 + $0x24] sm:$0xe] }
 0x19b   : > { %v3593_v42 = vrot.slane %v3591_v12, 4  ;;  %v3600_v41 = vshll.u32 %v3249_v19, 16  ;;  %7601 = vmatprep.mubr.msk.bf16.mxu1 %vm1172_vm7, %v7918_v36  ;;  %v3579_v60 = vsel %vm8766_vm15, %v3574_v8, %v3578_v37  ;;  %v3584_v48 = vrot.slane %v3583_v35, 4  ;;  %v1056_v36 = vld [vmem:[#allocation2 + $0xc8] sm:$0x1] }
 0x19c   : > { %7631 = vmatprep.mubr.msk.bf16.mxu0 %vm1172_vm7, %v6953_v31  ;;  %v464_v59 = vadd.f32 %v7937_v56, %v425_v22  ;;  %v3604_v47 = vshrl.u32 %v3249_v19, 16  ;;  %v465_v40 = vadd.f32 %v7937_v56, %v426_v25  ;;  %v3596_v6 = vrot.slane %v3594_v45, 5  ;;  %v4003_v12 = vld [vmem:[#allocation2 + $0x28] sm:$0xf]  ;;  %v4005_v25 = vld [vmem:[#allocation2 + $0x30] sm:$0xe] }
 0x19d   : > { %v3602_v43 = vrot.slane %v3600_v41, 5  ;;  %v3610_v52 = vshll.u32 %v3250_v28, 16  ;;  %v3589_v57 = vsel %vm8766_vm15, %v3584_v48, %v3588_v30  ;;  %v6973_v2 = vrot.slane %v3996_v46, 9  ;;  %v4004_v28 = vld [vmem:[#allocation2 + $0x2c] sm:$0x1] }
 0x19e   : > { %v7202_v1 = vpack.c.bf16 %v464_v59, %v464_v59  ;;  %v3606_v50 = vrot.slane %v3604_v47, 4  ;;  %v6954_v5 = vcombine.low %v3579_v60, %v3589_v57  ;;  %v7203_v61 = vpack.c.bf16 %v465_v40, %v465_v40  ;;  %v4006_v48 = vld [vmem:[#allocation2 + $0x34] sm:$0xf]  ;;  %v4007_v56 = vld [vmem:[#allocation2 + $0x38] sm:$0x1] }
 0x19f   : > { %v9100_v39 = vpop.f32.mrb[0].mxu1  ;;  %v3597_v15 = vor.u32 %v3596_v6, %v3593_v42  ;;  %v3612_v17 = vrot.slane %v3610_v52, 5  ;;  %v4094_v51 = vrot.slane %v3997_v10, 5  ;;  %v4097_v30 = vrot.slane %v9115_v0, 5  ;;  %v5984_v6 = vld [vmem:[#allocation10 + $0x10] sm:$0x3] }
 0x1a0   : > { %v9103_v32 = vpop.f32.mrb[1].mxu1  ;;  %v877_v53 = vshrl.u32 %v7202_v1, 16  ;;  %v880_v24 = vshll.u32 %v7202_v1, 16  ;;  %v3607_v27 = vor.u32 %v3606_v50, %v3602_v43  ;;  %v9117_v62 = vpop.f32.mrb[0].mxu0  ;;  %v885_v34 = vshrl.u32 %v7203_v61, 16 }
 0x1a1   : > { %v9109_v4 = vpop.f32.mrb[2].mxu1  ;;  %7632 = vmatmul.mubr.msk.bf16.gmra.mrb[72].mxu0 %vm1172_vm7, %v6954_v5  ;;  %v888_v14 = vshll.u32 %v7203_v61, 16  ;;  %v3598_v21 = vrot.slane %v3597_v15, 4  ;;  %v9120_v37 = vpop.f32.mrb[1].mxu0  ;;  %v9128_v7 = vand.u32 %v5418_v44, %v8511_v3  ;;  %v9136_v22 = vsel %vm8804_vm0, %v6973_v2, %v4094_v51  ;;  %v4008_v50 = vld [vmem:[#allocation2 + $0x3c] sm:$0xe] }
 0x1a2   : > { %v9111_v18 = vpop.f32.mrb[3].mxu1  ;;  %v879_v23 = vrot.slane %v877_v53, 7  ;;  %v3608_v9 = vrot.slane %v3607_v27, 4  ;;  %v9122_v11 = vpop.f32.mrb[2].mxu0  ;;  %v887_v19 = vrot.slane %v885_v34, 7  ;;  %v4096_v60 = vrot.slane %v4094_v51, 4 }
 0x1a3   : > { %v3603_v13 = vsel %vm8766_vm15, %v3598_v21, %v3602_v43  ;;  %v9130_v31 = vpop.f32.mrb[3].mxu0  ;;  %7707 = vmatprep.subr.bf16.mxu1 %v9128_v7  ;;  %v6974_v47 = vrot.slane %v3999_v55, 9  ;;  %v4101_v46 = vrot.slane %v4000_v63, 5  ;;  %v6975_v40 = vrot.slane %v4002_v26, 9  ;;  %v4009_v10 = vld [vmem:[#allocation2 + $0x40] sm:$0xf] }
 0x1a4   : > { %v882_v8 = vor.u32 %v880_v24, %v879_v23  ;;  %v883_v35 = vrot.slane %v879_v23, 4  ;;  %v3613_v16 = vsel %vm8766_vm15, %v3608_v9, %v3612_v17  ;;  %v890_v42 = vor.u32 %v888_v14, %v887_v19  ;;  %v4010_v0 = vld [vmem:[#allocation2 + $0x44] sm:$0x1]  ;;  %v4011_v24 = vld [vmem:[#allocation2 + $0x48] sm:$0xe] }
 0x1a5   : > { %v892_v45 = vrot.slane %v887_v19, 4  ;;  %v6955_v41 = vcombine.low %v3603_v13, %v3613_v16  ;;  %v4104_v57 = vrot.slane %v4001_v38, 5  ;;  %v4108_v1 = vrot.slane %v4003_v12, 5  ;;  %v4012_v27 = vld [vmem:[#allocation2 + $0x4c] sm:$0xf] }
 0x1a6   : > { %v1053_v59 = vsel %vm8551_vm9, %v882_v8, %v1052_v20  ;;  %v891_v43 = vsel %vm8543_vm8, %v883_v35, %v890_v42  ;;  %v4103_v54 = vrot.slane %v4101_v46, 4  ;;  %v4111_v5 = vrot.slane %v4004_v28, 5  ;;  %v4013_v20 = vld [vmem:[#allocation2 + $0x50] sm:$0x1]  ;;  %v4014_v63 = vld [vmem:[#allocation2 + $0x54] sm:$0xe] }
 0x1a7   : > { %1054 = vst [vmem:[#allocation2 + $0xc0] sm:$0xf] %v1053_v59  ;;  %7635 = vmatprep.mubr.msk.bf16.mxu0 %vm1172_vm7, %v6955_v41  ;;  %v1057_v52 = vsel %vm8580_vm10, %v892_v45, %v1056_v36  ;;  %1055 = vst.msk [vmem:[#allocation2 + $0xc4] sm:$0xf] %vm482_vm1, %v891_v43  ;;  %v6976_v61 = vrot.slane %v4005_v25, 9  ;;  %v4115_v15 = vrot.slane %v4006_v48, 5  ;;  %v4098_v49 = vsel %vm8804_vm0, %v4096_v60, %v4097_v30 }
 0x1a8   : > { %1058 = vst [vmem:[#allocation2 + $0xc8] sm:$0x1] %v1057_v52  ;;  %v4110_v2 = vrot.slane %v4108_v1, 4  ;;  %v4118_v53 = vrot.slane %v4007_v56, 5  ;;  %v9150_v29 = vand.u32 %v5984_v6, %v8511_v3  ;;  %v9154_v17 = vsel %vm8804_vm0, %v6974_v47, %v4101_v46  ;;  %v4015_v8 = vld [vmem:[#allocation2 + $0x58] sm:$0xf] }
 0x1a9   : > { %v9158_v44 = vsel %vm8804_vm0, %v6975_v40, %v4108_v1  ;;  %v4117_v34 = vrot.slane %v4115_v15, 4  ;;  %v6977_v14 = vrot.slane %v4008_v50, 9  ;;  %v9162_v21 = vsel %vm8804_vm0, %v4103_v54, %v4104_v57  ;;  %v9169_v23 = vpop.f32.mrb[4].mxu1  ;;  %v4016_v45 = vld [vmem:[#allocation2 + $0x5c] sm:$0x1] }
 0x1aa   : > { %v9166_v3 = vsel %vm8804_vm0, %v6976_v61, %v4115_v15  ;;  %7741 = vmatprep.subr.bf16.mxu0 %v9150_v29  ;;  %v4122_v51 = vrot.slane %v4009_v10, 5  ;;  %v4125_v55 = vrot.slane %v4010_v0, 5  ;;  %v9173_v9 = vsel %vm8804_vm0, %v4110_v2, %v4111_v5  ;;  %v9179_v19 = vpop.f32.mrb[5].mxu1  ;;  %v4017_v46 = vld [vmem:[#allocation2 + $0x60] sm:$0xe] }
 0x1ab   : > { %v9177_v36 = vsel %vm8804_vm0, %v4117_v34, %v4118_v53  ;;  %v6978_v38 = vrot.slane %v4011_v24, 9  ;;  %v4129_v26 = vrot.slane %v4012_v27, 5  ;;  %v6989_v13 = vcombine.low %v9136_v22, %v4098_v49  ;;  %v9182_v35 = vpop.f32.mrb[6].mxu1  ;;  %v4018_v40 = vld [vmem:[#allocation2 + $0x64] sm:$0xf] }
 0x1ac   : > { %v4124_v30 = vrot.slane %v4122_v51, 4  ;;  %v4132_v12 = vrot.slane %v4013_v20, 5  ;;  %v6990_v28 = vcombine.low %v9154_v17, %v9162_v21  ;;  %v9188_v25 = vsel %vm8804_vm0, %v6977_v14, %v4122_v51  ;;  %v4019_v50 = vld [vmem:[#allocation2 + $0x68] sm:$0x1]  ;;  %v4020_v10 = vld [vmem:[#allocation2 + $0x6c] sm:$0xe] }
 0x1ad   : > { %v4131_v42 = vrot.slane %v4129_v26, 4  ;;  %v6979_v41 = vrot.slane %v4014_v63, 9  ;;  %v6991_v22 = vcombine.low %v9158_v44, %v9173_v9  ;;  %v6992_v59 = vcombine.low %v9166_v3, %v9177_v36  ;;  %v9202_v54 = vpop.f32.mrb[7].mxu1  ;;  %v4021_v49 = vld [vmem:[#allocation2 + $0x70] sm:$0xf] }
 0x1ae   : > { %v3251_v16 = vld [vmem:[#allocation2 + $0xc0] sm:$0xf]  ;;  %v3252_v48 = vld [vmem:[#allocation2 + $0xc4] sm:$0xf]  ;;  %v9196_v47 = vsel %vm8804_vm0, %v4124_v30, %v4125_v55  ;;  %v9200_v1 = vsel %vm8804_vm0, %v6978_v38, %v4129_v26  ;;  %v4136_v0 = vrot.slane %v4015_v8, 5  ;;  %v4139_v55 = vrot.slane %v4016_v45, 5 }
 0x1af   : > { %v7919_v60 = vld [vmem:[#allocation2 + $0xc0] sm:$0xff]   ;;  %v3615_v56 = vshrl.u32 %v3251_v16, 16  ;;  %v3253_v6 = vld [vmem:[#allocation2 + $0xc8] sm:$0x1]  ;;  %v3618_v43 = vshll.u32 %v3251_v16, 16  ;;  %v3624_v52 = vshll.u32 %v3252_v48, 16  ;;  %v6993_v15 = vcombine.low %v9188_v25, %v9196_v47 }
 0x1b0   : > { %v3628_v57 = vshrl.u32 %v3252_v48, 16  ;;  %7602 = vmatmul.mubr.msk.bf16.gmra.mrb[76].mxu1 %vm1172_vm7, %v7919_v60  ;;  %v3634_v61 = vshll.u32 %v3253_v6, 16  ;;  %v9210_v27 = vsel %vm8804_vm0, %v4131_v42, %v4132_v12  ;;  %v4022_v34 = vld [vmem:[#allocation2 + $0x74] sm:$0x1]  ;;  %v9214_v20 = vsel %vm8804_vm0, %v6979_v41, %v4136_v0  ;;  %v4023_v63 = vld [vmem:[#allocation2 + $0x78] sm:$0xe] }
 0x1b1   : > { %v3617_v5 = vrot.slane %v3615_v56, 4  ;;  %v3620_v2 = vrot.slane %v3618_v43, 5  ;;  %v3626_v53 = vrot.slane %v3624_v52, 5  ;;  %7641 = vmatprep.mubr.msk.bf16.mxu1 %vm1172_vm7, %v6989_v13  ;;  %v4138_v51 = vrot.slane %v4136_v0, 4  ;;  %v4024_v38 = vld [vmem:[#allocation2 + $0x7c] sm:$0xf] }
 0x1b2   : > { %v3630_v24 = vrot.slane %v3628_v57, 4  ;;  %v3636_v14 = vrot.slane %v3634_v61, 5  ;;  %v6980_v8 = vrot.slane %v4017_v46, 9  ;;  %v4143_v16 = vrot.slane %v4018_v40, 5  ;;  %v4025_v48 = vld [vmem:[#allocation2 + $0x80] sm:$0x1] }
 0x1b3   : > { %v3621_v26 = vor.u32 %v3620_v2, %v3617_v5  ;;  %v9218_v13 = vsel %vm8804_vm0, %v4138_v51, %v4139_v55  ;;  %v4146_v12 = vrot.slane %v4019_v50, 5  ;;  %v6981_v42 = vrot.slane %v4020_v10, 9  ;;  %v9220_v56 = vpop.f32.mrb[4].mxu0  ;;  %v4026_v46 = vld [vmem:[#allocation2 + $0x84] sm:$0xe]  ;;  %v7920_v55 = vld [vmem:[#allocation2 + $0x18] sm:$0xff]  }
 0x1b4   : > { %v3631_v30 = vor.u32 %v3630_v24, %v3626_v53  ;;  %v4150_v60 = vrot.slane %v4021_v49, 5  ;;  %v4027_v40 = vld [vmem:[#allocation2 + $0x88] sm:$0xf]  ;;  %v4028_v52 = vld [vmem:[#allocation2 + $0x8c] sm:$0x1]  ;;  %v9226_v5 = vpop.f32.mrb[5].mxu0  ;;  %v9230_v50 = vsel %vm8804_vm0, %v6980_v8, %v4143_v16 }
 0x1b5   : > { %v3622_v41 = vrot.slane %v3621_v26, 4  ;;  %v4029_v57 = vld [vmem:[#allocation2 + $0x90] sm:$0xe]  ;;  %v4145_v10 = vrot.slane %v4143_v16, 4  ;;  %v4153_v0 = vrot.slane %v4022_v34, 5  ;;  %v9232_v2 = vpop.f32.mrb[6].mxu0 }
 0x1b6   : > { %v3632_v6 = vrot.slane %v3631_v30, 4  ;;  %v4152_v61 = vrot.slane %v4150_v60, 4  ;;  %v4030_v49 = vld [vmem:[#allocation2 + $0x94] sm:$0xf]  ;;  %v6982_v26 = vrot.slane %v4023_v63, 9  ;;  %v4157_v30 = vrot.slane %v4024_v38, 5 }
 0x1b7   : > { %v3627_v24 = vsel %vm8766_vm15, %v3622_v41, %v3626_v53  ;;  %v4031_v43 = vld [vmem:[#allocation2 + $0x98] sm:$0x1]  ;;  %v9238_v45 = vpop.f32.mrb[7].mxu0  ;;  %v9246_v34 = vsel %vm8804_vm0, %v4145_v10, %v4146_v12  ;;  %v9250_v53 = vsel %vm8804_vm0, %v6981_v42, %v4150_v60  ;;  %v4032_v63 = vld [vmem:[#allocation2 + $0x9c] sm:$0xe]  ;;  %v4164_v44 = vrot.slane %v4027_v40, 5 }
 0x1b8   : > { %v3637_v51 = vsel %vm8766_vm15, %v3632_v6, %v3636_v14  ;;  %7642 = vmatmul.mubr.msk.bf16.vlgmr.msra.gmra.mrb[80].mxu1 %vm1172_vm7, %v6990_v28  ;;  %v4160_v14 = vrot.slane %v4025_v48, 5  ;;  %v4033_v38 = vld [vmem:[#allocation2 + $0xa0] sm:$0xf]  ;;  %v6996_v17 = vcombine.low %v9230_v50, %v9246_v34  ;;  %v9261_v21 = vsel %vm8804_vm0, %v4152_v61, %v4153_v0  ;;  %v4034_v12 = vld [vmem:[#allocation2 + $0xa4] sm:$0x1] }
 0x1b9   : > { %v6956_v8 = vcombine.low %v3627_v24, %v3637_v51  ;;  %7708 = vmatpush3.bf16.msra.mxu1 %v9128_v7  ;;  %7645 = vmatprep.mubr.msk.bf16.mxu1 %vm1172_vm7, %v6991_v22  ;;  %v9265_v28 = vsel %vm8804_vm0, %v6982_v26, %v4157_v30  ;;  %v4159_v16 = vrot.slane %v4157_v30, 4  ;;  %v9267_v42 = vld [vmem:[#allocation2 + $0xa8] sm:$0xe]  ;;  %v6983_v7 = vrot.slane %v4026_v46, 9  ;;  %v9270_v60 = vld [vmem:[#allocation2 + $0xac] sm:$0xf] }
 0x1ba   : > { %v4167_v9 = vrot.slane %v4028_v52, 5  ;;  %v6984_v22 = vrot.slane %v4029_v57, 9  ;;  %v4171_v41 = vrot.slane %v4030_v49, 5  ;;  %v4174_v6 = vrot.slane %v4031_v43, 5  ;;  %v9277_v61 = vld [vmem:[#allocation2 + $0xb0] sm:$0x1] }
 0x1bb   : > { %7636 = vmatmul.mubr.msk.bf16.gmra.mrb[76].mxu0 %vm1172_vm7, %v6956_v8  ;;  %v9275_v48 = vsel %vm8804_vm0, %v4159_v16, %v4160_v14  ;;  %v6985_v10 = vrot.slane %v4032_v63, 9  ;;  %v6997_v0 = vcombine.low %v9250_v53, %v9261_v21  ;;  %v9283_v46 = vsel %vm8804_vm0, %v6983_v7, %v4164_v44  ;;  %v9285_v57 = vld [vmem:[#allocation2 + $0xb4] sm:$0xe]  ;;  %v9287_v24 = vld [vmem:[#allocation2 + $0xb8] sm:$0xf]  ;;  %v7921_v8 = vld [vmem:[#allocation2 + $0x24] sm:$0xff]  }
 0x1bc   : > { %7675 = vmatprep.mubr.msk.bf16.mxu0 %vm1172_vm7, %v7920_v55  ;;  %v4166_v40 = vrot.slane %v4164_v44, 4  ;;  %v4178_v52 = vrot.slane %v4033_v38, 5  ;;  %v9291_v49 = vsel %vm8804_vm0, %v6984_v22, %v4171_v41  ;;  %v4173_v43 = vrot.slane %v4171_v41, 4  ;;  %v9294_v26 = vld [vmem:[#allocation2 + $0xbc] sm:$0x1]  ;;  %v7497_v30 = vpop.f32.mrb[8].mxu1 }
 0x1bd   : > { %v4181_v51 = vrot.slane %v4034_v12, 5  ;;  %v6986_v55 = vrot.slane %v9267_v42, 9  ;;  %v6998_v14 = vcombine.low %v9265_v28, %v9275_v48  ;;  %v4185_v16 = vrot.slane %v9270_v60, 5  ;;  %v9303_v7 = vld [vmem:[#allocation2 + $0xc0] sm:$0xe]  ;;  %v1358_v44 = vpop.f32.mrb[9].mxu1 }
 0x1be   : > { %v9300_v63 = vsel %vm8804_vm0, %v4166_v40, %v4167_v9  ;;  %v4180_v38 = vrot.slane %v4178_v52, 4  ;;  %v7922_v12 = vld [vmem:[#allocation2 + $0x30] sm:$0xff]   ;;  %v9307_v42 = vsel %vm8804_vm0, %v4173_v43, %v4174_v6  ;;  %v9311_v22 = vsel %vm8804_vm0, %v6985_v10, %v4178_v52  ;;  %v4042_v9 = vld [vmem:[#allocation2 + $0xc4] sm:$0xf]  ;;  %v7498_v40 = vpop.f32.mrb[10].mxu1 }
 0x1bf   : > { %v4188_v41 = vrot.slane %v9277_v61, 5  ;;  %vm1389_vm1 = vcmask 523264   ;;  %v6999_v60 = vcombine.low %v9283_v46, %v9300_v63  ;;  %v7000_v6 = vcombine.low %v9291_v49, %v9307_v42  ;;  %v4043_v3 = vld [vmem:[#allocation2 + $0xc8] sm:$0x1]  ;;  %v7923_v61 = vld [vmem:[#allocation2 + $0x3c] sm:$0xff]  }
 0x1c0   : > { %7646 = vmatmul.mubr.msk.bf16.gmra.mrb[84].mxu1 %vm1172_vm7, %v6992_v59  ;;  %v9324_v10 = vsel %vm8804_vm0, %v4180_v38, %v4181_v51  ;;  %v4187_v52 = vrot.slane %v4185_v16, 4  ;;  %1408 = vst.msk [vmem:[#allocation3 + $0x90] sm:$0xff] %vm1389_vm1, %v9100_v39  ;;  %1406 = vst.msk [vmem:[#allocation3 + $0x80] sm:$0xff] %vm1389_vm1, %v9103_v32  ;;  %v4985_v39 = vld [vmem:[#allocation2 + $0x18] sm:$0xf]  ;;  %v1361_v32 = vpop.f32.mrb[11].mxu1 }
 0x1c1   : > { %1409 = vst.msk [vmem:[#allocation3 + $0x98] sm:$0xff] %vm1389_vm1, %v9109_v4  ;;  %1407 = vst.msk [vmem:[#allocation3 + $0x88] sm:$0xff] %vm1389_vm1, %v9111_v18  ;;  %7649 = vmatprep.mubr.msk.bf16.mxu1 %vm1172_vm7, %v6993_v15  ;;  %v9367_v4 = vsel %vm8804_vm0, %v6986_v55, %v4185_v16  ;;  %v6987_v18 = vrot.slane %v9285_v57, 9  ;;  %v6988_v36 = vrot.slane %v9303_v7, 9  ;;  %v4202_v47 = vrot.slane %v4043_v3, 5  ;;  %v7924_v7 = vld [vmem:[#allocation2 + $0x48] sm:$0xff]  }
 0x1c2   : > { %1392 = vst.msk [vmem:[#allocation3 + $0x10] sm:$0xff] %vm1389_vm1, %v9117_v62  ;;  %1390 = vst.msk [vmem:[#allocation3] sm:$0xff] %vm1389_vm1, %v9120_v37  ;;  %v4192_v62 = vrot.slane %v9287_v24, 5  ;;  %v4195_v37 = vrot.slane %v9294_v26, 5  ;;  %v4989_v51 = vld [vmem:[#allocation2 + $0x28] sm:$0xf] }
 0x1c3   : > { %1412 = vst.msk [vmem:[#allocation3 + $0xb0] sm:$0xff] %vm1389_vm1, %v9169_v23  ;;  %1393 = vst.msk [vmem:[#allocation3 + $0x18] sm:$0xff] %vm1389_vm1, %v9122_v11  ;;  %v4986_v11 = vld [vmem:[#allocation2 + $0x1c] sm:$0xf]  ;;  %7676 = vmatmul.mubr.msk.bf16.vlgmr.msra.gmra.mrb[80].mxu0 %vm1172_vm7, %v7921_v8  ;;  %v9378_v23 = vsel %vm8804_vm0, %v4187_v52, %v4188_v41  ;;  %v4990_v38 = vld [vmem:[#allocation2 + $0x2c] sm:$0x1]  ;;  %v10424_v52 = vcombine.low %v9200_v1, %v9210_v27 }
 0x1c4   : > { %1410 = vst.msk [vmem:[#allocation3 + $0xa0] sm:$0xff] %vm1389_vm1, %v9179_v19  ;;  %1391 = vst.msk [vmem:[#allocation3 + $0x8] sm:$0xff] %vm1389_vm1, %v9130_v31  ;;  %v7001_v31 = vcombine.low %v9311_v22, %v9324_v10  ;;  %v4199_v19 = vrot.slane %v4042_v9, 5  ;;  %7742 = vmatpush3.bf16.msra.mxu0 %v9150_v29  ;;  %7679 = vmatprep.mubr.msk.bf16.mxu0 %vm1172_vm7, %v7922_v12  ;;  %v9385_v25 = vsel %vm8804_vm0, %v6987_v18, %v4192_v62  ;;  %v5775_v16 = vld [vmem:[#allocation2 + $0x18] sm:$0xe]  ;;  %vm6572_vm2 = vcmask 519168  }
 0x1c5   : > { %1413 = vst.msk [vmem:[#allocation3 + $0xb8] sm:$0xff] %vm1389_vm1, %v9182_v35  ;;  %1411 = vst.msk [vmem:[#allocation3 + $0xa8] sm:$0xff] %vm1389_vm1, %v9202_v54  ;;  %v4987_v35 = vld [vmem:[#allocation2 + $0x20] sm:$0x1]  ;;  %v4194_v59 = vrot.slane %v4192_v62, 4  ;;  %v5034_v54 = vshrl.u32 %v4985_v39, 16  ;;  %v7002_v15 = vcombine.low %v9367_v4, %v9378_v23 }
 0x1c6   : > { %1396 = vst.msk [vmem:[#allocation3 + $0x30] sm:$0xff] %vm1389_vm1, %v9220_v56  ;;  %1394 = vst.msk [vmem:[#allocation3 + $0x20] sm:$0xff] %vm1389_vm1, %v9226_v5  ;;  %v4201_v56 = vrot.slane %v4199_v19, 4  ;;  %v5043_v5 = vshll.u32 %v4986_v11, 16  ;;  %v5047_v24 = vshrl.u32 %v4986_v11, 16  ;;  %v5053_v43 = vshll.u32 %v4987_v35, 16 }
 0x1c7   : > { %1416 = vst.msk [vmem:[#allocation3 + $0xd0] sm:$0xff] %vm1389_vm1, %v7497_v30  ;;  %1397 = vst.msk [vmem:[#allocation3 + $0x38] sm:$0xff] %vm1389_vm1, %v9232_v2  ;;  %v4988_v2 = vld [vmem:[#allocation2 + $0x24] sm:$0xf]  ;;  %v9391_v29 = vsel %vm8804_vm0, %v4194_v59, %v4195_v37  ;;  %v5036_v57 = vrot.slane %v5034_v54, 4  ;;  %v9397_v26 = vsel %vm8804_vm0, %v6988_v36, %v4199_v19  ;;  %v5071_v18 = vshrl.u32 %v4989_v51, 16 }
 0x1c8   : > { %1414 = vst.msk [vmem:[#allocation3 + $0xc0] sm:$0xff] %vm1389_vm1, %v1358_v44  ;;  %1395 = vst.msk [vmem:[#allocation3 + $0x28] sm:$0xff] %vm1389_vm1, %v9238_v45  ;;  %v5037_v45 = vshll.u32 %v4985_v39, 16  ;;  %v7003_v55 = vcombine.low %v9385_v25, %v9391_v29  ;;  %v9399_v8 = vrot.slane %v5043_v5, 5  ;;  %v9403_v44 = vsel %vm8804_vm0, %v4201_v56, %v4202_v47  ;;  %7650 = vmatmul.mubr.msk.bf16.gmra.mrb[88].mxu1 %vm1172_vm7, %v10424_v52  ;;  %v5777_v62 = vld [vmem:[#allocation2 + $0x20] sm:$0x1] }
 0x1c9   : > { %1417 = vst.msk [vmem:[#allocation3 + $0xd8] sm:$0xff] %vm1389_vm1, %v7498_v40  ;;  %1415 = vst.msk [vmem:[#allocation3 + $0xc8] sm:$0xff] %vm1389_vm1, %v1361_v32  ;;  %v5049_v12 = vrot.slane %v5047_v24, 4  ;;  %v5055_v41 = vrot.slane %v5053_v43, 5  ;;  %v5058_v9 = vshrl.u32 %v4988_v2, 16  ;;  %v5061_v39 = vshll.u32 %v4988_v2, 16 }
 0x1ca   : > { %v5039_v30 = vrot.slane %v5037_v45, 5  ;;  %v5776_v40 = vld [vmem:[#allocation2 + $0x1c] sm:$0xf]  ;;  %v5067_v32 = vshll.u32 %v4989_v51, 16  ;;  %v7481_v37 = vpop.f32.mrb[8].mxu0  ;;  %v10425_v11 = vcombine.low %v9214_v20, %v9218_v13  ;;  %v5077_v35 = vshll.u32 %v4990_v38, 16 }
 0x1cb   : > { %v5050_v36 = vor.u32 %v5049_v12, %v9399_v8  ;;  %v5060_v19 = vrot.slane %v5058_v9, 4  ;;  %v7085_v59 = vrot.slane %v5775_v16, 9  ;;  %v4991_v47 = vld [vmem:[#allocation2 + $0x30] sm:$0xf]  ;;  %1400 = vst.msk [vmem:[#allocation3 + $0x50] sm:$0xff] %vm1389_vm1, %v7481_v37  ;;  %v1294_v1 = vpop.f32.mrb[9].mxu0  ;;  %7680 = vmatmul.mubr.msk.bf16.gmra.mrb[84].mxu0 %vm1172_vm7, %v7923_v61  ;;  %v7004_v13 = vcombine.low %v9397_v26, %v9403_v44 }
 0x1cc   : > { %v5040_v3 = vor.u32 %v5039_v30, %v5036_v57  ;;  %7653 = vmatprep.mubr.msk.bf16.mxu1 %vm1172_vm7, %v10425_v11  ;;  %v5063_v54 = vrot.slane %v5061_v39, 5  ;;  %v9416_v56 = vrot.slane %v5067_v32, 5  ;;  %v5073_v45 = vrot.slane %v5071_v18, 4  ;;  %1398 = vst.msk [vmem:[#allocation3 + $0x40] sm:$0xff] %vm1389_vm1, %v1294_v1  ;;  %v7482_v20 = vpop.f32.mrb[10].mxu0  ;;  %7683 = vmatprep.mubr.msk.bf16.mxu0 %vm1172_vm7, %v7924_v7  ;;  %v7926_v11 = vld [vmem:[#allocation2 + $0x60] sm:$0xff]  }
 0x1cd   : > { %v5051_v5 = vrot.slane %v5050_v36, 4  ;;  %v5873_v2 = vrot.slane %v5776_v40, 5  ;;  %v5876_v57 = vrot.slane %v5777_v62, 5  ;;  %1401 = vst.msk [vmem:[#allocation3 + $0x58] sm:$0xff] %vm1389_vm1, %v7482_v20  ;;  %v1297_v24 = vpop.f32.mrb[11].mxu0  ;;  %v5079_v51 = vrot.slane %v5077_v35, 5 }
 0x1ce   : > { %v5041_v27 = vrot.slane %v5040_v3, 4  ;;  %v5064_v61 = vor.u32 %v5063_v54, %v5060_v19  ;;  %v5074_v43 = vor.u32 %v5073_v45, %v9416_v56  ;;  %v4992_v30 = vld [vmem:[#allocation2 + $0x34] sm:$0xf]  ;;  %v5082_v38 = vshrl.u32 %v4991_v47, 16  ;;  %1399 = vst.msk [vmem:[#allocation3 + $0x48] sm:$0xff] %vm1389_vm1, %v1297_v24  ;;  %v2123_v44 = vld [vmem:[#allocation3 + $0x20] sm:$0xff] }
 0x1cf   : > { %v5056_v7 = vsel %vm8766_vm15, %v5051_v5, %v5055_v41  ;;  %v5875_v12 = vrot.slane %v5873_v2, 4  ;;  %v4993_v9 = vld [vmem:[#allocation2 + $0x38] sm:$0x1]  ;;  %v5085_v40 = vshll.u32 %v4991_v47, 16  ;;  %v5778_v52 = vld [vmem:[#allocation2 + $0x24] sm:$0xe]  ;;  %v9432_v18 = vsel %vm8804_vm0, %v7085_v59, %v5873_v2 }
 0x1d0   : > { %v5046_v16 = vsel %vm8766_vm15, %v5041_v27, %v9399_v8  ;;  %v7925_v3 = vld [vmem:[#allocation2 + $0x54] sm:$0xff]   ;;  %v5065_v39 = vrot.slane %v5064_v61, 4  ;;  %v5075_v32 = vrot.slane %v5074_v43, 4  ;;  %v5084_v62 = vrot.slane %v5082_v38, 4  ;;  %v5779_v37 = vld [vmem:[#allocation2 + $0x28] sm:$0xf]  ;;  %7654 = vmatmul.mubr.msk.bf16.gmra.mrb[92].mxu1 %vm1172_vm7, %v6996_v17 }
 0x1d1   : > { %v9436_v8 = vsel %vm8804_vm0, %v5875_v12, %v5876_v57  ;;  %v5087_v36 = vrot.slane %v5085_v40, 5  ;;  %v5091_v41 = vshll.u32 %v4992_v30, 16  ;;  %v5095_v19 = vshrl.u32 %v4992_v30, 16  ;;  %v5780_v35 = vld [vmem:[#allocation2 + $0x2c] sm:$0x1]  ;;  %7657 = vmatprep.mubr.msk.bf16.mxu1 %vm1172_vm7, %v6997_v0  ;;  %v7501_v2 = vpop.f32.mrb[12].mxu1 }
 0x1d2   : > { %v9442_v47 = vcombine.low %v5046_v16, %v5056_v7  ;;  %v5070_v59 = vsel %vm8766_vm15, %v5065_v39, %v9416_v56  ;;  %v5080_v1 = vsel %vm8766_vm15, %v5075_v32, %v5079_v51  ;;  %v5101_v27 = vshll.u32 %v4993_v9, 16  ;;  %v4994_v54 = vld [vmem:[#allocation2 + $0x3c] sm:$0xf]  ;;  %v4995_v45 = vld [vmem:[#allocation2 + $0x40] sm:$0xf]  ;;  %1420 = vst.msk [vmem:[#allocation3 + $0xf0] sm:$0xff] %vm1389_vm1, %v7501_v2 }
 0x1d3   : > { %v7101_v50 = vcombine.low %v9432_v18, %v9436_v8  ;;  %v5088_v34 = vor.u32 %v5087_v36, %v5084_v62  ;;  %v5093_v17 = vrot.slane %v5091_v41, 5  ;;  %v5097_v20 = vrot.slane %v5095_v19, 4  ;;  %v4996_v5 = vld [vmem:[#allocation2 + $0x44] sm:$0x1]  ;;  %7684 = vmatmul.mubr.msk.bf16.gmra.mrb[88].mxu0 %vm1172_vm7, %v7925_v3  ;;  %v1374_v43 = vpop.f32.mrb[13].mxu1 }
 0x1d4   : > { %v5103_v56 = vrot.slane %v5101_v27, 5  ;;  %v7086_v57 = vrot.slane %v5778_v52, 9  ;;  %v5880_v24 = vrot.slane %v5779_v37, 5  ;;  %v5883_v61 = vrot.slane %v5780_v35, 5  ;;  %7687 = vmatprep.mubr.msk.bf16.mxu0 %vm1172_vm7, %v7926_v11  ;;  %1418 = vst.msk [vmem:[#allocation3 + $0xe0] sm:$0xff] %vm1389_vm1, %v1374_v43  ;;  %v7502_v30 = vpop.f32.mrb[14].mxu1 }
 0x1d5   : > { %v5089_v53 = vrot.slane %v5088_v34, 4  ;;  %v5098_v21 = vor.u32 %v5097_v20, %v5093_v17  ;;  %v5106_v0 = vshrl.u32 %v4994_v54, 16  ;;  %v5109_v51 = vshll.u32 %v4994_v54, 16  ;;  %v5781_v38 = vld [vmem:[#allocation2 + $0x30] sm:$0xe]  ;;  %1421 = vst.msk [vmem:[#allocation3 + $0xf8] sm:$0xff] %vm1389_vm1, %v7502_v30 }
 0x1d6   : > { %v9461_v16 = vsel %vm8804_vm0, %v7086_v57, %v5880_v24  ;;  %v5882_v7 = vrot.slane %v5880_v24, 4  ;;  %v5115_v12 = vshll.u32 %v4995_v45, 16  ;;  %v5119_v9 = vshrl.u32 %v4995_v45, 16  ;;  %v1377_v40 = vpop.f32.mrb[15].mxu1  ;;  %v5782_v52 = vld [vmem:[#allocation2 + $0x34] sm:$0xf] }
 0x1d7   : > { %v9464_v3 = vcombine.low %v5070_v59, %v5080_v1  ;;  %v5099_v39 = vrot.slane %v5098_v21, 4  ;;  %v5108_v32 = vrot.slane %v5106_v0, 4  ;;  %v5111_v62 = vrot.slane %v5109_v51, 5  ;;  %1419 = vst.msk [vmem:[#allocation3 + $0xe8] sm:$0xff] %vm1389_vm1, %v1377_v40  ;;  %v5783_v37 = vld [vmem:[#allocation2 + $0x38] sm:$0x1] }
 0x1d8   : > { %v7927_v11 = vld [vmem:[#allocation2 + $0x6c] sm:$0xff]   ;;  %v9469_v36 = vsel %vm8804_vm0, %v5882_v7, %v5883_v61  ;;  %v5117_v41 = vrot.slane %v5115_v12, 5  ;;  %v5121_v19 = vrot.slane %v5119_v9, 4  ;;  %v5125_v35 = vshll.u32 %v4996_v5, 16  ;;  %v4997_v27 = vld [vmem:[#allocation2 + $0x48] sm:$0xf]  ;;  %7658 = vmatmul.mubr.msk.bf16.gmra.mrb[96].mxu1 %vm1172_vm7, %v6998_v14 }
 0x1d9   : > { %v7928_v54 = vld [vmem:[#allocation2 + $0x78] sm:$0xff]   ;;  %v5094_v59 = vsel %vm8766_vm15, %v5089_v53, %v5093_v17  ;;  %v5104_v1 = vsel %vm8766_vm15, %v5099_v39, %v5103_v56  ;;  %v7102_v45 = vcombine.low %v9461_v16, %v9469_v36  ;;  %v5112_v34 = vor.u32 %v5111_v62, %v5108_v32  ;;  %v4998_v20 = vld [vmem:[#allocation2 + $0x4c] sm:$0xf]  ;;  %v4999_v61 = vld [vmem:[#allocation2 + $0x50] sm:$0x1]  ;;  %7661 = vmatprep.mubr.msk.bf16.mxu1 %vm1172_vm7, %v6999_v60 }
 0x1da   : > { %v5122_v2 = vor.u32 %v5121_v19, %v5117_v41  ;;  %v5127_v5 = vrot.slane %v5125_v35, 5  ;;  %v7087_v57 = vrot.slane %v5781_v38, 9  ;;  %v5887_v24 = vrot.slane %v5782_v52, 5  ;;  %v5784_v21 = vld [vmem:[#allocation2 + $0x3c] sm:$0xe]  ;;  %v7929_v7 = vld [vmem:[#allocation2 + $0x84] sm:$0xff]  }
 0x1db   : > { %v5113_v17 = vrot.slane %v5112_v34, 4  ;;  %v5890_v56 = vrot.slane %v5783_v37, 5  ;;  %v5130_v43 = vshrl.u32 %v4997_v27, 16  ;;  %v5133_v53 = vshll.u32 %v4997_v27, 16  ;;  %7688 = vmatmul.mubr.msk.bf16.gmra.mrb[92].mxu0 %vm1172_vm7, %v7927_v11  ;;  %v5785_v51 = vld [vmem:[#allocation2 + $0x40] sm:$0xf] }
 0x1dc   : > { %v9486_v28 = vcombine.low %v5094_v59, %v5104_v1  ;;  %v5123_v48 = vrot.slane %v5122_v2, 4  ;;  %v5889_v14 = vrot.slane %v5887_v24, 4  ;;  %v5139_v0 = vshll.u32 %v4998_v20, 16  ;;  %7691 = vmatprep.mubr.msk.bf16.mxu0 %vm1172_vm7, %v7928_v54  ;;  %v5786_v38 = vld [vmem:[#allocation2 + $0x44] sm:$0x1]  ;;  %v7930_v2 = vld [vmem:[#allocation2 + $0x90] sm:$0xff]  }
 0x1dd   : > { %v5118_v46 = vsel %vm8766_vm15, %v5113_v17, %v5117_v41  ;;  %v5132_v63 = vrot.slane %v5130_v43, 4  ;;  %v5135_v60 = vrot.slane %v5133_v53, 5  ;;  %v5143_v30 = vshrl.u32 %v4998_v20, 16  ;;  %v5000_v39 = vld [vmem:[#allocation2 + $0x54] sm:$0xf]  ;;  %v7507_v35 = vpop.f32.mrb[16].mxu1 }
 0x1de   : > { %v5128_v12 = vsel %vm8766_vm15, %v5123_v48, %v5127_v5  ;;  %v9495_v9 = vsel %vm8804_vm0, %v7087_v57, %v5887_v24  ;;  %v9497_v40 = vrot.slane %v5139_v0, 5  ;;  %v5149_v52 = vshll.u32 %v4999_v61, 16  ;;  %v5001_v41 = vld [vmem:[#allocation2 + $0x58] sm:$0xf]  ;;  %v5002_v19 = vld [vmem:[#allocation2 + $0x5c] sm:$0x1] }
 0x1df   : > { %v9499_v32 = vcombine.low %v5118_v46, %v5128_v12  ;;  %v9503_v62 = vsel %vm8804_vm0, %v5889_v14, %v5890_v56  ;;  %v5136_v37 = vor.u32 %v5135_v60, %v5132_v63  ;;  %v5145_v11 = vrot.slane %v5143_v30, 4  ;;  %v7485_v34 = vpop.f32.mrb[12].mxu0  ;;  %v1992_v20 = vpop.f32.mrb[17].mxu1  ;;  %v5787_v63 = vld [vmem:[#allocation2 + $0x48] sm:$0xe] }
 0x1e0   : > { %v9505_v27 = vrot.slane %v5149_v52, 5  ;;  %v7088_v54 = vrot.slane %v5784_v21, 9  ;;  %v5894_v59 = vrot.slane %v5785_v51, 5  ;;  %v5897_v1 = vrot.slane %v5786_v38, 5  ;;  %1404 = vst.msk [vmem:[#allocation3 + $0x70] sm:$0xff] %vm1389_vm1, %v7485_v34  ;;  %v1310_v17 = vpop.f32.mrb[13].mxu0  ;;  %7662 = vmatmul.mubr.msk.bf16.gmra.mrb[100].mxu1 %vm1172_vm7, %v7000_v6 }
 0x1e1   : > { %v9507_v5 = vrot.slane %v5136_v37, 4  ;;  %v5146_v57 = vor.u32 %v5145_v11, %v9497_v40  ;;  %v5154_v24 = vshrl.u32 %v5000_v39, 16  ;;  %v5157_v61 = vshll.u32 %v5000_v39, 16  ;;  %v7508_v56 = vpop.f32.mrb[18].mxu1  ;;  %1402 = vst.msk [vmem:[#allocation3 + $0x60] sm:$0xff] %vm1389_vm1, %v1310_v17  ;;  %v7486_v14 = vpop.f32.mrb[14].mxu0  ;;  %7665 = vmatprep.mubr.msk.bf16.mxu1 %vm1172_vm7, %v7001_v31 }
 0x1e2   : > { %v7103_v43 = vcombine.low %v9495_v9, %v9503_v62  ;;  %v5896_v53 = vrot.slane %v5894_v59, 4  ;;  %v5163_v21 = vshll.u32 %v5001_v41, 16  ;;  %v5167_v48 = vshrl.u32 %v5001_v41, 16  ;;  %v1995_v0 = vpop.f32.mrb[19].mxu1  ;;  %1405 = vst.msk [vmem:[#allocation3 + $0x78] sm:$0xff] %vm1389_vm1, %v7486_v14  ;;  %v1313_v46 = vpop.f32.mrb[15].mxu0 }
 0x1e3   : > { %v5147_v51 = vrot.slane %v5146_v57, 4  ;;  %v9524_v49 = vsel %vm8804_vm0, %v7088_v54, %v5894_v59  ;;  %v5156_v42 = vrot.slane %v5154_v24, 4  ;;  %v5159_v6 = vrot.slane %v5157_v61, 5  ;;  %7692 = vmatmul.mubr.msk.bf16.gmra.mrb[96].mxu0 %vm1172_vm7, %v7929_v7  ;;  %v2121_v30 = vld [vmem:[#allocation3 + $0x10] sm:$0xff]  ;;  %1403 = vst.msk [vmem:[#allocation3 + $0x68] sm:$0xff] %vm1389_vm1, %v1313_v46  ;;  %v2119_v37 = vld [vmem:[#allocation3] sm:$0xff] }
 0x1e4   : > { %v9530_v60 = vsel %vm8804_vm0, %v5896_v53, %v5897_v1  ;;  %v5165_v22 = vrot.slane %v5163_v21, 5  ;;  %v5169_v10 = vrot.slane %v5167_v48, 4  ;;  %v5173_v31 = vshll.u32 %v5002_v19, 16  ;;  %v5788_v38 = vld [vmem:[#allocation2 + $0x4c] sm:$0xf]  ;;  %7695 = vmatprep.mubr.msk.bf16.mxu0 %vm1172_vm7, %v7930_v2  ;;  %v7931_v19 = vld [vmem:[#allocation2 + $0x9c] sm:$0xff]  }
 0x1e5   : > { %v5142_v12 = vsel %vm8766_vm15, %v9507_v5, %v9497_v40  ;;  %v5152_v7 = vsel %vm8766_vm15, %v5147_v51, %v9505_v27  ;;  %v5160_v52 = vor.u32 %v5159_v6, %v5156_v42  ;;  %v2153_v39 = vadd.f32 %v7507_v35, %v2121_v30  ;;  %v5789_v11 = vld [vmem:[#allocation2 + $0x50] sm:$0x1]  ;;  %v5003_v41 = vld [vmem:[#allocation2 + $0x60] sm:$0xf]  ;;  %v5004_v24 = vld [vmem:[#allocation2 + $0x64] sm:$0xf] }
 0x1e6   : > { %v5170_v59 = vor.u32 %v5169_v10, %v5165_v22  ;;  %v5175_v1 = vrot.slane %v5173_v31, 5  ;;  %v2151_v34 = vadd.f32 %v2119_v37, %v1992_v20  ;;  %v2122_v2 = vld [vmem:[#allocation3 + $0x18] sm:$0xff]  ;;  %v2120_v57 = vld [vmem:[#allocation3 + $0x8] sm:$0xff]  ;;  %v7089_v61 = vrot.slane %v5787_v63, 9  ;;  %v5005_v35 = vld [vmem:[#allocation2 + $0x68] sm:$0x1] }
 0x1e7   : > { %v5161_v40 = vrot.slane %v5160_v52, 4  ;;  %2185 = vst.msk [vmem:[#allocation3 + $0x10] sm:$0xff] %vm1389_vm1, %v2153_v39  ;;  %v2154_v5 = vadd.f32 %v7508_v56, %v2122_v2  ;;  %v2152_v27 = vadd.f32 %v2120_v57, %v1995_v0  ;;  %v5790_v17 = vld [vmem:[#allocation2 + $0x54] sm:$0xe]  ;;  %v5791_v53 = vld [vmem:[#allocation2 + $0x58] sm:$0xf]  ;;  %v9557_v31 = vcombine.low %v5142_v12, %v5152_v7 }
 0x1e8   : > { %v7932_v21 = vld [vmem:[#allocation2 + $0xa8] sm:$0xff]   ;;  %v5171_v48 = vrot.slane %v5170_v59, 4  ;;  %2183 = vst.msk [vmem:[#allocation3] sm:$0xff] %vm1389_vm1, %v2151_v34  ;;  %v5901_v14 = vrot.slane %v5788_v38, 5  ;;  %v5904_v51 = vrot.slane %v5789_v11, 5  ;;  %v5178_v42 = vshrl.u32 %v5003_v41, 16  ;;  %7666 = vmatmul.mubr.msk.bf16.gmra.mrb[104].mxu1 %vm1172_vm7, %v7002_v15 }
 0x1e9   : > { %v9545_v20 = vpop.f32.mrb[16].mxu0  ;;  %v5166_v6 = vsel %vm8766_vm15, %v5161_v40, %v5165_v22  ;;  %2186 = vst.msk [vmem:[#allocation3 + $0x18] sm:$0xff] %vm1389_vm1, %v2154_v5  ;;  %2184 = vst.msk [vmem:[#allocation3 + $0x8] sm:$0xff] %vm1389_vm1, %v2152_v27  ;;  %v5181_v56 = vshll.u32 %v5003_v41, 16  ;;  %v5187_v0 = vshll.u32 %v5004_v24, 16  ;;  %v5191_v46 = vshrl.u32 %v5004_v24, 16  ;;  %7669 = vmatprep.mubr.msk.bf16.mxu1 %vm1172_vm7, %v7003_v55 }
 0x1ea   : > { %v5792_v63 = vld [vmem:[#allocation2 + $0x5c] sm:$0x1]  ;;  %v9551_v10 = vpop.f32.mrb[17].mxu0  ;;  %v5176_v22 = vsel %vm8766_vm15, %v5171_v48, %v5175_v1  ;;  %v5903_v30 = vrot.slane %v5901_v14, 4  ;;  %v5180_v38 = vrot.slane %v5178_v42, 4  ;;  %v7511_v39 = vpop.f32.mrb[20].mxu1  ;;  %v9569_v4 = vsel %vm8804_vm0, %v7089_v61, %v5901_v14 }
 0x1eb   : > { %v5006_v52 = vld [vmem:[#allocation2 + $0x6c] sm:$0xf]  ;;  %v9561_v37 = vpop.f32.mrb[18].mxu0  ;;  %v5183_v23 = vrot.slane %v5181_v56, 5  ;;  %v9571_v15 = vrot.slane %v5187_v0, 5  ;;  %v5193_v12 = vrot.slane %v5191_v46, 4  ;;  %7696 = vmatmul.mubr.msk.bf16.gmra.mrb[100].mxu0 %vm1172_vm7, %v7931_v19  ;;  %v9576_v41 = vcombine.low %v5166_v6, %v5176_v22 }
 0x1ec   : > { %v2008_v7 = vpop.f32.mrb[21].mxu1  ;;  %v9573_v11 = vpop.f32.mrb[19].mxu0  ;;  %v5197_v59 = vshll.u32 %v5005_v35, 16  ;;  %v7090_v1 = vrot.slane %v5790_v17, 9  ;;  %v5908_v25 = vrot.slane %v5791_v53, 5  ;;  %7699 = vmatprep.mubr.msk.bf16.mxu0 %vm1172_vm7, %v7932_v21  ;;  %v9581_v34 = vsel %vm8804_vm0, %v5903_v30, %v5904_v51  ;;  %v7933_v17 = vld [vmem:[#allocation2 + $0xb4] sm:$0xff]  }
 0x1ed   : > { %v5007_v29 = vld [vmem:[#allocation2 + $0x70] sm:$0xf]  ;;  %v7512_v55 = vpop.f32.mrb[22].mxu1  ;;  %v5184_v2 = vor.u32 %v5183_v23, %v5180_v38  ;;  %v5194_v57 = vor.u32 %v5193_v12, %v9571_v15  ;;  %v5911_v24 = vrot.slane %v5792_v63, 5  ;;  %v5008_v40 = vld [vmem:[#allocation2 + $0x74] sm:$0x1] }
 0x1ee   : > { %v2011_v5 = vpop.f32.mrb[23].mxu1  ;;  %v9584_v19 = vrot.slane %v5197_v59, 5  ;;  %v9588_v27 = vsel %vm8804_vm0, %v7090_v1, %v5908_v25  ;;  %v5910_v61 = vrot.slane %v5908_v25, 4  ;;  %v5202_v35 = vshrl.u32 %v5006_v52, 16  ;;  %v2690_v0 = vld [vmem:[#allocation3 + $0x10] sm:$0xff]  ;;  %v7934_v30 = vld [vmem:[#allocation2 + $0xc0] sm:$0xff]  }
 0x1ef   : > { %v9590_v53 = vrot.slane %v5184_v2, 4  ;;  %v9592_v21 = vrot.slane %v5194_v57, 4  ;;  %v5205_v48 = vshll.u32 %v5006_v52, 16  ;;  %v5211_v14 = vshll.u32 %v5007_v29, 16  ;;  %v2688_v46 = vld [vmem:[#allocation3] sm:$0xff]  ;;  %v9600_v22 = vpop.f32.mrb[20].mxu0 }
 0x1f0   : > { %v9596_v51 = vsel %vm8804_vm0, %v5910_v61, %v5911_v24  ;;  %v5204_v42 = vrot.slane %v5202_v35, 4  ;;  %v5215_v6 = vshrl.u32 %v5007_v29, 16  ;;  %v5221_v56 = vshll.u32 %v5008_v40, 16  ;;  %v9598_v63 = vld [vmem:[#allocation2 + $0x60] sm:$0xe]  ;;  %v2691_v59 = vld [vmem:[#allocation3 + $0x18] sm:$0xff]  ;;  %7670 = vmatmul.mubr.msk.bf16.gmra.mrb[108].mxu1 %vm1172_vm7, %v7004_v13 }
 0x1f1   : > { %v5190_v52 = vsel %vm8766_vm15, %v9590_v53, %v9571_v15  ;;  %v5200_v23 = vsel %vm8766_vm15, %v9592_v21, %v9584_v19  ;;  %v5207_v12 = vrot.slane %v5205_v48, 5  ;;  %v5794_v1 = vld [vmem:[#allocation2 + $0x64] sm:$0xf]  ;;  %v9612_v25 = vld [vmem:[#allocation2 + $0x68] sm:$0x1]  ;;  %v9614_v29 = vpop.f32.mrb[21].mxu0  ;;  %7709 = vmatprep.mubr.msk.bf16.mxu1 %vm1172_vm7, %v9442_v47  ;;  %v2722_v53 = vadd.f32 %v9545_v20, %v2690_v0 }
 0x1f2   : > { %v5213_v2 = vrot.slane %v5211_v14, 5  ;;  %v5217_v57 = vrot.slane %v5215_v6, 4  ;;  %v5223_v24 = vrot.slane %v5221_v56, 5  ;;  %v2125_v40 = vld [vmem:[#allocation3 + $0x30] sm:$0xff]  ;;  %v2689_v19 = vld [vmem:[#allocation3 + $0x8] sm:$0xff]  ;;  %v9622_v61 = vpop.f32.mrb[22].mxu0  ;;  %v2720_v26 = vadd.f32 %v2688_v46, %v9551_v10 }
 0x1f3   : > { %v5208_v35 = vor.u32 %v5207_v12, %v5204_v42  ;;  %v2157_v21 = vadd.f32 %v7511_v39, %v2125_v40  ;;  %v2126_v13 = vld [vmem:[#allocation3 + $0x38] sm:$0xff]  ;;  %v5009_v48 = vld [vmem:[#allocation2 + $0x78] sm:$0xf]  ;;  %v9628_v15 = vpop.f32.mrb[23].mxu0  ;;  %7700 = vmatmul.mubr.msk.bf16.gmra.mrb[104].mxu0 %vm1172_vm7, %v7933_v17  ;;  %v2155_v6 = vadd.f32 %v2123_v44, %v2008_v7  ;;  %v2723_v56 = vadd.f32 %v9561_v37, %v2691_v59  ;;  %v2124_v54 = vld [vmem:[#allocation3 + $0x28] sm:$0xff] }
 0x1f4   : > { %v5218_v14 = vor.u32 %v5217_v57, %v5213_v2  ;;  %v2158_v38 = vadd.f32 %v7512_v55, %v2126_v13  ;;  %v5010_v47 = vld [vmem:[#allocation2 + $0x7c] sm:$0xf]  ;;  %7703 = vmatprep.mubr.msk.bf16.mxu0 %vm1172_vm7, %v7934_v30  ;;  %2754 = vst.msk [vmem:[#allocation3 + $0x10] sm:$0xff] %vm1389_vm1, %v2722_v53  ;;  %2752 = vst.msk [vmem:[#allocation3] sm:$0xff] %vm1389_vm1, %v2720_v26  ;;  %v2721_v10 = vadd.f32 %v2689_v19, %v9573_v11  ;;  %v5011_v7 = vld [vmem:[#allocation2 + $0x80] sm:$0x1] }
 0x1f5   : > { %v5209_v20 = vrot.slane %v5208_v35, 4  ;;  %2189 = vst.msk [vmem:[#allocation3 + $0x30] sm:$0xff] %vm1389_vm1, %v2157_v21  ;;  %v2156_v39 = vadd.f32 %v2124_v54, %v2011_v5  ;;  %v7091_v17 = vrot.slane %v9598_v63, 9  ;;  %2187 = vst.msk [vmem:[#allocation3 + $0x20] sm:$0xff] %vm1389_vm1, %v2155_v6  ;;  %v5915_v37 = vrot.slane %v5794_v1, 5  ;;  %v7935_v12 = vld [vmem:[#allocation2 + $0xcc] sm:$0xff]  }
 0x1f6   : > { %v5219_v42 = vrot.slane %v5218_v14, 4  ;;  %2755 = vst.msk [vmem:[#allocation3 + $0x18] sm:$0xff] %vm1389_vm1, %v2723_v56  ;;  %2190 = vst.msk [vmem:[#allocation3 + $0x38] sm:$0xff] %vm1389_vm1, %v2158_v38  ;;  %v5918_v55 = vrot.slane %v9612_v25, 5  ;;  %v5226_v0 = vshrl.u32 %v5009_v48, 16  ;;  %v5229_v54 = vshll.u32 %v5009_v48, 16 }
 0x1f7   : > { %v5796_v46 = vld [vmem:[#allocation2 + $0x6c] sm:$0xe]  ;;  %v5214_v30 = vsel %vm8766_vm15, %v5209_v20, %v5213_v2  ;;  %2753 = vst.msk [vmem:[#allocation3 + $0x8] sm:$0xff] %vm1389_vm1, %v2721_v10  ;;  %2188 = vst.msk [vmem:[#allocation3 + $0x28] sm:$0xff] %vm1389_vm1, %v2156_v39  ;;  %v5235_v11 = vshll.u32 %v5010_v47, 16  ;;  %v5239_v5 = vshrl.u32 %v5010_v47, 16  ;;  %v9646_v59 = vcombine.low %v5190_v52, %v5200_v23 }
 0x1f8   : > { %v5797_v63 = vld [vmem:[#allocation2 + $0x70] sm:$0xf]  ;;  %v5224_v38 = vsel %vm8766_vm15, %v5219_v42, %v5223_v24  ;;  %v5917_v1 = vrot.slane %v5915_v37, 4  ;;  %v5228_v25 = vrot.slane %v5226_v0, 4  ;;  %v5798_v57 = vld [vmem:[#allocation2 + $0x74] sm:$0x1]  ;;  %v9652_v2 = vsel %vm8804_vm0, %v7091_v17, %v5915_v37  ;;  %7710 = vmatmul.mubr.msk.bf16.vlgmr.msra.gmra.mrb[112].mxu1 %vm1172_vm7, %v9464_v3 }
 0x1f9   : > { %v5231_v40 = vrot.slane %v5229_v54, 5  ;;  %v9654_v19 = vrot.slane %v5235_v11, 5  ;;  %v5241_v35 = vrot.slane %v5239_v5, 4  ;;  %v5012_v53 = vld [vmem:[#allocation2 + $0x84] sm:$0xf]  ;;  %v9658_v52 = vcombine.low %v5214_v30, %v5224_v38  ;;  %v7515_v44 = vpop.f32.mrb[24].mxu1  ;;  %7713 = vmatprep.mubr.msk.bf16.mxu1 %vm1172_vm7, %v9486_v28 }
 0x1fa   : > { %v5245_v23 = vshll.u32 %v5011_v7, 16  ;;  %v7092_v21 = vrot.slane %v5796_v46, 9  ;;  %v5922_v24 = vrot.slane %v5797_v63, 5  ;;  %v5013_v26 = vld [vmem:[#allocation2 + $0x88] sm:$0xf]  ;;  %v9664_v13 = vsel %vm8804_vm0, %v5917_v1, %v5918_v55  ;;  %v2024_v3 = vpop.f32.mrb[25].mxu1 }
 0x1fb   : > { %v5232_v48 = vor.u32 %v5231_v40, %v5228_v25  ;;  %v5242_v14 = vor.u32 %v5241_v35, %v9654_v19  ;;  %v5925_v6 = vrot.slane %v5798_v57, 5  ;;  %v5014_v56 = vld [vmem:[#allocation2 + $0x8c] sm:$0x1]  ;;  %v9667_v47 = vpop.f32.mrb[24].mxu0  ;;  %7704 = vmatmul.mubr.msk.bf16.gmra.mrb[108].mxu0 %vm1172_vm7, %v7935_v12  ;;  %v5250_v39 = vshrl.u32 %v5012_v53, 16  ;;  %v7516_v17 = vpop.f32.mrb[26].mxu1 }
 0x1fc   : > { %v9670_v20 = vrot.slane %v5245_v23, 5  ;;  %v9674_v10 = vsel %vm8804_vm0, %v7092_v21, %v5922_v24  ;;  %v5924_v28 = vrot.slane %v5922_v24, 4  ;;  %v9676_v7 = vpop.f32.mrb[25].mxu0  ;;  %7743 = vmatprep.mubr.msk.bf16.mxu0 %vm1172_vm7, %v7101_v50  ;;  %v5253_v55 = vshll.u32 %v5012_v53, 16  ;;  %v2694_v46 = vld [vmem:[#allocation3 + $0x30] sm:$0xff]  ;;  %v2692_v63 = vld [vmem:[#allocation3 + $0x20] sm:$0xff] }
 0x1fd   : > { %v9682_v42 = vrot.slane %v5232_v48, 4  ;;  %v9684_v37 = vrot.slane %v5242_v14, 4  ;;  %v5259_v0 = vshll.u32 %v5013_v26, 16  ;;  %v5252_v54 = vrot.slane %v5250_v39, 4  ;;  %v2027_v12 = vpop.f32.mrb[27].mxu1  ;;  %v9692_v18 = vpop.f32.mrb[26].mxu0 }
 0x1fe   : > { %v9688_v30 = vsel %vm8804_vm0, %v5924_v28, %v5925_v6  ;;  %v5263_v11 = vshrl.u32 %v5013_v26, 16  ;;  %v5269_v5 = vshll.u32 %v5014_v56, 16  ;;  %v9690_v38 = vld [vmem:[#allocation2 + $0x78] sm:$0xe]  ;;  %v7107_v8 = vcombine.low %v9652_v2, %v9664_v13  ;;  %v2695_v57 = vld [vmem:[#allocation3 + $0x38] sm:$0xff]  ;;  %v9706_v53 = vpop.f32.mrb[27].mxu0 }
 0x1ff   : > { %v5238_v50 = vsel %vm8766_vm15, %v9682_v42, %v9654_v19  ;;  %v5248_v1 = vsel %vm8766_vm15, %v9684_v37, %v9670_v20  ;;  %v5255_v25 = vrot.slane %v5253_v55, 5  ;;  %v5800_v40 = vld [vmem:[#allocation2 + $0x7c] sm:$0xf]  ;;  %v9704_v35 = vld [vmem:[#allocation2 + $0x80] sm:$0x1]  ;;  %v5261_v21 = vrot.slane %v5259_v0, 5 }
 0x200   : > { %v5265_v24 = vrot.slane %v5263_v11, 4  ;;  %v5271_v26 = vrot.slane %v5269_v5, 5  ;;  %v2129_v48 = vld [vmem:[#allocation3 + $0x50] sm:$0xff]  ;;  %v2693_v19 = vld [vmem:[#allocation3 + $0x28] sm:$0xff]  ;;  %v2726_v6 = vadd.f32 %v9600_v22, %v2694_v46  ;;  %v2724_v20 = vadd.f32 %v2692_v63, %v9614_v29  ;;  %v2127_v28 = vld [vmem:[#allocation3 + $0x40] sm:$0xff]  ;;  %7714 = vmatmul.mubr.msk.bf16.gmra.mrb[116].mxu1 %vm1172_vm7, %v9499_v32 }
 0x201   : > { %v5256_v14 = vor.u32 %v5255_v25, %v5252_v54  ;;  %v2161_v56 = vadd.f32 %v7515_v44, %v2129_v48  ;;  %v2130_v39 = vld [vmem:[#allocation3 + $0x58] sm:$0xff]  ;;  %v2159_v55 = vadd.f32 %v2127_v28, %v2024_v3  ;;  %v2727_v0 = vadd.f32 %v9622_v61, %v2695_v57  ;;  %v2128_v5 = vld [vmem:[#allocation3 + $0x48] sm:$0xff]  ;;  %7717 = vmatprep.mubr.msk.bf16.mxu1 %vm1172_vm7, %v9557_v31  ;;  %v5017_v3 = vld [vmem:[#allocation2 + $0x98] sm:$0x1] }
 0x202   : > { %v5015_v42 = vld [vmem:[#allocation2 + $0x90] sm:$0xf]  ;;  %v5266_v37 = vor.u32 %v5265_v24, %v5261_v21  ;;  %v2162_v11 = vadd.f32 %v7516_v17, %v2130_v39  ;;  %v5016_v23 = vld [vmem:[#allocation2 + $0x94] sm:$0xf]  ;;  %2758 = vst.msk [vmem:[#allocation3 + $0x30] sm:$0xff] %vm1389_vm1, %v2726_v6  ;;  %2756 = vst.msk [vmem:[#allocation3 + $0x20] sm:$0xff] %vm1389_vm1, %v2724_v20  ;;  %v2725_v29 = vadd.f32 %v2693_v19, %v9628_v15 }
 0x203   : > { %v5257_v22 = vrot.slane %v5256_v14, 4  ;;  %2193 = vst.msk [vmem:[#allocation3 + $0x50] sm:$0xff] %vm1389_vm1, %v2161_v56  ;;  %v2160_v32 = vadd.f32 %v2128_v5, %v2027_v12  ;;  %v7093_v44 = vrot.slane %v9690_v38, 9  ;;  %v5802_v61 = vld [vmem:[#allocation2 + $0x84] sm:$0xe]  ;;  %7744 = vmatmul.mubr.msk.bf16.vlgmr.msra.gmra.mrb[112].mxu0 %vm1172_vm7, %v7102_v45  ;;  %2191 = vst.msk [vmem:[#allocation3 + $0x40] sm:$0xff] %vm1389_vm1, %v2159_v55  ;;  %v9738_v25 = vcombine.low %v5238_v50, %v5248_v1 }
 0x204   : > { %v5267_v31 = vrot.slane %v5266_v37, 4  ;;  %2759 = vst.msk [vmem:[#allocation3 + $0x38] sm:$0xff] %vm1389_vm1, %v2727_v0  ;;  %2194 = vst.msk [vmem:[#allocation3 + $0x58] sm:$0xff] %vm1389_vm1, %v2162_v11  ;;  %v5929_v17 = vrot.slane %v5800_v40, 5  ;;  %v5932_v15 = vrot.slane %v9704_v35, 5  ;;  %v5274_v46 = vshrl.u32 %v5015_v42, 16  ;;  %7747 = vmatprep.mubr.msk.bf16.mxu0 %vm1172_vm7, %v7103_v43 }
 0x205   : > { %v5803_v54 = vld [vmem:[#allocation2 + $0x88] sm:$0xf]  ;;  %v5262_v16 = vsel %vm8766_vm15, %v5257_v22, %v5261_v21  ;;  %2757 = vst.msk [vmem:[#allocation3 + $0x28] sm:$0xff] %vm1389_vm1, %v2725_v29  ;;  %2192 = vst.msk [vmem:[#allocation3 + $0x48] sm:$0xff] %vm1389_vm1, %v2160_v32  ;;  %v5277_v36 = vshll.u32 %v5015_v42, 16  ;;  %v5283_v45 = vshll.u32 %v5016_v23, 16 }
 0x206   : > { %v5287_v63 = vshrl.u32 %v5016_v23, 16  ;;  %v5804_v12 = vld [vmem:[#allocation2 + $0x8c] sm:$0x1]  ;;  %v7519_v38 = vpop.f32.mrb[28].mxu1  ;;  %v5272_v57 = vsel %vm8766_vm15, %v5267_v31, %v5271_v26  ;;  %v5931_v9 = vrot.slane %v5929_v17, 4  ;;  %v5276_v62 = vrot.slane %v5274_v46, 4 }
 0x207   : > { %v5018_v43 = vld [vmem:[#allocation2 + $0x9c] sm:$0xf]  ;;  %v2040_v40 = vpop.f32.mrb[29].mxu1  ;;  %v9744_v35 = vsel %vm8804_vm0, %v7093_v44, %v5929_v17  ;;  %v5279_v21 = vrot.slane %v5277_v36, 5  ;;  %v9746_v24 = vrot.slane %v5283_v45, 5  ;;  %v9748_v14 = vcombine.low %v5262_v16, %v5272_v57  ;;  %v9750_v56 = vpop.f32.mrb[28].mxu0 }
 0x208   : > { %v5289_v48 = vrot.slane %v5287_v63, 4  ;;  %v5019_v23 = vld [vmem:[#allocation2 + $0xa0] sm:$0xf]  ;;  %v7520_v19 = vpop.f32.mrb[30].mxu1  ;;  %v5293_v50 = vshll.u32 %v5017_v3, 16  ;;  %v7094_v1 = vrot.slane %v5802_v61, 9  ;;  %v9754_v20 = vsel %vm8804_vm0, %v5931_v9, %v5932_v15  ;;  %7718 = vmatmul.mubr.msk.bf16.gmra.mrb[120].mxu1 %vm1172_vm7, %v9576_v41 }
 0x209   : > { %v5936_v6 = vrot.slane %v5803_v54, 5  ;;  %v2043_v26 = vpop.f32.mrb[31].mxu1  ;;  %v5280_v28 = vor.u32 %v5279_v21, %v5276_v62  ;;  %v5939_v42 = vrot.slane %v5804_v12, 5  ;;  %v5020_v37 = vld [vmem:[#allocation2 + $0xa4] sm:$0x1]  ;;  %v9757_v55 = vpop.f32.mrb[29].mxu0  ;;  %7721 = vmatprep.mubr.msk.bf16.mxu1 %vm1172_vm7, %v9646_v59  ;;  %v10426_v41 = vcombine.low %v9524_v49, %v9530_v60 }
 0x20a   : > { %v5290_v39 = vor.u32 %v5289_v48, %v9746_v24  ;;  %v9761_v0 = vrot.slane %v5293_v50, 5  ;;  %v5298_v22 = vshrl.u32 %v5018_v43, 16  ;;  %v9767_v29 = vpop.f32.mrb[30].mxu0  ;;  %v5301_v3 = vshll.u32 %v5018_v43, 16  ;;  %v2698_v54 = vld [vmem:[#allocation3 + $0x50] sm:$0xff]  ;;  %v2696_v16 = vld [vmem:[#allocation3 + $0x40] sm:$0xff] }
 0x20b   : > { %v9765_v11 = vsel %vm8804_vm0, %v7094_v1, %v5936_v6  ;;  %v5938_v5 = vrot.slane %v5936_v6, 4  ;;  %v5281_v32 = vrot.slane %v5280_v28, 4  ;;  %v5307_v61 = vshll.u32 %v5019_v23, 16  ;;  %7748 = vmatmul.mubr.msk.bf16.gmra.mrb[116].mxu0 %vm1172_vm7, %v10426_v41  ;;  %v9779_v36 = vld [vmem:[#allocation2 + $0x90] sm:$0xe]  ;;  %v9781_v59 = vpop.f32.mrb[31].mxu0 }
 0x20c   : > { %v5291_v44 = vrot.slane %v5290_v39, 4  ;;  %v5300_v17 = vrot.slane %v5298_v22, 4  ;;  %v5311_v15 = vshrl.u32 %v5019_v23, 16  ;;  %v5317_v46 = vshll.u32 %v5020_v37, 16  ;;  %v2699_v57 = vld [vmem:[#allocation3 + $0x58] sm:$0xff]  ;;  %v2133_v48 = vld [vmem:[#allocation3 + $0x70] sm:$0xff] }
 0x20d   : > { %v9777_v31 = vsel %vm8804_vm0, %v5938_v5, %v5939_v42  ;;  %v10427_v45 = vcombine.low %v9569_v4, %v9581_v34  ;;  %v7109_v49 = vcombine.low %v9744_v35, %v9754_v20  ;;  %v5286_v60 = vsel %vm8766_vm15, %v5281_v32, %v9746_v24  ;;  %v5806_v9 = vld [vmem:[#allocation2 + $0x94] sm:$0xf]  ;;  %v9795_v62 = vld [vmem:[#allocation2 + $0x98] sm:$0x1]  ;;  %v2697_v23 = vld [vmem:[#allocation3 + $0x48] sm:$0xff] }
 0x20e   : > { %v5296_v63 = vsel %vm8766_vm15, %v5291_v44, %v9761_v0  ;;  %v5303_v12 = vrot.slane %v5301_v3, 5  ;;  %v7110_v4 = vcombine.low %v9765_v11, %v9777_v31  ;;  %v9799_v34 = vrot.slane %v5307_v61, 5  ;;  %v2131_v28 = vld [vmem:[#allocation3 + $0x60] sm:$0xff]  ;;  %v2134_v39 = vld [vmem:[#allocation3 + $0x78] sm:$0xff]  ;;  %v5021_v42 = vld [vmem:[#allocation2 + $0xa8] sm:$0xf] }
 0x20f   : > { %7751 = vmatprep.mubr.msk.bf16.mxu0 %vm1172_vm7, %v10427_v45  ;;  %v5313_v43 = vrot.slane %v5311_v15, 4  ;;  %v9801_v21 = vrot.slane %v5317_v46, 5  ;;  %v2730_v50 = vadd.f32 %v9667_v47, %v2698_v54  ;;  %v2165_v1 = vadd.f32 %v7519_v38, %v2133_v48  ;;  %v2132_v32 = vld [vmem:[#allocation3 + $0x68] sm:$0xff]  ;;  %v5022_v44 = vld [vmem:[#allocation2 + $0xac] sm:$0xf] }
 0x210   : > { %v5304_v24 = vor.u32 %v5303_v12, %v5300_v17  ;;  %v2728_v6 = vadd.f32 %v2696_v16, %v9676_v7  ;;  %v2163_v0 = vadd.f32 %v2131_v28, %v2040_v40  ;;  %v2731_v5 = vadd.f32 %v9692_v18, %v2699_v57  ;;  %v5023_v61 = vld [vmem:[#allocation2 + $0xb0] sm:$0x1]  ;;  %v5808_v41 = vld [vmem:[#allocation2 + $0x9c] sm:$0xe]  ;;  %v9812_v40 = vpop.f32.mrb[32].mxu1  ;;  %7722 = vmatmul.mubr.msk.bf16.gmra.mrb[124].mxu1 %vm1172_vm7, %v9658_v52  ;;  %v2136_v20 = vld [vmem:[#allocation3 + $0x88] sm:$0xff] }
 0x211   : > { %v5314_v37 = vor.u32 %v5313_v43, %v9799_v34  ;;  %v2166_v22 = vadd.f32 %v7520_v19, %v2134_v39  ;;  %2762 = vst.msk [vmem:[#allocation3 + $0x50] sm:$0xff] %vm1389_vm1, %v2730_v50  ;;  %2197 = vst.msk [vmem:[#allocation3 + $0x70] sm:$0xff] %vm1389_vm1, %v2165_v1  ;;  %v2729_v47 = vadd.f32 %v2697_v23, %v9706_v53  ;;  %v7095_v38 = vrot.slane %v9779_v36, 9  ;;  %v9820_v17 = vpop.f32.mrb[33].mxu1  ;;  %v5809_v16 = vld [vmem:[#allocation2 + $0xa0] sm:$0xf] }
 0x212   : > { %v5305_v3 = vrot.slane %v5304_v24, 4  ;;  %2760 = vst.msk [vmem:[#allocation3 + $0x40] sm:$0xff] %vm1389_vm1, %v2728_v6  ;;  %v2164_v7 = vadd.f32 %v2132_v32, %v2043_v26  ;;  %2195 = vst.msk [vmem:[#allocation3 + $0x60] sm:$0xff] %vm1389_vm1, %v2163_v0  ;;  %v5943_v19 = vrot.slane %v5806_v9, 5  ;;  %v5946_v53 = vrot.slane %v9795_v62, 5  ;;  %7725 = vmatprep.mubr.msk.bf16.mxu1 %vm1172_vm7, %v9738_v25  ;;  %v9826_v36 = vpop.f32.mrb[34].mxu1 }
 0x213   : > { %v5315_v18 = vrot.slane %v5314_v37, 4  ;;  %2763 = vst.msk [vmem:[#allocation3 + $0x58] sm:$0xff] %vm1389_vm1, %v2731_v5  ;;  %2198 = vst.msk [vmem:[#allocation3 + $0x78] sm:$0xff] %vm1389_vm1, %v2166_v22  ;;  %v5322_v26 = vshrl.u32 %v5021_v42, 16  ;;  %v7063_v15 = vcombine.low %v5286_v60, %v5296_v63  ;;  %v5325_v52 = vshll.u32 %v5021_v42, 16  ;;  %v9838_v9 = vpop.f32.mrb[35].mxu1 }
 0x214   : > { %2761 = vst.msk [vmem:[#allocation3 + $0x48] sm:$0xff] %vm1389_vm1, %v2729_v47  ;;  %2196 = vst.msk [vmem:[#allocation3 + $0x68] sm:$0xff] %vm1389_vm1, %v2164_v7  ;;  %v5331_v46 = vshll.u32 %v5022_v44, 16  ;;  %v5335_v54 = vshrl.u32 %v5022_v44, 16  ;;  %v10428_v45 = vcombine.low %v9588_v27, %v9596_v51  ;;  %v5310_v25 = vsel %vm8766_vm15, %v5305_v3, %v9799_v34  ;;  %v5810_v57 = vld [vmem:[#allocation2 + $0xa4] sm:$0x1] }
 0x215   : > { %v5320_v60 = vsel %vm8766_vm15, %v5315_v18, %v9801_v21  ;;  %v5945_v63 = vrot.slane %v5943_v19, 4  ;;  %v5324_v12 = vrot.slane %v5322_v26, 4  ;;  %v9840_v62 = vpop.f32.mrb[32].mxu0  ;;  %v9848_v27 = vsel %vm8804_vm0, %v7095_v38, %v5943_v19  ;;  %v5024_v21 = vld [vmem:[#allocation2 + $0xb4] sm:$0xf] }
 0x216   : > { %7752 = vmatmul.mubr.msk.bf16.gmra.mrb[120].mxu0 %vm1172_vm7, %v10428_v45  ;;  %v5327_v51 = vrot.slane %v5325_v52, 5  ;;  %v5333_v34 = vrot.slane %v5331_v46, 5  ;;  %v5337_v43 = vrot.slane %v5335_v54, 4  ;;  %v9850_v48 = vpop.f32.mrb[33].mxu0  ;;  %v5341_v24 = vshll.u32 %v5023_v61, 16 }
 0x217   : > { %7755 = vmatprep.mubr.msk.bf16.mxu0 %vm1172_vm7, %v7107_v8  ;;  %v9854_v23 = vsel %vm8804_vm0, %v5945_v63, %v5946_v53  ;;  %v7096_v50 = vrot.slane %v5808_v41, 9  ;;  %v5950_v1 = vrot.slane %v5809_v16, 5  ;;  %v5025_v2 = vld [vmem:[#allocation2 + $0xb8] sm:$0xf]  ;;  %v9856_v13 = vpop.f32.mrb[34].mxu0  ;;  %v9858_v8 = vcombine.low %v5310_v25, %v5320_v60 }
 0x218   : > { %v5328_v6 = vor.u32 %v5327_v51, %v5324_v12  ;;  %v5338_v28 = vor.u32 %v5337_v43, %v5333_v34  ;;  %v5953_v39 = vrot.slane %v5810_v57, 5  ;;  %v5026_v42 = vld [vmem:[#allocation2 + $0xbc] sm:$0x1]  ;;  %v9860_v37 = vpop.f32.mrb[35].mxu0  ;;  %v7111_v0 = vcombine.low %v9848_v27, %v9854_v23  ;;  %7726 = vmatmul.mubr.msk.bf16.gmra.mrb[128].mxu1 %vm1172_vm7, %v9748_v14  ;;  %v2702_v19 = vld [vmem:[#allocation3 + $0x70] sm:$0xff] }
 0x219   : > { %v5343_v5 = vrot.slane %v5341_v24, 5  ;;  %v5952_v22 = vrot.slane %v5950_v1, 4  ;;  %v5346_v32 = vshrl.u32 %v5024_v21, 16  ;;  %v5349_v47 = vshll.u32 %v5024_v21, 16  ;;  %v2700_v53 = vld [vmem:[#allocation3 + $0x60] sm:$0xff]  ;;  %7729 = vmatprep.mubr.msk.bf16.mxu1 %vm1172_vm7, %v7063_v15  ;;  %v2137_v51 = vld [vmem:[#allocation3 + $0x90] sm:$0xff] }
 0x21a   : > { %v5329_v44 = vrot.slane %v5328_v6, 4  ;;  %v5339_v3 = vrot.slane %v5338_v28, 4  ;;  %v5355_v7 = vshll.u32 %v5025_v2, 16  ;;  %v9868_v38 = vsel %vm8804_vm0, %v7096_v50, %v5950_v1  ;;  %v9870_v26 = vld [vmem:[#allocation2 + $0xa8] sm:$0xe]  ;;  %v2703_v16 = vld [vmem:[#allocation3 + $0x78] sm:$0xff] }
 0x21b   : > { %v5348_v61 = vrot.slane %v5346_v32, 4  ;;  %v5359_v41 = vshrl.u32 %v5025_v2, 16  ;;  %v5365_v18 = vshll.u32 %v5026_v42, 16  ;;  %v9879_v14 = vsel %vm8804_vm0, %v5952_v22, %v5953_v39  ;;  %v5812_v45 = vld [vmem:[#allocation2 + $0xac] sm:$0xf]  ;;  %v2135_v24 = vld [vmem:[#allocation3 + $0x80] sm:$0xff] }
 0x21c   : > { %v5334_v52 = vsel %vm8766_vm15, %v5329_v44, %v5333_v34  ;;  %v5344_v46 = vsel %vm8766_vm15, %v5339_v3, %v5343_v5  ;;  %v5351_v54 = vrot.slane %v5349_v47, 5  ;;  %v9881_v25 = vld [vmem:[#allocation2 + $0xb0] sm:$0x1]  ;;  %v10429_v60 = vcombine.low %v9674_v10, %v9688_v30  ;;  %v2701_v34 = vld [vmem:[#allocation3 + $0x68] sm:$0xff]  ;;  %v5814_v42 = vld [vmem:[#allocation2 + $0xb4] sm:$0xe] }
 0x21d   : > { %v7065_v15 = vcombine.low %v5334_v52, %v5344_v46  ;;  %v9887_v63 = vrot.slane %v5355_v7, 5  ;;  %v5361_v12 = vrot.slane %v5359_v41, 4  ;;  %v9889_v57 = vrot.slane %v5365_v18, 5  ;;  %v2138_v50 = vld [vmem:[#allocation3 + $0x98] sm:$0xff]  ;;  %v5027_v1 = vld [vmem:[#allocation2 + $0xc0] sm:$0xf] }
 0x21e   : > { %7756 = vmatmul.mubr.msk.bf16.gmra.mrb[124].mxu0 %vm1172_vm7, %v10429_v60  ;;  %v5352_v43 = vor.u32 %v5351_v54, %v5348_v61  ;;  %v2734_v21 = vadd.f32 %v9750_v56, %v2702_v19  ;;  %v2169_v10 = vadd.f32 %v9812_v40, %v2137_v51  ;;  %v2732_v30 = vadd.f32 %v2700_v53, %v9757_v55  ;;  %v9902_v39 = vpop.f32.mrb[36].mxu1  ;;  %v5816_v46 = vld [vmem:[#allocation2 + $0xbc] sm:$0x1]  ;;  %v5030_v60 = vld [vmem:[#allocation2 + $0xcc] sm:$0xf] }
 0x21f   : > { %7759 = vmatprep.mubr.msk.bf16.mxu0 %vm1172_vm7, %v7109_v49  ;;  %v5362_v2 = vor.u32 %v5361_v12, %v9887_v63  ;;  %v2167_v6 = vadd.f32 %v2135_v24, %v9820_v17  ;;  %v2735_v28 = vadd.f32 %v9767_v29, %v2703_v16  ;;  %v2170_v35 = vadd.f32 %v9826_v36, %v2138_v50  ;;  %v5028_v49 = vld [vmem:[#allocation2 + $0xc4] sm:$0xf]  ;;  %v5029_v29 = vld [vmem:[#allocation2 + $0xc8] sm:$0x1]  ;;  %v5815_v36 = vld [vmem:[#allocation2 + $0xb8] sm:$0xf] }
 0x220   : > { %v5353_v56 = vrot.slane %v5352_v43, 4  ;;  %2766 = vst.msk [vmem:[#allocation3 + $0x70] sm:$0xff] %vm1389_vm1, %v2734_v21  ;;  %2201 = vst.msk [vmem:[#allocation3 + $0x90] sm:$0xff] %vm1389_vm1, %v2169_v10  ;;  %v2733_v55 = vadd.f32 %v2701_v34, %v9781_v59  ;;  %v2168_v40 = vadd.f32 %v2136_v20, %v9838_v9  ;;  %v7097_v17 = vrot.slane %v9870_v26, 9  ;;  %v9910_v5 = vpop.f32.mrb[37].mxu1  ;;  %v9924_v18 = vpop.f32.mrb[36].mxu0  ;;  %7730 = vmatmul.mubr.msk.bf16.gmra.mrb[132].mxu1 %vm1172_vm7, %v9858_v8 }
 0x221   : > { %2764 = vst.msk [vmem:[#allocation3 + $0x60] sm:$0xff] %vm1389_vm1, %v2732_v30  ;;  %v5363_v22 = vrot.slane %v5362_v2, 4  ;;  %2199 = vst.msk [vmem:[#allocation3 + $0x80] sm:$0xff] %vm1389_vm1, %v2167_v6  ;;  %v5957_v32 = vrot.slane %v5812_v45, 5  ;;  %v5960_v44 = vrot.slane %v9881_v25, 5  ;;  %v5370_v59 = vshrl.u32 %v5027_v1, 16  ;;  %7733 = vmatprep.mubr.msk.bf16.mxu1 %vm1172_vm7, %v7065_v15 }
 0x222   : > { %2767 = vst.msk [vmem:[#allocation3 + $0x78] sm:$0xff] %vm1389_vm1, %v2735_v28  ;;  %2202 = vst.msk [vmem:[#allocation3 + $0x98] sm:$0xff] %vm1389_vm1, %v2170_v35  ;;  %v9916_v3 = vpop.f32.mrb[38].mxu1  ;;  %v7112_v9 = vcombine.low %v9868_v38, %v9879_v14  ;;  %v5373_v47 = vshll.u32 %v5027_v1, 16  ;;  %v5379_v7 = vshll.u32 %v5028_v49, 16  ;;  %v5383_v61 = vshrl.u32 %v5028_v49, 16 }
 0x223   : > { %2765 = vst.msk [vmem:[#allocation3 + $0x68] sm:$0xff] %vm1389_vm1, %v2733_v55  ;;  %2200 = vst.msk [vmem:[#allocation3 + $0x88] sm:$0xff] %vm1389_vm1, %v2168_v40  ;;  %v9922_v41 = vpop.f32.mrb[39].mxu1  ;;  %v5358_v19 = vsel %vm8766_vm15, %v5353_v56, %v9887_v63  ;;  %v5368_v53 = vsel %vm8766_vm15, %v5363_v22, %v9889_v57  ;;  %v5959_v26 = vrot.slane %v5957_v32, 4  ;;  %v5372_v52 = vrot.slane %v5370_v59, 4  ;;  %v9934_v54 = vpop.f32.mrb[37].mxu0 }
 0x224   : > { %v9939_v16 = vsel %vm8804_vm0, %v7097_v17, %v5957_v32  ;;  %v5375_v8 = vrot.slane %v5373_v47, 5  ;;  %v5381_v45 = vrot.slane %v5379_v7, 5  ;;  %v5385_v25 = vrot.slane %v5383_v61, 4  ;;  %v9941_v63 = vpop.f32.mrb[38].mxu0  ;;  %v5031_v34 = vld [vmem:[#allocation2 + $0xd0] sm:$0xf] }
 0x225   : > { %v5961_v12 = vsel %vm8804_vm0, %v5959_v26, %v5960_v44  ;;  %v5389_v57 = vshll.u32 %v5029_v29, 16  ;;  %v7098_v15 = vrot.slane %v5814_v42, 9  ;;  %v5964_v51 = vrot.slane %v5815_v36, 5  ;;  %v9949_v43 = vpop.f32.mrb[39].mxu0  ;;  %v5032_v31 = vld [vmem:[#allocation2 + $0xd4] sm:$0x1] }
 0x226   : > { %7760 = vmatmul.mubr.msk.bf16.gmra.mrb[128].mxu0 %vm1172_vm7, %v7110_v4  ;;  %v7066_v21 = vcombine.low %v5358_v19, %v5368_v53  ;;  %v5376_v10 = vor.u32 %v5375_v8, %v5372_v52  ;;  %v5386_v30 = vor.u32 %v5385_v25, %v5381_v45  ;;  %v5967_v11 = vrot.slane %v5816_v46, 5  ;;  %v5817_v36 = vld [vmem:[#allocation2 + $0xc0] sm:$0xe]  ;;  %v5818_v22 = vld [vmem:[#allocation2 + $0xc4] sm:$0xf]  ;;  %v2141_v7 = vld [vmem:[#allocation3 + $0xb0] sm:$0xff] }
 0x227   : > { %7763 = vmatprep.mubr.msk.bf16.mxu0 %vm1172_vm7, %v7111_v0  ;;  %v7113_v4 = vcombine.low %v9939_v16, %v5961_v12  ;;  %v5391_v24 = vrot.slane %v5389_v57, 5  ;;  %v5966_v50 = vrot.slane %v5964_v51, 4  ;;  %v5394_v1 = vshrl.u32 %v5030_v60, 16  ;;  %v2706_v49 = vld [vmem:[#allocation3 + $0x90] sm:$0xff]  ;;  %v2139_v46 = vld [vmem:[#allocation3 + $0xa0] sm:$0xff]  ;;  %v2140_v12 = vld [vmem:[#allocation3 + $0xa8] sm:$0xff] }
 0x228   : > { %v5377_v2 = vrot.slane %v5376_v10, 4  ;;  %v5387_v6 = vrot.slane %v5386_v30, 4  ;;  %v5397_v28 = vshll.u32 %v5030_v60, 16  ;;  %v5403_v35 = vshll.u32 %v5031_v34, 16  ;;  %v2704_v56 = vld [vmem:[#allocation3 + $0x80] sm:$0xff]  ;;  %7734 = vmatmul.mubr.msk.bf16.gmra.mrb[136].mxu1 %vm1172_vm7, %v7066_v21 }
 0x229   : > { %v9958_v20 = vsel %vm8804_vm0, %v7098_v15, %v5964_v51  ;;  %v5396_v27 = vrot.slane %v5394_v1, 4  ;;  %v5407_v23 = vshrl.u32 %v5031_v34, 16  ;;  %v5413_v0 = vshll.u32 %v5032_v31, 16  ;;  %v2707_v42 = vld [vmem:[#allocation3 + $0x98] sm:$0xff]  ;;  %v5819_v16 = vld [vmem:[#allocation2 + $0xc8] sm:$0x1] }
 0x22a   : > { %v5382_v55 = vsel %vm8766_vm15, %v5377_v2, %v5381_v45  ;;  %v5392_v40 = vsel %vm8766_vm15, %v5387_v6, %v5391_v24  ;;  %v9966_v17 = vsel %vm8804_vm0, %v5966_v50, %v5967_v11  ;;  %v5399_v29 = vrot.slane %v5397_v28, 5  ;;  %v2705_v61 = vld [vmem:[#allocation3 + $0x88] sm:$0xff]  ;;  %v9972_v8 = vld [vmem:[#allocation2 + $0xcc] sm:$0xe]  ;;  %v7531_v45 = vpop.f32.mrb[40].mxu1  ;;  %v2143_v1 = vld [vmem:[#allocation3 + $0xc0] sm:$0xff] }
 0x22b   : > { %v7067_v32 = vcombine.low %v5382_v55, %v5392_v40  ;;  %v5405_v44 = vrot.slane %v5403_v35, 5  ;;  %v5409_v59 = vrot.slane %v5407_v23, 4  ;;  %v5415_v47 = vrot.slane %v5413_v0, 5  ;;  %v5821_v57 = vld [vmem:[#allocation2 + $0xd0] sm:$0xf]  ;;  %v2088_v15 = vpop.f32.mrb[41].mxu1 }
 0x22c   : > { %v5400_v19 = vor.u32 %v5399_v29, %v5396_v27  ;;  %v2738_v53 = vadd.f32 %v9840_v62, %v2706_v49  ;;  %v2173_v26 = vadd.f32 %v9902_v39, %v2141_v7  ;;  %v2736_v52 = vadd.f32 %v2704_v56, %v9850_v48  ;;  %v2142_v39 = vld [vmem:[#allocation3 + $0xb8] sm:$0xff]  ;;  %v9988_v34 = vpop.f32.mrb[40].mxu0  ;;  %v2145_v31 = vld [vmem:[#allocation3 + $0xd0] sm:$0xff]  ;;  %v2144_v40 = vld [vmem:[#allocation3 + $0xc8] sm:$0xff] }
 0x22d   : > { %7737 = vmatprep.mubr.msk.bf16.mxu1 %vm1172_vm7, %v7067_v32  ;;  %v5410_v25 = vor.u32 %v5409_v59, %v5405_v44  ;;  %v2171_v60 = vadd.f32 %v2139_v46, %v9910_v5  ;;  %v2739_v62 = vadd.f32 %v9856_v13, %v2707_v42  ;;  %v7099_v48 = vrot.slane %v5817_v36, 9  ;;  %v5822_v5 = vld [vmem:[#allocation2 + $0xd4] sm:$0x1] }
 0x22e   : > { %7764 = vmatmul.mubr.msk.bf16.gmra.mrb[132].mxu0 %vm1172_vm7, %v7112_v9  ;;  %v5401_v51 = vrot.slane %v5400_v19, 4  ;;  %2770 = vst.msk [vmem:[#allocation3 + $0x90] sm:$0xff] %vm1389_vm1, %v2738_v53  ;;  %2205 = vst.msk [vmem:[#allocation3 + $0xb0] sm:$0xff] %vm1389_vm1, %v2173_v26  ;;  %v2174_v38 = vadd.f32 %v9916_v3, %v2142_v39  ;;  %v2737_v14 = vadd.f32 %v2705_v61, %v9860_v37  ;;  %v7532_v9 = vpop.f32.mrb[42].mxu1  ;;  %v5971_v30 = vrot.slane %v5818_v22, 5  ;;  %v2146_v27 = vld [vmem:[#allocation3 + $0xd8] sm:$0xff] }
 0x22f   : > { %7767 = vmatprep.mubr.msk.bf16.mxu0 %vm1172_vm7, %v7113_v4  ;;  %2768 = vst.msk [vmem:[#allocation3 + $0x80] sm:$0xff] %vm1389_vm1, %v2736_v52  ;;  %v2172_v13 = vadd.f32 %v2140_v12, %v9922_v41  ;;  %v7114_v21 = vcombine.low %v9958_v20, %v9966_v17  ;;  %v5411_v10 = vrot.slane %v5410_v25, 4  ;;  %2203 = vst.msk [vmem:[#allocation3 + $0xa0] sm:$0xff] %vm1389_vm1, %v2171_v60  ;;  %v5974_v11 = vrot.slane %v5819_v16, 5  ;;  %v2091_v3 = vpop.f32.mrb[43].mxu1  ;;  %v2657_v4 = vpop.f32.mrb[41].mxu0 }
 0x230   : > { %2771 = vst.msk [vmem:[#allocation3 + $0x98] sm:$0xff] %vm1389_vm1, %v2739_v62  ;;  %v5406_v37 = vsel %vm8766_vm15, %v5401_v51, %v5405_v44  ;;  %2206 = vst.msk [vmem:[#allocation3 + $0xb8] sm:$0xff] %vm1389_vm1, %v2174_v38  ;;  %v7100_v41 = vrot.slane %v9972_v8, 9  ;;  %v5978_v24 = vrot.slane %v5821_v57, 5  ;;  %v2177_v50 = vadd.f32 %v7531_v45, %v2145_v31  ;;  %v7566_v2 = vpop.f32.mrb[42].mxu0  ;;  %v2149_v52 = vld [vmem:[#allocation3 + $0xf0] sm:$0xff] }
 0x231   : > { %2769 = vst.msk [vmem:[#allocation3 + $0x88] sm:$0xff] %vm1389_vm1, %v2737_v14  ;;  %2204 = vst.msk [vmem:[#allocation3 + $0xa8] sm:$0xff] %vm1389_vm1, %v2172_v13  ;;  %v5416_v6 = vsel %vm8766_vm15, %v5411_v10, %v5415_v47  ;;  %v5972_v28 = vsel %vm8804_vm0, %v7099_v48, %v5971_v30  ;;  %v5973_v35 = vrot.slane %v5971_v30, 4  ;;  %v2175_v20 = vadd.f32 %v2143_v1, %v2088_v15  ;;  %v2660_v23 = vpop.f32.mrb[43].mxu0  ;;  %v2147_v45 = vld [vmem:[#allocation3 + $0xe0] sm:$0xff]  ;;  %v2150_v62 = vld [vmem:[#allocation3 + $0xf8] sm:$0xff] }
 0x232   : > { %v7068_v0 = vcombine.low %v5406_v37, %v5416_v6  ;;  %v5980_v49 = vrot.slane %v5978_v24, 4  ;;  %v5981_v56 = vrot.slane %v5822_v5, 5  ;;  %2209 = vst.msk [vmem:[#allocation3 + $0xd0] sm:$0xff] %vm1389_vm1, %v2177_v50  ;;  %v2178_v55 = vadd.f32 %v7532_v9, %v2146_v27  ;;  %v2148_v51 = vld [vmem:[#allocation3 + $0xe8] sm:$0xff]  ;;  %v3110_v30 = vld [vmem:[#allocation3] sm:$0xff] }
 0x233   : > { %v5975_v17 = vsel %vm8804_vm0, %v5973_v35, %v5974_v11  ;;  %2207 = vst.msk [vmem:[#allocation3 + $0xc0] sm:$0xff] %vm1389_vm1, %v2175_v20  ;;  %v2176_v58 = vadd.f32 %v2144_v40, %v2091_v3  ;;  %v5979_v36 = vsel %vm8804_vm0, %v7100_v41, %v5978_v24  ;;  %v3111_v1 = vld [vmem:[#allocation3 + $0x8] sm:$0xff]  ;;  %v3116_v40 = vld [vmem:[#allocation3 + $0x30] sm:$0xff] }
 0x234   : > { %7738 = vmatmul.mubr.msk.bf16.gmra.mrb[140].mxu1 %vm1172_vm7, %v7068_v0  ;;  %v7115_v29 = vcombine.low %v5972_v28, %v5975_v17  ;;  %2210 = vst.msk [vmem:[#allocation3 + $0xd8] sm:$0xff] %vm1389_vm1, %v2178_v55  ;;  %v5982_v22 = vsel %vm8804_vm0, %v5980_v49, %v5981_v56  ;;  %v7569_v61 = vpop.f32.mrb[44].mxu0 }
 0x235   : > { %v2710_v42 = vld [vmem:[#allocation3 + $0xb0] sm:$0xff]  ;;  %2208 = vst.msk [vmem:[#allocation3 + $0xc8] sm:$0xff] %vm1389_vm1, %v2176_v58  ;;  %v7535_v26 = vpop.f32.mrb[44].mxu1  ;;  %v2673_v46 = vpop.f32.mrb[45].mxu0  ;;  %v7116_v16 = vcombine.low %v5979_v36, %v5982_v22 }
 0x236   : > { %7768 = vmatmul.mubr.msk.bf16.gmra.mrb[136].mxu0 %vm1172_vm7, %v7114_v21  ;;  %v2742_v32 = vadd.f32 %v9924_v18, %v2710_v42  ;;  %v2708_v44 = vld [vmem:[#allocation3 + $0xa0] sm:$0xff]  ;;  %v2181_v18 = vadd.f32 %v7535_v26, %v2149_v52  ;;  %v2104_v8 = vpop.f32.mrb[45].mxu1 }
 0x237   : > { %7771 = vmatprep.mubr.msk.bf16.mxu0 %vm1172_vm7, %v7115_v29  ;;  %v2740_v59 = vadd.f32 %v2708_v44, %v9934_v54  ;;  %v2711_v47 = vld [vmem:[#allocation3 + $0xb8] sm:$0xff]  ;;  %v7570_v54 = vpop.f32.mrb[46].mxu0  ;;  %v2179_v60 = vadd.f32 %v2147_v45, %v2104_v8  ;;  %v3114_v29 = vld [vmem:[#allocation3 + $0x20] sm:$0xff] }
 0x238   : > { %v2709_v7 = vld [vmem:[#allocation3 + $0xa8] sm:$0xff]  ;;  %2774 = vst.msk [vmem:[#allocation3 + $0xb0] sm:$0xff] %vm1389_vm1, %v2742_v32  ;;  %v2743_v19 = vadd.f32 %v9941_v63, %v2711_v47  ;;  %v2676_v39 = vpop.f32.mrb[47].mxu0  ;;  %2213 = vst.msk [vmem:[#allocation3 + $0xf0] sm:$0xff] %vm1389_vm1, %v2181_v18  ;;  %v3117_v32 = vld [vmem:[#allocation3 + $0x38] sm:$0xff] }
 0x239   : > { %v2741_v53 = vadd.f32 %v2709_v7, %v9949_v43  ;;  %2772 = vst.msk [vmem:[#allocation3 + $0xa0] sm:$0xff] %vm1389_vm1, %v2740_v59  ;;  %v2714_v33 = vld [vmem:[#allocation3 + $0xd0] sm:$0xff]  ;;  %v7536_v43 = vpop.f32.mrb[46].mxu1  ;;  %2211 = vst.msk [vmem:[#allocation3 + $0xe0] sm:$0xff] %vm1389_vm1, %v2179_v60 }
 0x23a   : > { %2775 = vst.msk [vmem:[#allocation3 + $0xb8] sm:$0xff] %vm1389_vm1, %v2743_v19  ;;  %v2746_v25 = vadd.f32 %v9988_v34, %v2714_v33  ;;  %v2712_v63 = vld [vmem:[#allocation3 + $0xc0] sm:$0xff]  ;;  %v2182_v57 = vadd.f32 %v7536_v43, %v2150_v62  ;;  %v2107_v15 = vpop.f32.mrb[47].mxu1  ;;  %v3112_v34 = vld [vmem:[#allocation3 + $0x10] sm:$0xff] }
 0x23b   : > { %2773 = vst.msk [vmem:[#allocation3 + $0xa8] sm:$0xff] %vm1389_vm1, %v2741_v53  ;;  %v2744_v12 = vadd.f32 %v2712_v63, %v2657_v4  ;;  %v2715_v48 = vld [vmem:[#allocation3 + $0xd8] sm:$0xff]  ;;  %v2180_v13 = vadd.f32 %v2148_v51, %v2107_v15  ;;  %v3118_v43 = vld [vmem:[#allocation3 + $0x40] sm:$0xff] }
 0x23c   : > { %2778 = vst.msk [vmem:[#allocation3 + $0xd0] sm:$0xff] %vm1389_vm1, %v2746_v25  ;;  %v2747_v38 = vadd.f32 %v7566_v2, %v2715_v48  ;;  %v2713_v14 = vld [vmem:[#allocation3 + $0xc8] sm:$0xff]  ;;  %2214 = vst.msk [vmem:[#allocation3 + $0xf8] sm:$0xff] %vm1389_vm1, %v2182_v57  ;;  %v3113_v4 = vld [vmem:[#allocation3 + $0x18] sm:$0xff] }
 0x23d   : > { %2776 = vst.msk [vmem:[#allocation3 + $0xc0] sm:$0xff] %vm1389_vm1, %v2744_v12  ;;  %v2745_v5 = vadd.f32 %v2713_v14, %v2660_v23  ;;  %2212 = vst.msk [vmem:[#allocation3 + $0xe8] sm:$0xff] %vm1389_vm1, %v2180_v13  ;;  %v7575_v9 = vpop.f32.mrb[48].mxu1  ;;  %v3120_v25 = vld [vmem:[#allocation3 + $0x50] sm:$0xff]  ;;  %v3121_v48 = vld [vmem:[#allocation3 + $0x58] sm:$0xff] }
 0x23e   : > { %7772 = vmatmul.mubr.msk.bf16.gmra.mrb[140].mxu0 %vm1172_vm7, %v7116_v16  ;;  %2779 = vst.msk [vmem:[#allocation3 + $0xd8] sm:$0xff] %vm1389_vm1, %v2747_v38  ;;  %v3144_v21 = vadd.f32 %v7575_v9, %v3112_v34  ;;  %v2983_v10 = vpop.f32.mrb[49].mxu1  ;;  %v3119_v14 = vld [vmem:[#allocation3 + $0x48] sm:$0xff] }
 0x23f   : > { %2777 = vst.msk [vmem:[#allocation3 + $0xc8] sm:$0xff] %vm1389_vm1, %v2745_v5  ;;  %v2718_v11 = vld [vmem:[#allocation3 + $0xf0] sm:$0xff]  ;;  %v3142_v31 = vadd.f32 %v3110_v30, %v2983_v10  ;;  %v7576_v3 = vpop.f32.mrb[50].mxu1 }
 0x240   : > { %v2750_v37 = vadd.f32 %v7569_v61, %v2718_v11  ;;  %v2716_v41 = vld [vmem:[#allocation3 + $0xe0] sm:$0xff]  ;;  %3176 = vst.msk [vmem:[#allocation3 + $0x10] sm:$0xff] %vm1389_vm1, %v3144_v21  ;;  %v3145_v24 = vadd.f32 %v7576_v3, %v3113_v4  ;;  %v2986_v50 = vpop.f32.mrb[51].mxu1  ;;  %v7609_v2 = vpop.f32.mrb[48].mxu0  ;;  %v3115_v61 = vld [vmem:[#allocation3 + $0x28] sm:$0xff] }
 0x241   : > { %v2748_v6 = vadd.f32 %v2716_v41, %v2673_v46  ;;  %3174 = vst.msk [vmem:[#allocation3] sm:$0xff] %vm1389_vm1, %v3142_v31  ;;  %v3143_v35 = vadd.f32 %v3111_v1, %v2986_v50  ;;  %v3773_v20 = vpop.f32.mrb[49].mxu0  ;;  %v3122_v50 = vld [vmem:[#allocation3 + $0x60] sm:$0xff] }
 0x242   : > { %2782 = vst.msk [vmem:[#allocation3 + $0xf0] sm:$0xff] %vm1389_vm1, %v2750_v37  ;;  %3177 = vst.msk [vmem:[#allocation3 + $0x18] sm:$0xff] %vm1389_vm1, %v3145_v24  ;;  %v7610_v0 = vpop.f32.mrb[50].mxu0  ;;  %v3124_v37 = vld [vmem:[#allocation3 + $0x70] sm:$0xff] }
 0x243   : > { %v2719_v28 = vld [vmem:[#allocation3 + $0xf8] sm:$0xff]  ;;  %2780 = vst.msk [vmem:[#allocation3 + $0xe0] sm:$0xff] %vm1389_vm1, %v2748_v6  ;;  %3175 = vst.msk [vmem:[#allocation3 + $0x8] sm:$0xff] %vm1389_vm1, %v3143_v35  ;;  %v3776_v56 = vpop.f32.mrb[51].mxu0 }
 0x244   : > { %v2751_v27 = vadd.f32 %v7570_v54, %v2719_v28  ;;  %v2717_v23 = vld [vmem:[#allocation3 + $0xe8] sm:$0xff]  ;;  %v3125_v28 = vld [vmem:[#allocation3 + $0x78] sm:$0xff] }
 0x245   : > { %v2749_v49 = vadd.f32 %v2717_v23, %v2676_v39  ;;  %v7579_v55 = vpop.f32.mrb[52].mxu1 }
 0x246   : > { %2783 = vst.msk [vmem:[#allocation3 + $0xf8] sm:$0xff] %vm1389_vm1, %v2751_v27  ;;  %v3148_v17 = vadd.f32 %v7579_v55, %v3116_v40  ;;  %v2999_v58 = vpop.f32.mrb[53].mxu1 }
 0x247   : > { %2781 = vst.msk [vmem:[#allocation3 + $0xe8] sm:$0xff] %vm1389_vm1, %v2749_v49  ;;  %v3902_v42 = vld [vmem:[#allocation3 + $0x10] sm:$0xff]  ;;  %v3146_v36 = vadd.f32 %v3114_v29, %v2999_v58  ;;  %v7580_v22 = vpop.f32.mrb[54].mxu1 }
 0x248   : > { %v3934_v44 = vadd.f32 %v7609_v2, %v3902_v42  ;;  %3180 = vst.msk [vmem:[#allocation3 + $0x30] sm:$0xff] %vm1389_vm1, %v3148_v17  ;;  %v3900_v59 = vld [vmem:[#allocation3] sm:$0xff]  ;;  %v3149_v47 = vadd.f32 %v7580_v22, %v3117_v32  ;;  %v3002_v7 = vpop.f32.mrb[55].mxu1 }
 0x249   : > { %v3932_v19 = vadd.f32 %v3900_v59, %v3773_v20  ;;  %3178 = vst.msk [vmem:[#allocation3 + $0x20] sm:$0xff] %vm1389_vm1, %v3146_v36  ;;  %v3903_v53 = vld [vmem:[#allocation3 + $0x18] sm:$0xff]  ;;  %v3147_v26 = vadd.f32 %v3115_v61, %v3002_v7  ;;  %v7613_v52 = vpop.f32.mrb[52].mxu0  ;;  %v3126_v7 = vld [vmem:[#allocation3 + $0x80] sm:$0xff] }
 0x24a   : > { %3966 = vst.msk [vmem:[#allocation3 + $0x10] sm:$0xff] %vm1389_vm1, %v3934_v44  ;;  %v3935_v46 = vadd.f32 %v7610_v0, %v3903_v53  ;;  %3181 = vst.msk [vmem:[#allocation3 + $0x38] sm:$0xff] %vm1389_vm1, %v3149_v47  ;;  %v3901_v16 = vld [vmem:[#allocation3 + $0x8] sm:$0xff]  ;;  %v3789_v33 = vpop.f32.mrb[53].mxu0  ;;  %v3128_v44 = vld [vmem:[#allocation3 + $0x90] sm:$0xff] }
 0x24b   : > { %3964 = vst.msk [vmem:[#allocation3] sm:$0xff] %vm1389_vm1, %v3932_v19  ;;  %v3933_v18 = vadd.f32 %v3901_v16, %v3776_v56  ;;  %3179 = vst.msk [vmem:[#allocation3 + $0x28] sm:$0xff] %vm1389_vm1, %v3147_v26  ;;  %v7614_v8 = vpop.f32.mrb[54].mxu0  ;;  %v3123_v0 = vld [vmem:[#allocation3 + $0x68] sm:$0xff]  ;;  %v3129_v26 = vld [vmem:[#allocation3 + $0x98] sm:$0xff] }
 0x24c   : > { %3967 = vst.msk [vmem:[#allocation3 + $0x18] sm:$0xff] %vm1389_vm1, %v3935_v46  ;;  %v3792_v45 = vpop.f32.mrb[55].mxu0 }
 0x24d   : > { %3965 = vst.msk [vmem:[#allocation3 + $0x8] sm:$0xff] %vm1389_vm1, %v3933_v18  ;;  %v7583_v54 = vpop.f32.mrb[56].mxu1  ;;  %v3127_v18 = vld [vmem:[#allocation3 + $0x88] sm:$0xff] }
 0x24e   : > { %v3152_v63 = vadd.f32 %v7583_v54, %v3120_v25  ;;  %v3015_v60 = vpop.f32.mrb[57].mxu1 }
 0x24f   : > { %v3906_v62 = vld [vmem:[#allocation3 + $0x30] sm:$0xff]  ;;  %v3150_v39 = vadd.f32 %v3118_v43, %v3015_v60  ;;  %v7584_v12 = vpop.f32.mrb[58].mxu1 }
 0x250   : > { %v3938_v57 = vadd.f32 %v7613_v52, %v3906_v62  ;;  %3184 = vst.msk [vmem:[#allocation3 + $0x50] sm:$0xff] %vm1389_vm1, %v3152_v63  ;;  %v3904_v15 = vld [vmem:[#allocation3 + $0x20] sm:$0xff]  ;;  %v3153_v51 = vadd.f32 %v7584_v12, %v3121_v48  ;;  %v3018_v38 = vpop.f32.mrb[59].mxu1 }
 0x251   : > { %v3936_v13 = vadd.f32 %v3904_v15, %v3789_v33  ;;  %3182 = vst.msk [vmem:[#allocation3 + $0x40] sm:$0xff] %vm1389_vm1, %v3150_v39  ;;  %v3907_v5 = vld [vmem:[#allocation3 + $0x38] sm:$0xff]  ;;  %v3151_v9 = vadd.f32 %v3119_v14, %v3018_v38  ;;  %v3130_v38 = vld [vmem:[#allocation3 + $0xa0] sm:$0xff] }
 0x252   : > { %v7617_v34 = vpop.f32.mrb[56].mxu0  ;;  %3970 = vst.msk [vmem:[#allocation3 + $0x30] sm:$0xff] %vm1389_vm1, %v3938_v57  ;;  %v3939_v21 = vadd.f32 %v7614_v8, %v3907_v5  ;;  %3185 = vst.msk [vmem:[#allocation3 + $0x58] sm:$0xff] %vm1389_vm1, %v3153_v51  ;;  %v3905_v10 = vld [vmem:[#allocation3 + $0x28] sm:$0xff]  ;;  %v3132_v57 = vld [vmem:[#allocation3 + $0xb0] sm:$0xff] }
 0x253   : > { %v3805_v30 = vpop.f32.mrb[57].mxu0  ;;  %3968 = vst.msk [vmem:[#allocation3 + $0x20] sm:$0xff] %vm1389_vm1, %v3936_v13  ;;  %v3937_v11 = vadd.f32 %v3905_v10, %v3792_v45  ;;  %3183 = vst.msk [vmem:[#allocation3 + $0x48] sm:$0xff] %vm1389_vm1, %v3151_v9  ;;  %v3133_v9 = vld [vmem:[#allocation3 + $0xb8] sm:$0xff] }
 0x254   : > { %v7618_v31 = vpop.f32.mrb[58].mxu0  ;;  %3971 = vst.msk [vmem:[#allocation3 + $0x38] sm:$0xff] %vm1389_vm1, %v3939_v21 }
 0x255   : > { %v3808_v3 = vpop.f32.mrb[59].mxu0  ;;  %3969 = vst.msk [vmem:[#allocation3 + $0x28] sm:$0xff] %vm1389_vm1, %v3937_v11  ;;  %v7587_v4 = vpop.f32.mrb[60].mxu1  ;;  %v3131_v11 = vld [vmem:[#allocation3 + $0xa8] sm:$0xff] }
 0x256   : > { %v3156_v41 = vadd.f32 %v7587_v4, %v3124_v37  ;;  %v3031_v24 = vpop.f32.mrb[61].mxu1 }
 0x257   : > { %v3910_v1 = vld [vmem:[#allocation3 + $0x50] sm:$0xff]  ;;  %v3154_v2 = vadd.f32 %v3122_v50, %v3031_v24  ;;  %v7588_v6 = vpop.f32.mrb[62].mxu1 }
 0x258   : > { %v3942_v35 = vadd.f32 %v7617_v34, %v3910_v1  ;;  %3188 = vst.msk [vmem:[#allocation3 + $0x70] sm:$0xff] %vm1389_vm1, %v3156_v41  ;;  %v3908_v20 = vld [vmem:[#allocation3 + $0x40] sm:$0xff]  ;;  %v3157_v27 = vadd.f32 %v7588_v6, %v3125_v28  ;;  %v3034_v23 = vpop.f32.mrb[63].mxu1  ;;  %v3136_v6 = vld [vmem:[#allocation3 + $0xd0] sm:$0xff] }
 0x259   : > { %v3940_v49 = vadd.f32 %v3908_v20, %v3805_v30  ;;  %3186 = vst.msk [vmem:[#allocation3 + $0x60] sm:$0xff] %vm1389_vm1, %v3154_v2  ;;  %v3911_v56 = vld [vmem:[#allocation3 + $0x58] sm:$0xff]  ;;  %v3155_v55 = vadd.f32 %v3123_v0, %v3034_v23 }
 0x25a   : > { %v7621_v40 = vpop.f32.mrb[60].mxu0  ;;  %3974 = vst.msk [vmem:[#allocation3 + $0x50] sm:$0xff] %vm1389_vm1, %v3942_v35  ;;  %v3943_v17 = vadd.f32 %v7618_v31, %v3911_v56  ;;  %3189 = vst.msk [vmem:[#allocation3 + $0x78] sm:$0xff] %vm1389_vm1, %v3157_v27  ;;  %v3909_v58 = vld [vmem:[#allocation3 + $0x48] sm:$0xff]  ;;  %v3134_v27 = vld [vmem:[#allocation3 + $0xc0] sm:$0xff] }
 0x25b   : > { %v3821_v29 = vpop.f32.mrb[61].mxu0  ;;  %3972 = vst.msk [vmem:[#allocation3 + $0x40] sm:$0xff] %vm1389_vm1, %v3940_v49  ;;  %v3941_v42 = vadd.f32 %v3909_v58, %v3808_v3  ;;  %3187 = vst.msk [vmem:[#allocation3 + $0x68] sm:$0xff] %vm1389_vm1, %v3155_v55  ;;  %v3137_v55 = vld [vmem:[#allocation3 + $0xd8] sm:$0xff] }
 0x25c   : > { %v7622_v36 = vpop.f32.mrb[62].mxu0  ;;  %3975 = vst.msk [vmem:[#allocation3 + $0x58] sm:$0xff] %vm1389_vm1, %v3943_v17 }
 0x25d   : > { %v3824_v22 = vpop.f32.mrb[63].mxu0  ;;  %3973 = vst.msk [vmem:[#allocation3 + $0x48] sm:$0xff] %vm1389_vm1, %v3941_v42  ;;  %v7591_v32 = vpop.f32.mrb[64].mxu1  ;;  %v3135_v42 = vld [vmem:[#allocation3 + $0xc8] sm:$0xff] }
 0x25e   : > { %v3160_v59 = vadd.f32 %v7591_v32, %v3128_v44  ;;  %v3047_v47 = vpop.f32.mrb[65].mxu1 }
 0x25f   : > { %v3914_v61 = vld [vmem:[#allocation3 + $0x70] sm:$0xff]  ;;  %v3158_v19 = vadd.f32 %v3126_v7, %v3047_v47  ;;  %v7592_v53 = vpop.f32.mrb[66].mxu1 }
 0x260   : > { %v3946_v52 = vadd.f32 %v7621_v40, %v3914_v61  ;;  %3192 = vst.msk [vmem:[#allocation3 + $0x90] sm:$0xff] %vm1389_vm1, %v3160_v59  ;;  %v3912_v46 = vld [vmem:[#allocation3 + $0x60] sm:$0xff]  ;;  %v3161_v16 = vadd.f32 %v7592_v53, %v3129_v26  ;;  %v3050_v33 = vpop.f32.mrb[67].mxu1 }
 0x261   : > { %v3944_v8 = vadd.f32 %v3912_v46, %v3821_v29  ;;  %3190 = vst.msk [vmem:[#allocation3 + $0x80] sm:$0xff] %vm1389_vm1, %v3158_v19  ;;  %v3915_v45 = vld [vmem:[#allocation3 + $0x78] sm:$0xff]  ;;  %v3159_v54 = vadd.f32 %v3127_v18, %v3050_v33 }
 0x262   : > { %v7625_v25 = vpop.f32.mrb[64].mxu0  ;;  %3978 = vst.msk [vmem:[#allocation3 + $0x70] sm:$0xff] %vm1389_vm1, %v3946_v52  ;;  %v3947_v63 = vadd.f32 %v7622_v36, %v3915_v45  ;;  %3193 = vst.msk [vmem:[#allocation3 + $0x98] sm:$0xff] %vm1389_vm1, %v3161_v16  ;;  %v3913_v60 = vld [vmem:[#allocation3 + $0x68] sm:$0xff] }
 0x263   : > { %v3837_v43 = vpop.f32.mrb[65].mxu0  ;;  %3976 = vst.msk [vmem:[#allocation3 + $0x60] sm:$0xff] %vm1389_vm1, %v3944_v8  ;;  %v3945_v62 = vadd.f32 %v3913_v60, %v3824_v22  ;;  %3191 = vst.msk [vmem:[#allocation3 + $0x88] sm:$0xff] %vm1389_vm1, %v3159_v54 }
 0x264   : > { %v7626_v39 = vpop.f32.mrb[66].mxu0  ;;  %3979 = vst.msk [vmem:[#allocation3 + $0x78] sm:$0xff] %vm1389_vm1, %v3947_v63 }
 0x265   : > { %v3840_v12 = vpop.f32.mrb[67].mxu0  ;;  %3977 = vst.msk [vmem:[#allocation3 + $0x68] sm:$0xff] %vm1389_vm1, %v3945_v62  ;;  %v7595_v48 = vpop.f32.mrb[68].mxu1 }
 0x266   : > { %v3164_v15 = vadd.f32 %v7595_v48, %v3132_v57  ;;  %v3063_v51 = vpop.f32.mrb[69].mxu1 }
 0x267   : > { %v3918_v14 = vld [vmem:[#allocation3 + $0x90] sm:$0xff]  ;;  %v3162_v13 = vadd.f32 %v3130_v38, %v3063_v51  ;;  %v7596_v5 = vpop.f32.mrb[70].mxu1 }
 0x268   : > { %v3950_v34 = vadd.f32 %v7625_v25, %v3918_v14  ;;  %3196 = vst.msk [vmem:[#allocation3 + $0xb0] sm:$0xff] %vm1389_vm1, %v3164_v15  ;;  %v3916_v21 = vld [vmem:[#allocation3 + $0x80] sm:$0xff]  ;;  %v3165_v10 = vadd.f32 %v7596_v5, %v3133_v9  ;;  %v3066_v30 = vpop.f32.mrb[71].mxu1  ;;  %v3140_v25 = vld [vmem:[#allocation3 + $0xf0] sm:$0xff]  ;;  %v3139_v15 = vld [vmem:[#allocation3 + $0xe8] sm:$0xff] }
 0x269   : > { %v3948_v31 = vadd.f32 %v3916_v21, %v3837_v43  ;;  %3194 = vst.msk [vmem:[#allocation3 + $0xa0] sm:$0xff] %vm1389_vm1, %v3162_v13  ;;  %v3919_v3 = vld [vmem:[#allocation3 + $0x98] sm:$0xff]  ;;  %v3163_v4 = vadd.f32 %v3131_v11, %v3066_v30  ;;  %v3138_v43 = vld [vmem:[#allocation3 + $0xe0] sm:$0xff]  ;;  %v4468_v14 = vld [vmem:[#allocation3 + $0x10] sm:$0xff] }
 0x26a   : > { %3982 = vst.msk [vmem:[#allocation3 + $0x90] sm:$0xff] %vm1389_vm1, %v3950_v34  ;;  %v3951_v37 = vadd.f32 %v7626_v39, %v3919_v3  ;;  %3197 = vst.msk [vmem:[#allocation3 + $0xb8] sm:$0xff] %vm1389_vm1, %v3165_v10  ;;  %v3917_v41 = vld [vmem:[#allocation3 + $0x88] sm:$0xff]  ;;  %v4466_v9 = vld [vmem:[#allocation3] sm:$0xff] }
 0x26b   : > { %3980 = vst.msk [vmem:[#allocation3 + $0x80] sm:$0xff] %vm1389_vm1, %v3948_v31  ;;  %v3949_v24 = vadd.f32 %v3917_v41, %v3840_v12  ;;  %3195 = vst.msk [vmem:[#allocation3 + $0xa8] sm:$0xff] %vm1389_vm1, %v3163_v4  ;;  %v3141_v12 = vld [vmem:[#allocation3 + $0xf8] sm:$0xff] }
 0x26c   : > { %v7629_v50 = vpop.f32.mrb[68].mxu0  ;;  %3983 = vst.msk [vmem:[#allocation3 + $0x98] sm:$0xff] %vm1389_vm1, %v3951_v37  ;;  %v4469_v11 = vld [vmem:[#allocation3 + $0x18] sm:$0xff] }
 0x26d   : > { %v3853_v1 = vpop.f32.mrb[69].mxu0  ;;  %3981 = vst.msk [vmem:[#allocation3 + $0x88] sm:$0xff] %vm1389_vm1, %v3949_v24  ;;  %v7599_v2 = vpop.f32.mrb[72].mxu1  ;;  %v4467_v24 = vld [vmem:[#allocation3 + $0x8] sm:$0xff] }
 0x26e   : > { %v7630_v28 = vpop.f32.mrb[70].mxu0  ;;  %v3168_v35 = vadd.f32 %v7599_v2, %v3136_v6  ;;  %v3079_v20 = vpop.f32.mrb[73].mxu1 }
 0x26f   : > { %v3856_v23 = vpop.f32.mrb[71].mxu0  ;;  %v3922_v0 = vld [vmem:[#allocation3 + $0xb0] sm:$0xff]  ;;  %v3166_v49 = vadd.f32 %v3134_v27, %v3079_v20  ;;  %v7600_v56 = vpop.f32.mrb[74].mxu1 }
 0x270   : > { %v3954_v40 = vadd.f32 %v7629_v50, %v3922_v0  ;;  %3200 = vst.msk [vmem:[#allocation3 + $0xd0] sm:$0xff] %vm1389_vm1, %v3168_v35  ;;  %v3920_v17 = vld [vmem:[#allocation3 + $0xa0] sm:$0xff]  ;;  %v3169_v58 = vadd.f32 %v7600_v56, %v3137_v55  ;;  %v3082_v29 = vpop.f32.mrb[75].mxu1  ;;  %v4472_v0 = vld [vmem:[#allocation3 + $0x30] sm:$0xff] }
 0x271   : > { %v3952_v36 = vadd.f32 %v3920_v17, %v3853_v1  ;;  %3198 = vst.msk [vmem:[#allocation3 + $0xc0] sm:$0xff] %vm1389_vm1, %v3166_v49  ;;  %v3923_v22 = vld [vmem:[#allocation3 + $0xb8] sm:$0xff]  ;;  %v3167_v32 = vadd.f32 %v3135_v42, %v3082_v29  ;;  %v4470_v55 = vld [vmem:[#allocation3 + $0x20] sm:$0xff] }
 0x272   : > { %3986 = vst.msk [vmem:[#allocation3 + $0xb0] sm:$0xff] %vm1389_vm1, %v3954_v40  ;;  %v3955_v44 = vadd.f32 %v7630_v28, %v3923_v22  ;;  %3201 = vst.msk [vmem:[#allocation3 + $0xd8] sm:$0xff] %vm1389_vm1, %v3169_v58  ;;  %v3921_v59 = vld [vmem:[#allocation3 + $0xa8] sm:$0xff]  ;;  %v4473_v42 = vld [vmem:[#allocation3 + $0x38] sm:$0xff] }
 0x273   : > { %3984 = vst.msk [vmem:[#allocation3 + $0xa0] sm:$0xff] %vm1389_vm1, %v3952_v36  ;;  %v3953_v47 = vadd.f32 %v3921_v59, %v3856_v23  ;;  %3199 = vst.msk [vmem:[#allocation3 + $0xc8] sm:$0xff] %vm1389_vm1, %v3167_v32 }
 0x274   : > { %v7633_v7 = vpop.f32.mrb[72].mxu0  ;;  %3987 = vst.msk [vmem:[#allocation3 + $0xb8] sm:$0xff] %vm1389_vm1, %v3955_v44 }
 0x275   : > { %v3869_v61 = vpop.f32.mrb[73].mxu0  ;;  %3985 = vst.msk [vmem:[#allocation3 + $0xa8] sm:$0xff] %vm1389_vm1, %v3953_v47  ;;  %v4471_v47 = vld [vmem:[#allocation3 + $0x28] sm:$0xff] }
 0x276   : > { %v7634_v19 = vpop.f32.mrb[74].mxu0 }
 0x277   : > { %v3872_v53 = vpop.f32.mrb[75].mxu0  ;;  %v3926_v26 = vld [vmem:[#allocation3 + $0xd0] sm:$0xff] }
 0x278   : > { %v3958_v52 = vadd.f32 %v7633_v7, %v3926_v26  ;;  %v3924_v46 = vld [vmem:[#allocation3 + $0xc0] sm:$0xff] }
 0x279   : > { %v3956_v16 = vadd.f32 %v3924_v46, %v3869_v61  ;;  %v3927_v33 = vld [vmem:[#allocation3 + $0xd8] sm:$0xff] }
 0x27a   : > { %3990 = vst.msk [vmem:[#allocation3 + $0xd0] sm:$0xff] %vm1389_vm1, %v3958_v52  ;;  %v3959_v18 = vadd.f32 %v7634_v19, %v3927_v33  ;;  %v3925_v8 = vld [vmem:[#allocation3 + $0xc8] sm:$0xff] }
 0x27b   : > { %3988 = vst.msk [vmem:[#allocation3 + $0xc0] sm:$0xff] %vm1389_vm1, %v3956_v16  ;;  %v3957_v45 = vadd.f32 %v3925_v8, %v3872_v53 }
 0x27c   : > { %3991 = vst.msk [vmem:[#allocation3 + $0xd8] sm:$0xff] %vm1389_vm1, %v3959_v18  ;;  %v4476_v18 = vld [vmem:[#allocation3 + $0x50] sm:$0xff] }
 0x27d   : > { %3989 = vst.msk [vmem:[#allocation3 + $0xc8] sm:$0xff] %vm1389_vm1, %v3957_v45 }
 0x283   : > { %v7603_v54 = vpop.f32.mrb[76].mxu1 }
 0x284   : > { %v3172_v63 = vadd.f32 %v7603_v54, %v3140_v25  ;;  %v3095_v60 = vpop.f32.mrb[77].mxu1  ;;  %v4474_v54 = vld [vmem:[#allocation3 + $0x40] sm:$0xff] }
 0x285   : > { %v3170_v62 = vadd.f32 %v3138_v43, %v3095_v60  ;;  %v7604_v39 = vpop.f32.mrb[78].mxu1 }
 0x286   : > { %3204 = vst.msk [vmem:[#allocation3 + $0xf0] sm:$0xff] %vm1389_vm1, %v3172_v63  ;;  %v3173_v48 = vadd.f32 %v7604_v39, %v3141_v12  ;;  %v3098_v57 = vpop.f32.mrb[79].mxu1 }
 0x287   : > { %3202 = vst.msk [vmem:[#allocation3 + $0xe0] sm:$0xff] %vm1389_vm1, %v3170_v62  ;;  %v3171_v51 = vadd.f32 %v3139_v15, %v3098_v57  ;;  %v4477_v62 = vld [vmem:[#allocation3 + $0x58] sm:$0xff] }
 0x288   : > { %3205 = vst.msk [vmem:[#allocation3 + $0xf8] sm:$0xff] %vm1389_vm1, %v3173_v48 }
 0x289   : > { %3203 = vst.msk [vmem:[#allocation3 + $0xe8] sm:$0xff] %vm1389_vm1, %v3171_v51  ;;  %v4475_v51 = vld [vmem:[#allocation3 + $0x48] sm:$0xff] }
 0x28b   : > { %v7643_v38 = vpop.f32.mrb[80].mxu1 }
 0x28c   : > { %v4500_v13 = vadd.f32 %v7643_v38, %v4468_v14  ;;  %v4339_v5 = vpop.f32.mrb[81].mxu1 }
 0x28d   : > { %v3930_v21 = vld [vmem:[#allocation3 + $0xf0] sm:$0xff]  ;;  %v4498_v10 = vadd.f32 %v4466_v9, %v4339_v5  ;;  %v7644_v30 = vpop.f32.mrb[82].mxu1 }
 0x28e   : > { %v7637_v34 = vpop.f32.mrb[76].mxu0  ;;  %v3928_v4 = vld [vmem:[#allocation3 + $0xe0] sm:$0xff]  ;;  %4532 = vst.msk [vmem:[#allocation3 + $0x10] sm:$0xff] %vm1389_vm1, %v4500_v13  ;;  %v4501_v37 = vadd.f32 %v7644_v30, %v4469_v11  ;;  %v4342_v41 = vpop.f32.mrb[83].mxu1  ;;  %v4480_v11 = vld [vmem:[#allocation3 + $0x70] sm:$0xff] }
 0x28f   : > { %v3962_v31 = vadd.f32 %v7637_v34, %v3930_v21  ;;  %v3885_v3 = vpop.f32.mrb[77].mxu0  ;;  %v3931_v2 = vld [vmem:[#allocation3 + $0xf8] sm:$0xff]  ;;  %4530 = vst.msk [vmem:[#allocation3] sm:$0xff] %vm1389_vm1, %v4498_v10  ;;  %v4499_v6 = vadd.f32 %v4467_v24, %v4342_v41 }
 0x290   : > { %v3960_v50 = vadd.f32 %v3928_v4, %v3885_v3  ;;  %v7638_v1 = vpop.f32.mrb[78].mxu0  ;;  %v3929_v20 = vld [vmem:[#allocation3 + $0xe8] sm:$0xff]  ;;  %4533 = vst.msk [vmem:[#allocation3 + $0x18] sm:$0xff] %vm1389_vm1, %v4501_v37  ;;  %v4478_v4 = vld [vmem:[#allocation3 + $0x60] sm:$0xff] }
 0x291   : > { %3994 = vst.msk [vmem:[#allocation3 + $0xf0] sm:$0xff] %vm1389_vm1, %v3962_v31  ;;  %v3963_v28 = vadd.f32 %v7638_v1, %v3931_v2  ;;  %v3888_v35 = vpop.f32.mrb[79].mxu0  ;;  %4531 = vst.msk [vmem:[#allocation3 + $0x8] sm:$0xff] %vm1389_vm1, %v4499_v6  ;;  %v4481_v1 = vld [vmem:[#allocation3 + $0x78] sm:$0xff] }
 0x292   : > { %3992 = vst.msk [vmem:[#allocation3 + $0xe0] sm:$0xff] %vm1389_vm1, %v3960_v50  ;;  %v3961_v27 = vadd.f32 %v3929_v20, %v3888_v35 }
 0x293   : > { %3995 = vst.msk [vmem:[#allocation3 + $0xf8] sm:$0xff] %vm1389_vm1, %v3963_v28  ;;  %v7647_v23 = vpop.f32.mrb[84].mxu1 }
 0x294   : > { %3993 = vst.msk [vmem:[#allocation3 + $0xe8] sm:$0xff] %vm1389_vm1, %v3961_v27  ;;  %v4504_v49 = vadd.f32 %v7647_v23, %v4472_v0  ;;  %v4355_v56 = vpop.f32.mrb[85].mxu1  ;;  %v4479_v27 = vld [vmem:[#allocation3 + $0x68] sm:$0xff] }
 0x295   : > { %v4891_v17 = vld [vmem:[#allocation3 + $0x10] sm:$0xff]  ;;  %v4502_v58 = vadd.f32 %v4470_v55, %v4355_v56  ;;  %v7648_v29 = vpop.f32.mrb[86].mxu1 }
 0x296   : > { %v7677_v40 = vpop.f32.mrb[80].mxu0  ;;  %4536 = vst.msk [vmem:[#allocation3 + $0x30] sm:$0xff] %vm1389_vm1, %v4504_v49  ;;  %v4889_v32 = vld [vmem:[#allocation3] sm:$0xff]  ;;  %v4505_v44 = vadd.f32 %v7648_v29, %v4473_v42  ;;  %v4358_v59 = vpop.f32.mrb[87].mxu1  ;;  %v4484_v42 = vld [vmem:[#allocation3 + $0x90] sm:$0xff] }
 0x297   : > { %v4923_v36 = vadd.f32 %v7677_v40, %v4891_v17  ;;  %v4762_v22 = vpop.f32.mrb[81].mxu0  ;;  %4534 = vst.msk [vmem:[#allocation3 + $0x20] sm:$0xff] %vm1389_vm1, %v4502_v58  ;;  %v4892_v19 = vld [vmem:[#allocation3 + $0x18] sm:$0xff]  ;;  %v4503_v53 = vadd.f32 %v4471_v47, %v4358_v59 }
 0x298   : > { %v4921_v7 = vadd.f32 %v4889_v32, %v4762_v22  ;;  %v7678_v61 = vpop.f32.mrb[82].mxu0  ;;  %4537 = vst.msk [vmem:[#allocation3 + $0x38] sm:$0xff] %vm1389_vm1, %v4505_v44  ;;  %v4890_v46 = vld [vmem:[#allocation3 + $0x8] sm:$0xff]  ;;  %v4482_v32 = vld [vmem:[#allocation3 + $0x80] sm:$0xff] }
 0x299   : > { %4955 = vst.msk [vmem:[#allocation3 + $0x10] sm:$0xff] %vm1389_vm1, %v4923_v36  ;;  %v4924_v26 = vadd.f32 %v7678_v61, %v4892_v19  ;;  %v4765_v52 = vpop.f32.mrb[83].mxu0  ;;  %4535 = vst.msk [vmem:[#allocation3 + $0x28] sm:$0xff] %vm1389_vm1, %v4503_v53  ;;  %v4485_v61 = vld [vmem:[#allocation3 + $0x98] sm:$0xff] }
 0x29a   : > { %4953 = vst.msk [vmem:[#allocation3] sm:$0xff] %vm1389_vm1, %v4921_v7  ;;  %v4922_v16 = vadd.f32 %v4890_v46, %v4765_v52 }
 0x29b   : > { %4956 = vst.msk [vmem:[#allocation3 + $0x18] sm:$0xff] %vm1389_vm1, %v4924_v26  ;;  %v7651_v33 = vpop.f32.mrb[88].mxu1 }
 0x29c   : > { %4954 = vst.msk [vmem:[#allocation3 + $0x8] sm:$0xff] %vm1389_vm1, %v4922_v16  ;;  %v4508_v8 = vadd.f32 %v7651_v33, %v4476_v18  ;;  %v4371_v45 = vpop.f32.mrb[89].mxu1  ;;  %v4483_v16 = vld [vmem:[#allocation3 + $0x88] sm:$0xff] }
 0x29d   : > { %v4895_v63 = vld [vmem:[#allocation3 + $0x30] sm:$0xff]  ;;  %v4506_v60 = vadd.f32 %v4474_v54, %v4371_v45  ;;  %v7652_v43 = vpop.f32.mrb[90].mxu1 }
 0x29e   : > { %v7681_v25 = vpop.f32.mrb[84].mxu0  ;;  %4540 = vst.msk [vmem:[#allocation3 + $0x50] sm:$0xff] %vm1389_vm1, %v4508_v8  ;;  %v4893_v48 = vld [vmem:[#allocation3 + $0x20] sm:$0xff]  ;;  %v4509_v57 = vadd.f32 %v7652_v43, %v4477_v62  ;;  %v4374_v15 = vpop.f32.mrb[91].mxu1  ;;  %v4488_v62 = vld [vmem:[#allocation3 + $0xb0] sm:$0xff] }
 0x29f   : > { %v4927_v39 = vadd.f32 %v7681_v25, %v4895_v63  ;;  %v4778_v12 = vpop.f32.mrb[85].mxu0  ;;  %4538 = vst.msk [vmem:[#allocation3 + $0x40] sm:$0xff] %vm1389_vm1, %v4506_v60  ;;  %v4896_v13 = vld [vmem:[#allocation3 + $0x38] sm:$0xff]  ;;  %v4507_v5 = vadd.f32 %v4475_v51, %v4374_v15 }
 0x2a0   : > { %v4925_v38 = vadd.f32 %v4893_v48, %v4778_v12  ;;  %v7682_v14 = vpop.f32.mrb[86].mxu0  ;;  %4541 = vst.msk [vmem:[#allocation3 + $0x58] sm:$0xff] %vm1389_vm1, %v4509_v57  ;;  %v4894_v21 = vld [vmem:[#allocation3 + $0x28] sm:$0xff]  ;;  %v4486_v48 = vld [vmem:[#allocation3 + $0xa0] sm:$0xff] }
 0x2a1   : > { %4959 = vst.msk [vmem:[#allocation3 + $0x30] sm:$0xff] %vm1389_vm1, %v4927_v39  ;;  %v4928_v9 = vadd.f32 %v7682_v14, %v4896_v13  ;;  %v4781_v34 = vpop.f32.mrb[87].mxu0  ;;  %4539 = vst.msk [vmem:[#allocation3 + $0x48] sm:$0xff] %vm1389_vm1, %v4507_v5  ;;  %v4489_v14 = vld [vmem:[#allocation3 + $0xb8] sm:$0xff] }
 0x2a2   : > { %4957 = vst.msk [vmem:[#allocation3 + $0x20] sm:$0xff] %vm1389_vm1, %v4925_v38  ;;  %v4926_v10 = vadd.f32 %v4894_v21, %v4781_v34 }
 0x2a3   : > { %4960 = vst.msk [vmem:[#allocation3 + $0x38] sm:$0xff] %vm1389_vm1, %v4928_v9  ;;  %v7655_v30 = vpop.f32.mrb[92].mxu1 }
 0x2a4   : > { %4958 = vst.msk [vmem:[#allocation3 + $0x28] sm:$0xff] %vm1389_vm1, %v4926_v10  ;;  %v4512_v31 = vadd.f32 %v7655_v30, %v4480_v11  ;;  %v4387_v3 = vpop.f32.mrb[93].mxu1  ;;  %v4487_v10 = vld [vmem:[#allocation3 + $0xa8] sm:$0xff] }
 0x2a5   : > { %v4899_v41 = vld [vmem:[#allocation3 + $0x50] sm:$0xff]  ;;  %v4510_v24 = vadd.f32 %v4478_v4, %v4387_v3  ;;  %v7656_v50 = vpop.f32.mrb[94].mxu1 }
 0x2a6   : > { %v7685_v37 = vpop.f32.mrb[88].mxu0  ;;  %4544 = vst.msk [vmem:[#allocation3 + $0x70] sm:$0xff] %vm1389_vm1, %v4512_v31  ;;  %v4897_v28 = vld [vmem:[#allocation3 + $0x40] sm:$0xff]  ;;  %v4513_v35 = vadd.f32 %v7656_v50, %v4481_v1  ;;  %v4390_v20 = vpop.f32.mrb[95].mxu1  ;;  %v4492_v1 = vld [vmem:[#allocation3 + $0xd0] sm:$0xff] }
 0x2a7   : > { %v4931_v2 = vadd.f32 %v7685_v37, %v4899_v41  ;;  %v4794_v6 = vpop.f32.mrb[89].mxu0  ;;  %4542 = vst.msk [vmem:[#allocation3 + $0x60] sm:$0xff] %vm1389_vm1, %v4510_v24  ;;  %v4900_v49 = vld [vmem:[#allocation3 + $0x58] sm:$0xff]  ;;  %v4511_v56 = vadd.f32 %v4479_v27, %v4390_v20 }
 0x2a8   : > { %v4929_v23 = vadd.f32 %v4897_v28, %v4794_v6  ;;  %v7686_v0 = vpop.f32.mrb[90].mxu0  ;;  %4545 = vst.msk [vmem:[#allocation3 + $0x78] sm:$0xff] %vm1389_vm1, %v4513_v35  ;;  %v4898_v17 = vld [vmem:[#allocation3 + $0x48] sm:$0xff]  ;;  %v4490_v28 = vld [vmem:[#allocation3 + $0xc0] sm:$0xff] }
 0x2a9   : > { %4963 = vst.msk [vmem:[#allocation3 + $0x50] sm:$0xff] %vm1389_vm1, %v4931_v2  ;;  %v4932_v55 = vadd.f32 %v7686_v0, %v4900_v49  ;;  %v4797_v40 = vpop.f32.mrb[91].mxu0  ;;  %4543 = vst.msk [vmem:[#allocation3 + $0x68] sm:$0xff] %vm1389_vm1, %v4511_v56  ;;  %v4493_v0 = vld [vmem:[#allocation3 + $0xd8] sm:$0xff] }
 0x2aa   : > { %4961 = vst.msk [vmem:[#allocation3 + $0x40] sm:$0xff] %vm1389_vm1, %v4929_v23  ;;  %v4930_v58 = vadd.f32 %v4898_v17, %v4797_v40 }
 0x2ab   : > { %4964 = vst.msk [vmem:[#allocation3 + $0x58] sm:$0xff] %vm1389_vm1, %v4932_v55  ;;  %v7659_v29 = vpop.f32.mrb[96].mxu1 }
 0x2ac   : > { %4962 = vst.msk [vmem:[#allocation3 + $0x48] sm:$0xff] %vm1389_vm1, %v4930_v58  ;;  %v4516_v36 = vadd.f32 %v7659_v29, %v4484_v42  ;;  %v4403_v22 = vpop.f32.mrb[97].mxu1  ;;  %v4491_v58 = vld [vmem:[#allocation3 + $0xc8] sm:$0xff] }
 0x2ad   : > { %v4903_v59 = vld [vmem:[#allocation3 + $0x70] sm:$0xff]  ;;  %v4514_v47 = vadd.f32 %v4482_v32, %v4403_v22  ;;  %v7660_v7 = vpop.f32.mrb[98].mxu1 }
 0x2ae   : > { %v7689_v44 = vpop.f32.mrb[92].mxu0  ;;  %4548 = vst.msk [vmem:[#allocation3 + $0x90] sm:$0xff] %vm1389_vm1, %v4516_v36  ;;  %v4901_v26 = vld [vmem:[#allocation3 + $0x60] sm:$0xff]  ;;  %v4517_v52 = vadd.f32 %v7660_v7, %v4485_v61  ;;  %v4406_v46 = vpop.f32.mrb[99].mxu1  ;;  %v4496_v61 = vld [vmem:[#allocation3 + $0xf0] sm:$0xff] }
 0x2af   : > { %v4935_v19 = vadd.f32 %v7689_v44, %v4903_v59  ;;  %v4810_v53 = vpop.f32.mrb[93].mxu0  ;;  %4546 = vst.msk [vmem:[#allocation3 + $0x80] sm:$0xff] %vm1389_vm1, %v4514_v47  ;;  %v4904_v8 = vld [vmem:[#allocation3 + $0x78] sm:$0xff]  ;;  %v4515_v45 = vadd.f32 %v4483_v16, %v4406_v46 }
 0x2b0   : > { %v4933_v33 = vadd.f32 %v4901_v26, %v4810_v53  ;;  %v7690_v18 = vpop.f32.mrb[94].mxu0  ;;  %4549 = vst.msk [vmem:[#allocation3 + $0x98] sm:$0xff] %vm1389_vm1, %v4517_v52  ;;  %v4902_v63 = vld [vmem:[#allocation3 + $0x68] sm:$0xff]  ;;  %v4494_v26 = vld [vmem:[#allocation3 + $0xe0] sm:$0xff] }
 0x2b1   : > { %4967 = vst.msk [vmem:[#allocation3 + $0x70] sm:$0xff] %vm1389_vm1, %v4935_v19  ;;  %v4936_v54 = vadd.f32 %v7690_v18, %v4904_v8  ;;  %v4813_v25 = vpop.f32.mrb[95].mxu0  ;;  %4547 = vst.msk [vmem:[#allocation3 + $0x88] sm:$0xff] %vm1389_vm1, %v4515_v45  ;;  %v4497_v18 = vld [vmem:[#allocation3 + $0xf8] sm:$0xff] }
 0x2b2   : > { %4965 = vst.msk [vmem:[#allocation3 + $0x60] sm:$0xff] %vm1389_vm1, %v4933_v33  ;;  %v4934_v60 = vadd.f32 %v4902_v63, %v4813_v25 }
 0x2b3   : > { %4968 = vst.msk [vmem:[#allocation3 + $0x78] sm:$0xff] %vm1389_vm1, %v4936_v54  ;;  %v7663_v43 = vpop.f32.mrb[100].mxu1 }
 0x2b4   : > { %4966 = vst.msk [vmem:[#allocation3 + $0x68] sm:$0xff] %vm1389_vm1, %v4934_v60  ;;  %v4520_v39 = vadd.f32 %v7663_v43, %v4488_v62  ;;  %v4419_v12 = vpop.f32.mrb[101].mxu1  ;;  %v4495_v60 = vld [vmem:[#allocation3 + $0xe8] sm:$0xff] }
 0x2b5   : > { %v4907_v15 = vld [vmem:[#allocation3 + $0x90] sm:$0xff]  ;;  %v4518_v51 = vadd.f32 %v4486_v48, %v4419_v12  ;;  %v7664_v38 = vpop.f32.mrb[102].mxu1 }
 0x2b6   : > { %v7693_v57 = vpop.f32.mrb[96].mxu0  ;;  %4552 = vst.msk [vmem:[#allocation3 + $0xb0] sm:$0xff] %vm1389_vm1, %v4520_v39  ;;  %v4905_v9 = vld [vmem:[#allocation3 + $0x80] sm:$0xff]  ;;  %v4521_v34 = vadd.f32 %v7664_v38, %v4489_v14  ;;  %v4422_v21 = vpop.f32.mrb[103].mxu1  ;;  %v5681_v14 = vld [vmem:[#allocation3 + $0x10] sm:$0xff] }
 0x2b7   : > { %v4939_v13 = vadd.f32 %v7693_v57, %v4907_v15  ;;  %v4826_v5 = vpop.f32.mrb[97].mxu0  ;;  %4550 = vst.msk [vmem:[#allocation3 + $0xa0] sm:$0xff] %vm1389_vm1, %v4518_v51  ;;  %v4908_v31 = vld [vmem:[#allocation3 + $0x98] sm:$0xff]  ;;  %v4519_v3 = vadd.f32 %v4487_v10, %v4422_v21 }
 0x2b8   : > { %v4937_v30 = vadd.f32 %v4905_v9, %v4826_v5  ;;  %v7694_v11 = vpop.f32.mrb[98].mxu0  ;;  %4553 = vst.msk [vmem:[#allocation3 + $0xb8] sm:$0xff] %vm1389_vm1, %v4521_v34  ;;  %v4906_v41 = vld [vmem:[#allocation3 + $0x88] sm:$0xff]  ;;  %v5679_v9 = vld [vmem:[#allocation3] sm:$0xff] }
 0x2b9   : > { %4971 = vst.msk [vmem:[#allocation3 + $0x90] sm:$0xff] %vm1389_vm1, %v4939_v13  ;;  %v4940_v4 = vadd.f32 %v7694_v11, %v4908_v31  ;;  %v4829_v37 = vpop.f32.mrb[99].mxu0  ;;  %4551 = vst.msk [vmem:[#allocation3 + $0xa8] sm:$0xff] %vm1389_vm1, %v4519_v3  ;;  %v5682_v11 = vld [vmem:[#allocation3 + $0x18] sm:$0xff] }
 0x2ba   : > { %4969 = vst.msk [vmem:[#allocation3 + $0x80] sm:$0xff] %vm1389_vm1, %v4937_v30  ;;  %v4938_v24 = vadd.f32 %v4906_v41, %v4829_v37 }
 0x2bb   : > { %4972 = vst.msk [vmem:[#allocation3 + $0x98] sm:$0xff] %vm1389_vm1, %v4940_v4  ;;  %v7667_v50 = vpop.f32.mrb[104].mxu1 }
 0x2bc   : > { %4970 = vst.msk [vmem:[#allocation3 + $0x88] sm:$0xff] %vm1389_vm1, %v4938_v24  ;;  %v4524_v2 = vadd.f32 %v7667_v50, %v4492_v1  ;;  %v4435_v6 = vpop.f32.mrb[105].mxu1  ;;  %v5680_v24 = vld [vmem:[#allocation3 + $0x8] sm:$0xff] }
 0x2bd   : > { %v4911_v20 = vld [vmem:[#allocation3 + $0xb0] sm:$0xff]  ;;  %v4522_v27 = vadd.f32 %v4490_v28, %v4435_v6  ;;  %v7668_v23 = vpop.f32.mrb[106].mxu1 }
 0x2be   : > { %v7697_v35 = vpop.f32.mrb[100].mxu0  ;;  %4556 = vst.msk [vmem:[#allocation3 + $0xd0] sm:$0xff] %vm1389_vm1, %v4524_v2  ;;  %v4909_v55 = vld [vmem:[#allocation3 + $0xa0] sm:$0xff]  ;;  %v4525_v40 = vadd.f32 %v7668_v23, %v4493_v0  ;;  %v4438_v17 = vpop.f32.mrb[107].mxu1  ;;  %v5685_v0 = vld [vmem:[#allocation3 + $0x30] sm:$0xff] }
 0x2bf   : > { %v4943_v49 = vadd.f32 %v7697_v35, %v4911_v20  ;;  %v4842_v56 = vpop.f32.mrb[101].mxu0  ;;  %4554 = vst.msk [vmem:[#allocation3 + $0xc0] sm:$0xff] %vm1389_vm1, %v4522_v27  ;;  %v4912_v36 = vld [vmem:[#allocation3 + $0xb8] sm:$0xff]  ;;  %v4523_v22 = vadd.f32 %v4491_v58, %v4438_v17 }
 0x2c0   : > { %v4941_v29 = vadd.f32 %v4909_v55, %v4842_v56  ;;  %v7698_v42 = vpop.f32.mrb[102].mxu0  ;;  %4557 = vst.msk [vmem:[#allocation3 + $0xd8] sm:$0xff] %vm1389_vm1, %v4525_v40  ;;  %v4910_v59 = vld [vmem:[#allocation3 + $0xa8] sm:$0xff]  ;;  %v5683_v55 = vld [vmem:[#allocation3 + $0x20] sm:$0xff] }
 0x2c1   : > { %4975 = vst.msk [vmem:[#allocation3 + $0xb0] sm:$0xff] %vm1389_vm1, %v4943_v49  ;;  %v4944_v32 = vadd.f32 %v7698_v42, %v4912_v36  ;;  %v4845_v44 = vpop.f32.mrb[103].mxu0  ;;  %4555 = vst.msk [vmem:[#allocation3 + $0xc8] sm:$0xff] %vm1389_vm1, %v4523_v22  ;;  %v5686_v42 = vld [vmem:[#allocation3 + $0x38] sm:$0xff] }
 0x2c2   : > { %4973 = vst.msk [vmem:[#allocation3 + $0xa0] sm:$0xff] %vm1389_vm1, %v4941_v29  ;;  %v4942_v47 = vadd.f32 %v4910_v59, %v4845_v44 }
 0x2c3   : > { %4976 = vst.msk [vmem:[#allocation3 + $0xb8] sm:$0xff] %vm1389_vm1, %v4944_v32  ;;  %v7671_v7 = vpop.f32.mrb[108].mxu1 }
 0x2c4   : > { %4974 = vst.msk [vmem:[#allocation3 + $0xa8] sm:$0xff] %vm1389_vm1, %v4942_v47  ;;  %v4528_v19 = vadd.f32 %v7671_v7, %v4496_v61  ;;  %v4451_v53 = vpop.f32.mrb[109].mxu1  ;;  %v5684_v47 = vld [vmem:[#allocation3 + $0x28] sm:$0xff] }
 0x2c5   : > { %v4915_v46 = vld [vmem:[#allocation3 + $0xd0] sm:$0xff]  ;;  %v4526_v16 = vadd.f32 %v4494_v26, %v4451_v53  ;;  %v7672_v33 = vpop.f32.mrb[110].mxu1 }
 0x2c6   : > { %v7701_v52 = vpop.f32.mrb[104].mxu0  ;;  %4560 = vst.msk [vmem:[#allocation3 + $0xf0] sm:$0xff] %vm1389_vm1, %v4528_v19  ;;  %v4913_v54 = vld [vmem:[#allocation3 + $0xc0] sm:$0xff]  ;;  %v4529_v25 = vadd.f32 %v7672_v33, %v4497_v18  ;;  %v4454_v63 = vpop.f32.mrb[111].mxu1  ;;  %v5689_v18 = vld [vmem:[#allocation3 + $0x50] sm:$0xff] }
 0x2c7   : > { %v4947_v8 = vadd.f32 %v7701_v52, %v4915_v46  ;;  %v4858_v45 = vpop.f32.mrb[105].mxu0  ;;  %4558 = vst.msk [vmem:[#allocation3 + $0xe0] sm:$0xff] %vm1389_vm1, %v4526_v16  ;;  %v4916_v39 = vld [vmem:[#allocation3 + $0xd8] sm:$0xff]  ;;  %v4527_v12 = vadd.f32 %v4495_v60, %v4454_v63 }
 0x2c8   : > { %v4945_v43 = vadd.f32 %v4913_v54, %v4858_v45  ;;  %v7702_v62 = vpop.f32.mrb[106].mxu0  ;;  %4561 = vst.msk [vmem:[#allocation3 + $0xf8] sm:$0xff] %vm1389_vm1, %v4529_v25  ;;  %v4914_v15 = vld [vmem:[#allocation3 + $0xc8] sm:$0xff]  ;;  %v5687_v54 = vld [vmem:[#allocation3 + $0x40] sm:$0xff]  ;;  %v10179_v25 = vld [vmem:[#allocation12] ss:$0 sm:$0xff] }
 0x2c9   : > { %4979 = vst.msk [vmem:[#allocation3 + $0xd0] sm:$0xff] %vm1389_vm1, %v4947_v8  ;;  %v4948_v48 = vadd.f32 %v7702_v62, %v4916_v39  ;;  %v4861_v57 = vpop.f32.mrb[107].mxu0  ;;  %4559 = vst.msk [vmem:[#allocation3 + $0xe8] sm:$0xff] %vm1389_vm1, %v4527_v12  ;;  %v5690_v39 = vld [vmem:[#allocation3 + $0x58] sm:$0xff] }
 0x2ca   : > { %4977 = vst.msk [vmem:[#allocation3 + $0xc0] sm:$0xff] %vm1389_vm1, %v4945_v43  ;;  %v4946_v51 = vadd.f32 %v4914_v15, %v4861_v57 }
 0x2cb   : > { %4980 = vst.msk [vmem:[#allocation3 + $0xd8] sm:$0xff] %vm1389_vm1, %v4948_v48  ;;  %v7711_v38 = vpop.f32.mrb[112].mxu1 }
 0x2cc   : > { %4978 = vst.msk [vmem:[#allocation3 + $0xc8] sm:$0xff] %vm1389_vm1, %v4946_v51  ;;  %v5713_v13 = vadd.f32 %v7711_v38, %v5681_v14  ;;  %v5552_v5 = vpop.f32.mrb[113].mxu1  ;;  %v5688_v38 = vld [vmem:[#allocation3 + $0x48] sm:$0xff] }
 0x2cd   : > { %v4919_v21 = vld [vmem:[#allocation3 + $0xf0] sm:$0xff]  ;;  %v5711_v10 = vadd.f32 %v5679_v9, %v5552_v5  ;;  %v7712_v30 = vpop.f32.mrb[114].mxu1 }
 0x2ce   : > { %v7705_v34 = vpop.f32.mrb[108].mxu0  ;;  %v4917_v4 = vld [vmem:[#allocation3 + $0xe0] sm:$0xff]  ;;  %5745 = vst.msk [vmem:[#allocation3 + $0x10] sm:$0xff] %vm1389_vm1, %v5713_v13  ;;  %v5714_v37 = vadd.f32 %v7712_v30, %v5682_v11  ;;  %v5555_v41 = vpop.f32.mrb[115].mxu1 }
 0x2cf   : > { %v4951_v31 = vadd.f32 %v7705_v34, %v4919_v21  ;;  %v4874_v3 = vpop.f32.mrb[109].mxu0  ;;  %v4920_v2 = vld [vmem:[#allocation3 + $0xf8] sm:$0xff]  ;;  %5743 = vst.msk [vmem:[#allocation3] sm:$0xff] %vm1389_vm1, %v5711_v10  ;;  %v5712_v6 = vadd.f32 %v5680_v24, %v5555_v41 }
 0x2d0   : > { %v4949_v50 = vadd.f32 %v4917_v4, %v4874_v3  ;;  %v7706_v1 = vpop.f32.mrb[110].mxu0  ;;  %v4918_v20 = vld [vmem:[#allocation3 + $0xe8] sm:$0xff]  ;;  %5746 = vst.msk [vmem:[#allocation3 + $0x18] sm:$0xff] %vm1389_vm1, %v5714_v37 }
 0x2d1   : > { %4983 = vst.msk [vmem:[#allocation3 + $0xf0] sm:$0xff] %vm1389_vm1, %v4951_v31  ;;  %v4952_v28 = vadd.f32 %v7706_v1, %v4920_v2  ;;  %v4877_v35 = vpop.f32.mrb[111].mxu0  ;;  %5744 = vst.msk [vmem:[#allocation3 + $0x8] sm:$0xff] %vm1389_vm1, %v5712_v6 }
 0x2d2   : > { %4981 = vst.msk [vmem:[#allocation3 + $0xe0] sm:$0xff] %vm1389_vm1, %v4949_v50  ;;  %v4950_v27 = vadd.f32 %v4918_v20, %v4877_v35 }
 0x2d3   : > { %4984 = vst.msk [vmem:[#allocation3 + $0xf8] sm:$0xff] %vm1389_vm1, %v4952_v28  ;;  %v7715_v23 = vpop.f32.mrb[116].mxu1  ;;  %v5693_v28 = vld [vmem:[#allocation3 + $0x70] sm:$0xff] }
 0x2d4   : > { %4982 = vst.msk [vmem:[#allocation3 + $0xe8] sm:$0xff] %vm1389_vm1, %v4950_v27  ;;  %v5717_v49 = vadd.f32 %v7715_v23, %v5685_v0  ;;  %v5568_v56 = vpop.f32.mrb[117].mxu1  ;;  %v5691_v0 = vld [vmem:[#allocation3 + $0x60] sm:$0xff] }
 0x2d5   : > { %v6247_v17 = vld [vmem:[#allocation3 + $0x10] sm:$0xff]  ;;  %v5715_v58 = vadd.f32 %v5683_v55, %v5568_v56  ;;  %v7716_v29 = vpop.f32.mrb[118].mxu1 }
 0x2d6   : > { %v7745_v40 = vpop.f32.mrb[112].mxu0  ;;  %5749 = vst.msk [vmem:[#allocation3 + $0x30] sm:$0xff] %vm1389_vm1, %v5717_v49  ;;  %v6245_v32 = vld [vmem:[#allocation3] sm:$0xff]  ;;  %v5718_v44 = vadd.f32 %v7716_v29, %v5686_v42  ;;  %v5571_v59 = vpop.f32.mrb[119].mxu1  ;;  %v5694_v29 = vld [vmem:[#allocation3 + $0x78] sm:$0xff] }
 0x2d7   : > { %v6279_v36 = vadd.f32 %v7745_v40, %v6247_v17  ;;  %v6118_v22 = vpop.f32.mrb[113].mxu0  ;;  %5747 = vst.msk [vmem:[#allocation3 + $0x20] sm:$0xff] %vm1389_vm1, %v5715_v58  ;;  %v6248_v19 = vld [vmem:[#allocation3 + $0x18] sm:$0xff]  ;;  %v5716_v53 = vadd.f32 %v5684_v47, %v5571_v59  ;;  %v5692_v47 = vld [vmem:[#allocation3 + $0x68] sm:$0xff] }
 0x2d8   : > { %v6277_v7 = vadd.f32 %v6245_v32, %v6118_v22  ;;  %v7746_v61 = vpop.f32.mrb[114].mxu0  ;;  %5750 = vst.msk [vmem:[#allocation3 + $0x38] sm:$0xff] %vm1389_vm1, %v5718_v44  ;;  %v6246_v46 = vld [vmem:[#allocation3 + $0x8] sm:$0xff] }
 0x2d9   : > { %6311 = vst.msk [vmem:[#allocation3 + $0x10] sm:$0xff] %vm1389_vm1, %v6279_v36  ;;  %v6280_v26 = vadd.f32 %v7746_v61, %v6248_v19  ;;  %v6121_v52 = vpop.f32.mrb[115].mxu0  ;;  %5748 = vst.msk [vmem:[#allocation3 + $0x28] sm:$0xff] %vm1389_vm1, %v5716_v53 }
 0x2da   : > { %6309 = vst.msk [vmem:[#allocation3] sm:$0xff] %vm1389_vm1, %v6277_v7  ;;  %v6278_v16 = vadd.f32 %v6246_v46, %v6121_v52 }
 0x2db   : > { %6312 = vst.msk [vmem:[#allocation3 + $0x18] sm:$0xff] %vm1389_vm1, %v6280_v26  ;;  %v7719_v33 = vpop.f32.mrb[120].mxu1 }
 0x2dc   : > { %6310 = vst.msk [vmem:[#allocation3 + $0x8] sm:$0xff] %vm1389_vm1, %v6278_v16  ;;  %v5721_v8 = vadd.f32 %v7719_v33, %v5689_v18  ;;  %v5584_v45 = vpop.f32.mrb[121].mxu1 }
 0x2dd   : > { %v6251_v60 = vld [vmem:[#allocation3 + $0x30] sm:$0xff]  ;;  %v5719_v43 = vadd.f32 %v5687_v54, %v5584_v45  ;;  %v7720_v62 = vpop.f32.mrb[122].mxu1 }
 0x2de   : > { %v7749_v63 = vpop.f32.mrb[116].mxu0  ;;  %5753 = vst.msk [vmem:[#allocation3 + $0x50] sm:$0xff] %vm1389_vm1, %v5721_v8  ;;  %v6249_v57 = vld [vmem:[#allocation3 + $0x20] sm:$0xff]  ;;  %v5722_v15 = vadd.f32 %v7720_v62, %v5690_v39  ;;  %v5587_v51 = vpop.f32.mrb[123].mxu1 }
 0x2df   : > { %v6283_v12 = vadd.f32 %v7749_v63, %v6251_v60  ;;  %v6134_v48 = vpop.f32.mrb[117].mxu0  ;;  %5751 = vst.msk [vmem:[#allocation3 + $0x40] sm:$0xff] %vm1389_vm1, %v5719_v43  ;;  %v6252_v9 = vld [vmem:[#allocation3 + $0x38] sm:$0xff]  ;;  %v5720_v34 = vadd.f32 %v5688_v38, %v5587_v51 }
 0x2e0   : > { %v6343_v14 = vld [vmem:[#allocation3 + $0x10] sm:$0xff]  ;;  %v6281_v13 = vadd.f32 %v6249_v57, %v6134_v48  ;;  %v7750_v5 = vpop.f32.mrb[118].mxu0  ;;  %5754 = vst.msk [vmem:[#allocation3 + $0x58] sm:$0xff] %vm1389_vm1, %v5722_v15  ;;  %v6250_v31 = vld [vmem:[#allocation3 + $0x28] sm:$0xff] }
 0x2e1   : > { %v6382_v21 = vadd.f32 %v10179_v25, %v6343_v14  ;;  %v6341_v10 = vld [vmem:[#allocation3] sm:$0xff]  ;;  %6315 = vst.msk [vmem:[#allocation3 + $0x30] sm:$0xff] %vm1389_vm1, %v6283_v12  ;;  %v6284_v30 = vadd.f32 %v7750_v5, %v6252_v9  ;;  %v6137_v11 = vpop.f32.mrb[119].mxu0  ;;  %5752 = vst.msk [vmem:[#allocation3 + $0x48] sm:$0xff] %vm1389_vm1, %v5720_v34  ;;  %v5697_v57 = vld [vmem:[#allocation3 + $0x90] sm:$0xff] }
 0x2e2   : > { %v6380_v3 = vadd.f32 %v10179_v25, %v6341_v10  ;;  %v6344_v4 = vld [vmem:[#allocation3 + $0x18] sm:$0xff]  ;;  %6313 = vst.msk [vmem:[#allocation3 + $0x20] sm:$0xff] %vm1389_vm1, %v6281_v13  ;;  %v6282_v37 = vadd.f32 %v6250_v31, %v6137_v11  ;;  %v5695_v13 = vld [vmem:[#allocation3 + $0x80] sm:$0xff] }
 0x2e3   : > { %v6414_v41 = vmax.f32 %v6382_v21, 0.0  ;;  %v6383_v24 = vadd.f32 %v10179_v25, %v6344_v4  ;;  %v6342_v50 = vld [vmem:[#allocation3 + $0x8] sm:$0xff]  ;;  %6316 = vst.msk [vmem:[#allocation3 + $0x38] sm:$0xff] %vm1389_vm1, %v6284_v30  ;;  %v7723_v6 = vpop.f32.mrb[124].mxu1  ;;  %v5698_v11 = vld [vmem:[#allocation3 + $0x98] sm:$0xff] }
 0x2e4   : > { %v6412_v1 = vmax.f32 %v6380_v3, 0.0  ;;  %v6381_v2 = vadd.f32 %v10179_v25, %v6342_v50  ;;  %6314 = vst.msk [vmem:[#allocation3 + $0x28] sm:$0xff] %vm1389_vm1, %v6282_v37  ;;  %v5725_v27 = vadd.f32 %v7723_v6, %v5693_v28  ;;  %v5600_v23 = vpop.f32.mrb[125].mxu1  ;;  %v5696_v50 = vld [vmem:[#allocation3 + $0x88] sm:$0xff] }
 0x2e5   : > { %v7206_v35 = vpack.c.bf16 %v6414_v41, %v6414_v41  ;;  %v6415_v20 = vmax.f32 %v6383_v24, 0.0  ;;  %v6255_v40 = vld [vmem:[#allocation3 + $0x50] sm:$0xff]  ;;  %v5723_v17 = vadd.f32 %v5691_v0, %v5600_v23  ;;  %v7724_v58 = vpop.f32.mrb[126].mxu1 }
 0x2e6   : > { %v7204_v49 = vpack.c.bf16 %v6412_v1, %v6412_v1  ;;  %v6413_v56 = vmax.f32 %v6381_v2, 0.0  ;;  %5757 = vst.msk [vmem:[#allocation3 + $0x70] sm:$0xff] %vm1389_vm1, %v5725_v27  ;;  %v6253_v32 = vld [vmem:[#allocation3 + $0x40] sm:$0xff]  ;;  %v5726_v44 = vadd.f32 %v7724_v58, %v5694_v29  ;;  %v5603_v59 = vpop.f32.mrb[127].mxu1 }
 0x2e7   : > { %6575 = vst.msk [vmem:[%s10195_s26 + $0x8] sm:$0xf] %vm6572_vm2, %v7206_v35  ;;  %v7207_v42 = vpack.c.bf16 %v6415_v20, %v6415_v20  ;;  %v6256_v26 = vld [vmem:[#allocation3 + $0x58] sm:$0xff]  ;;  %v5724_v52 = vadd.f32 %v5692_v47, %v5603_v59 }
 0x2e8   : > { %6573 = vst.msk [vmem:[%s10195_s26] sm:$0xf] %vm6572_vm2, %v7204_v49  ;;  %v7205_v7 = vpack.c.bf16 %v6413_v56, %v6413_v56  ;;  %v6347_v61 = vld [vmem:[#allocation3 + $0x30] sm:$0xff]  ;;  %v6254_v8 = vld [vmem:[#allocation3 + $0x48] sm:$0xff] }
 0x2e9   : > { %v7753_v55 = vpop.f32.mrb[120].mxu0  ;;  %5755 = vst.msk [vmem:[#allocation3 + $0x60] sm:$0xff] %vm1389_vm1, %v5723_v17  ;;  %v6386_v46 = vadd.f32 %v10179_v25, %v6347_v61  ;;  %v6345_v16 = vld [vmem:[#allocation3 + $0x20] sm:$0xff]  ;;  %5758 = vst.msk [vmem:[#allocation3 + $0x78] sm:$0xff] %vm1389_vm1, %v5726_v44  ;;  %v5701_v44 = vld [vmem:[#allocation3 + $0xb0] sm:$0xff] }
 0x2ea   : > { %v6287_v36 = vadd.f32 %v7753_v55, %v6255_v40  ;;  %v6150_v22 = vpop.f32.mrb[121].mxu0  ;;  %6576 = vst.msk [vmem:[%s10195_s26 + $0xc] sm:$0xf] %vm6572_vm2, %v7207_v42  ;;  %6574 = vst.msk [vmem:[%s10195_s26 + $0x4] sm:$0xf] %vm6572_vm2, %v7205_v7  ;;  %v6384_v45 = vadd.f32 %v10179_v25, %v6345_v16  ;;  %v6348_v54 = vld [vmem:[#allocation3 + $0x38] sm:$0xff] }
 0x2eb   : > { %v6285_v19 = vadd.f32 %v6253_v32, %v6150_v22  ;;  %v7754_v53 = vpop.f32.mrb[122].mxu0  ;;  %5756 = vst.msk [vmem:[#allocation3 + $0x68] sm:$0xff] %vm1389_vm1, %v5724_v52  ;;  %v6418_v60 = vmax.f32 %v6386_v46, 0.0  ;;  %v6387_v43 = vadd.f32 %v10179_v25, %v6348_v54  ;;  %v6346_v62 = vld [vmem:[#allocation3 + $0x28] sm:$0xff]  ;;  %v7727_v48 = vpop.f32.mrb[128].mxu1 }
 0x2ec   : > { %6319 = vst.msk [vmem:[#allocation3 + $0x50] sm:$0xff] %vm1389_vm1, %v6287_v36  ;;  %v6288_v33 = vadd.f32 %v7754_v53, %v6256_v26  ;;  %v6153_v18 = vpop.f32.mrb[123].mxu0  ;;  %v6416_v39 = vmax.f32 %v6384_v45, 0.0  ;;  %v6385_v12 = vadd.f32 %v10179_v25, %v6346_v62  ;;  %v5729_v38 = vadd.f32 %v7727_v48, %v5697_v57  ;;  %v5616_v14 = vpop.f32.mrb[129].mxu1  ;;  %v5700_v62 = vld [vmem:[#allocation3 + $0xa8] sm:$0xff] }
 0x2ed   : > { %6317 = vst.msk [vmem:[#allocation3 + $0x40] sm:$0xff] %vm1389_vm1, %v6285_v19  ;;  %v6286_v63 = vadd.f32 %v6254_v8, %v6153_v18  ;;  %v7210_v15 = vpack.c.bf16 %v6418_v60, %v6418_v60  ;;  %v6419_v51 = vmax.f32 %v6387_v43, 0.0  ;;  %v6259_v21 = vld [vmem:[#allocation3 + $0x70] sm:$0xff]  ;;  %v5727_v10 = vadd.f32 %v5695_v13, %v5616_v14  ;;  %v7728_v30 = vpop.f32.mrb[130].mxu1  ;;  %v5699_v19 = vld [vmem:[#allocation3 + $0xa0] sm:$0xff]  ;;  %v5702_v18 = vld [vmem:[#allocation3 + $0xb8] sm:$0xff] }
 0x2ee   : > { %6320 = vst.msk [vmem:[#allocation3 + $0x58] sm:$0xff] %vm1389_vm1, %v6288_v33  ;;  %v7208_v5 = vpack.c.bf16 %v6416_v39, %v6416_v39  ;;  %v6417_v9 = vmax.f32 %v6385_v12, 0.0  ;;  %5761 = vst.msk [vmem:[#allocation3 + $0x90] sm:$0xff] %vm1389_vm1, %v5729_v38  ;;  %v5730_v41 = vadd.f32 %v7728_v30, %v5698_v11  ;;  %v5619_v24 = vpop.f32.mrb[131].mxu1 }
 0x2ef   : > { %6318 = vst.msk [vmem:[#allocation3 + $0x48] sm:$0xff] %vm1389_vm1, %v6286_v63  ;;  %v7211_v31 = vpack.c.bf16 %v6419_v51, %v6419_v51  ;;  %5759 = vst.msk [vmem:[#allocation3 + $0x80] sm:$0xff] %vm1389_vm1, %v5727_v10  ;;  %v5728_v20 = vadd.f32 %v5696_v50, %v5619_v24 }
 0x2f0   : > { %6579 = vst.msk [vmem:[%s10195_s26 + $0x18] sm:$0xf] %vm6572_vm2, %v7210_v15  ;;  %v6257_v37 = vld [vmem:[#allocation3 + $0x60] sm:$0xff]  ;;  %6577 = vst.msk [vmem:[%s10195_s26 + $0x10] sm:$0xf] %vm6572_vm2, %v7208_v5  ;;  %v7209_v1 = vpack.c.bf16 %v6417_v9, %v6417_v9  ;;  %v6260_v35 = vld [vmem:[#allocation3 + $0x78] sm:$0xff] }
 0x2f1   : > { %v7757_v34 = vpop.f32.mrb[124].mxu0  ;;  %6580 = vst.msk [vmem:[%s10195_s26 + $0x1c] sm:$0xf] %vm6572_vm2, %v7211_v31 }
 0x2f2   : > { %v6291_v3 = vadd.f32 %v7757_v34, %v6259_v21  ;;  %v6166_v4 = vpop.f32.mrb[125].mxu0  ;;  %5762 = vst.msk [vmem:[#allocation3 + $0x98] sm:$0xff] %vm1389_vm1, %v5730_v41  ;;  %v6258_v56 = vld [vmem:[#allocation3 + $0x68] sm:$0xff]  ;;  %5760 = vst.msk [vmem:[#allocation3 + $0x88] sm:$0xff] %vm1389_vm1, %v5728_v20  ;;  %v5705_v41 = vld [vmem:[#allocation3 + $0xd0] sm:$0xff] }
 0x2f3   : > { %v6351_v2 = vld [vmem:[#allocation3 + $0x50] sm:$0xff]  ;;  %v6289_v6 = vadd.f32 %v6257_v37, %v6166_v4  ;;  %v7758_v28 = vpop.f32.mrb[126].mxu0  ;;  %6578 = vst.msk [vmem:[%s10195_s26 + $0x14] sm:$0xf] %vm6572_vm2, %v7209_v1  ;;  %v7731_v32 = vpop.f32.mrb[132].mxu1 }
 0x2f4   : > { %v6390_v27 = vadd.f32 %v10179_v25, %v6351_v2  ;;  %v6349_v23 = vld [vmem:[#allocation3 + $0x40] sm:$0xff]  ;;  %6323 = vst.msk [vmem:[#allocation3 + $0x70] sm:$0xff] %vm1389_vm1, %v6291_v3  ;;  %v6292_v0 = vadd.f32 %v7758_v28, %v6260_v35  ;;  %v6169_v49 = vpop.f32.mrb[127].mxu0  ;;  %v5733_v7 = vadd.f32 %v7731_v32, %v5701_v44  ;;  %v5632_v61 = vpop.f32.mrb[133].mxu1 }
 0x2f5   : > { %v6388_v55 = vadd.f32 %v10179_v25, %v6349_v23  ;;  %v6352_v40 = vld [vmem:[#allocation3 + $0x58] sm:$0xff]  ;;  %6321 = vst.msk [vmem:[#allocation3 + $0x60] sm:$0xff] %vm1389_vm1, %v6289_v6  ;;  %v6290_v17 = vadd.f32 %v6258_v56, %v6169_v49  ;;  %v6263_v46 = vld [vmem:[#allocation3 + $0x90] sm:$0xff]  ;;  %v5731_v16 = vadd.f32 %v5699_v19, %v5632_v61  ;;  %v7732_v33 = vpop.f32.mrb[134].mxu1  ;;  %v5703_v6 = vld [vmem:[#allocation3 + $0xc0] sm:$0xff] }
 0x2f6   : > { %v6422_v58 = vmax.f32 %v6390_v27, 0.0  ;;  %v6391_v29 = vadd.f32 %v10179_v25, %v6352_v40  ;;  %v6350_v42 = vld [vmem:[#allocation3 + $0x48] sm:$0xff]  ;;  %6324 = vst.msk [vmem:[#allocation3 + $0x78] sm:$0xff] %vm1389_vm1, %v6292_v0  ;;  %5765 = vst.msk [vmem:[#allocation3 + $0xb0] sm:$0xff] %vm1389_vm1, %v5733_v7  ;;  %v6261_v63 = vld [vmem:[#allocation3 + $0x80] sm:$0xff]  ;;  %v5734_v60 = vadd.f32 %v7732_v33, %v5702_v18  ;;  %v5635_v43 = vpop.f32.mrb[135].mxu1 }
 0x2f7   : > { %v6420_v36 = vmax.f32 %v6388_v55, 0.0  ;;  %v6389_v22 = vadd.f32 %v10179_v25, %v6350_v42  ;;  %6322 = vst.msk [vmem:[#allocation3 + $0x68] sm:$0xff] %vm1389_vm1, %v6290_v17  ;;  %5763 = vst.msk [vmem:[#allocation3 + $0xa0] sm:$0xff] %vm1389_vm1, %v5731_v16  ;;  %v5732_v51 = vadd.f32 %v5700_v62, %v5635_v43  ;;  %v5706_v49 = vld [vmem:[#allocation3 + $0xd8] sm:$0xff]  ;;  %v5704_v42 = vld [vmem:[#allocation3 + $0xc8] sm:$0xff] }
 0x2f8   : > { %v7214_v59 = vpack.c.bf16 %v6422_v58, %v6422_v58  ;;  %v6423_v47 = vmax.f32 %v6391_v29, 0.0  ;;  %5766 = vst.msk [vmem:[#allocation3 + $0xb8] sm:$0xff] %vm1389_vm1, %v5734_v60  ;;  %v5709_v62 = vld [vmem:[#allocation3 + $0xf0] sm:$0xff] }
 0x2f9   : > { %v7212_v53 = vpack.c.bf16 %v6420_v36, %v6420_v36  ;;  %v6421_v26 = vmax.f32 %v6389_v22, 0.0  ;;  %v7761_v52 = vpop.f32.mrb[128].mxu0  ;;  %v6264_v15 = vld [vmem:[#allocation3 + $0x98] sm:$0xff]  ;;  %v6262_v9 = vld [vmem:[#allocation3 + $0x88] sm:$0xff]  ;;  %5764 = vst.msk [vmem:[#allocation3 + $0xa8] sm:$0xff] %vm1389_vm1, %v5732_v51 }
 0x2fa   : > { %6583 = vst.msk [vmem:[%s10195_s26 + $0x28] sm:$0xf] %vm6572_vm2, %v7214_v59  ;;  %v7215_v8 = vpack.c.bf16 %v6423_v47, %v6423_v47  ;;  %v6295_v45 = vadd.f32 %v7761_v52, %v6263_v46  ;;  %v6182_v54 = vpop.f32.mrb[129].mxu0 }
 0x2fb   : > { %6581 = vst.msk [vmem:[%s10195_s26 + $0x20] sm:$0xf] %vm6572_vm2, %v7212_v53  ;;  %v7213_v39 = vpack.c.bf16 %v6421_v26, %v6421_v26  ;;  %v6355_v12 = vld [vmem:[#allocation3 + $0x70] sm:$0xff]  ;;  %v6293_v48 = vadd.f32 %v6261_v63, %v6182_v54  ;;  %v7762_v57 = vpop.f32.mrb[130].mxu0  ;;  %v7735_v37 = vpop.f32.mrb[136].mxu1 }
 0x2fc   : > { %6584 = vst.msk [vmem:[%s10195_s26 + $0x2c] sm:$0xf] %vm6572_vm2, %v7215_v8  ;;  %v6394_v38 = vadd.f32 %v10179_v25, %v6355_v12  ;;  %v6353_v14 = vld [vmem:[#allocation3 + $0x60] sm:$0xff]  ;;  %v6296_v13 = vadd.f32 %v7762_v57, %v6264_v15  ;;  %v6185_v5 = vpop.f32.mrb[131].mxu0  ;;  %v5737_v1 = vadd.f32 %v7735_v37, %v5705_v41  ;;  %v5648_v2 = vpop.f32.mrb[137].mxu1 }
 0x2fd   : > { %6327 = vst.msk [vmem:[#allocation3 + $0x90] sm:$0xff] %vm1389_vm1, %v6295_v45  ;;  %v6392_v34 = vadd.f32 %v10179_v25, %v6353_v14  ;;  %v6356_v21 = vld [vmem:[#allocation3 + $0x78] sm:$0xff]  ;;  %6325 = vst.msk [vmem:[#allocation3 + $0x80] sm:$0xff] %vm1389_vm1, %v6293_v48  ;;  %v6294_v10 = vadd.f32 %v6262_v9, %v6185_v5  ;;  %v6267_v27 = vld [vmem:[#allocation3 + $0xb0] sm:$0xff]  ;;  %v5735_v23 = vadd.f32 %v5703_v6, %v5648_v2  ;;  %v7736_v0 = vpop.f32.mrb[138].mxu1 }
 0x2fe   : > { %6582 = vst.msk [vmem:[%s10195_s26 + $0x24] sm:$0xf] %vm6572_vm2, %v7213_v39  ;;  %v6426_v30 = vmax.f32 %v6394_v38, 0.0  ;;  %v6395_v11 = vadd.f32 %v10179_v25, %v6356_v21  ;;  %v6354_v31 = vld [vmem:[#allocation3 + $0x68] sm:$0xff]  ;;  %v6265_v17 = vld [vmem:[#allocation3 + $0xa0] sm:$0xff]  ;;  %v5738_v58 = vadd.f32 %v7736_v0, %v5706_v49  ;;  %v5651_v29 = vpop.f32.mrb[139].mxu1 }
 0x2ff   : > { %6328 = vst.msk [vmem:[#allocation3 + $0x98] sm:$0xff] %vm1389_vm1, %v6296_v13  ;;  %v6424_v3 = vmax.f32 %v6392_v34, 0.0  ;;  %v6393_v4 = vadd.f32 %v10179_v25, %v6354_v31  ;;  %6326 = vst.msk [vmem:[#allocation3 + $0x88] sm:$0xff] %vm1389_vm1, %v6294_v10  ;;  %v6268_v59 = vld [vmem:[#allocation3 + $0xb8] sm:$0xff]  ;;  %v5736_v47 = vadd.f32 %v5704_v42, %v5651_v29  ;;  %v5707_v38 = vld [vmem:[#allocation3 + $0xe0] sm:$0xff] }
 0x300   : > { %v7218_v24 = vpack.c.bf16 %v6426_v30, %v6426_v30  ;;  %v6427_v50 = vmax.f32 %v6395_v11, 0.0  ;;  %5769 = vst.msk [vmem:[#allocation3 + $0xd0] sm:$0xff] %vm1389_vm1, %v5737_v1  ;;  %5767 = vst.msk [vmem:[#allocation3 + $0xc0] sm:$0xff] %vm1389_vm1, %v5735_v23  ;;  %v6266_v26 = vld [vmem:[#allocation3 + $0xa8] sm:$0xff]  ;;  %v5710_v10 = vld [vmem:[#allocation3 + $0xf8] sm:$0xff] }
 0x301   : > { %v7216_v28 = vpack.c.bf16 %v6424_v3, %v6424_v3  ;;  %v6425_v35 = vmax.f32 %v6393_v4, 0.0  ;;  %v7765_v20 = vpop.f32.mrb[132].mxu0  ;;  %5770 = vst.msk [vmem:[#allocation3 + $0xd8] sm:$0xff] %vm1389_vm1, %v5738_v58  ;;  %5768 = vst.msk [vmem:[#allocation3 + $0xc8] sm:$0xff] %vm1389_vm1, %v5736_v47 }
 0x302   : > { %6587 = vst.msk [vmem:[%s10195_s26 + $0x38] sm:$0xf] %vm6572_vm2, %v7218_v24  ;;  %v7219_v56 = vpack.c.bf16 %v6427_v50, %v6427_v50  ;;  %v6299_v55 = vadd.f32 %v7765_v20, %v6267_v27  ;;  %v6198_v40 = vpop.f32.mrb[133].mxu0  ;;  %v5708_v24 = vld [vmem:[#allocation3 + $0xe8] sm:$0xff] }
 0x303   : > { %6585 = vst.msk [vmem:[%s10195_s26 + $0x30] sm:$0xf] %vm6572_vm2, %v7216_v28  ;;  %v7217_v36 = vpack.c.bf16 %v6425_v35, %v6425_v35  ;;  %v6297_v32 = vadd.f32 %v6265_v17, %v6198_v40  ;;  %v7766_v44 = vpop.f32.mrb[134].mxu0 }
 0x304   : > { %v6359_v22 = vld [vmem:[#allocation3 + $0x90] sm:$0xff]  ;;  %6588 = vst.msk [vmem:[%s10195_s26 + $0x3c] sm:$0xf] %vm6572_vm2, %v7219_v56  ;;  %v6357_v61 = vld [vmem:[#allocation3 + $0x80] sm:$0xff]  ;;  %v6300_v19 = vadd.f32 %v7766_v44, %v6268_v59  ;;  %v6201_v53 = vpop.f32.mrb[135].mxu0 }
 0x305   : > { %v6398_v7 = vadd.f32 %v10179_v25, %v6359_v22  ;;  %6331 = vst.msk [vmem:[#allocation3 + $0xb0] sm:$0xff] %vm1389_vm1, %v6299_v55  ;;  %v6396_v52 = vadd.f32 %v10179_v25, %v6357_v61  ;;  %6329 = vst.msk [vmem:[#allocation3 + $0xa0] sm:$0xff] %vm1389_vm1, %v6297_v32  ;;  %v6298_v16 = vadd.f32 %v6266_v26, %v6201_v53 }
 0x306   : > { %6586 = vst.msk [vmem:[%s10195_s26 + $0x34] sm:$0xf] %vm6572_vm2, %v7217_v36  ;;  %v6360_v46 = vld [vmem:[#allocation3 + $0x98] sm:$0xff]  ;;  %v6358_v8 = vld [vmem:[#allocation3 + $0x88] sm:$0xff] }
 0x307   : > { %v6430_v33 = vmax.f32 %v6398_v7, 0.0  ;;  %v6399_v18 = vadd.f32 %v10179_v25, %v6360_v46  ;;  %6332 = vst.msk [vmem:[#allocation3 + $0xb8] sm:$0xff] %vm1389_vm1, %v6300_v19  ;;  %v6428_v45 = vmax.f32 %v6396_v52, 0.0  ;;  %v6397_v54 = vadd.f32 %v10179_v25, %v6358_v8  ;;  %6330 = vst.msk [vmem:[#allocation3 + $0xa8] sm:$0xff] %vm1389_vm1, %v6298_v16  ;;  %v7739_v43 = vpop.f32.mrb[140].mxu1  ;;  %v6271_v57 = vld [vmem:[#allocation3 + $0xd0] sm:$0xff] }
 0x308   : > { %v5741_v15 = vadd.f32 %v7739_v43, %v5709_v62  ;;  %v5664_v51 = vpop.f32.mrb[141].mxu1  ;;  %v6269_v9 = vld [vmem:[#allocation3 + $0xc0] sm:$0xff]  ;;  %v6272_v4 = vld [vmem:[#allocation3 + $0xd8] sm:$0xff]  ;;  %v6270_v28 = vld [vmem:[#allocation3 + $0xc8] sm:$0xff] }
 0x309   : > { %v7222_v63 = vpack.c.bf16 %v6430_v33, %v6430_v33  ;;  %v6431_v60 = vmax.f32 %v6399_v18, 0.0  ;;  %v7220_v39 = vpack.c.bf16 %v6428_v45, %v6428_v45  ;;  %v6429_v12 = vmax.f32 %v6397_v54, 0.0  ;;  %v7769_v48 = vpop.f32.mrb[136].mxu0  ;;  %v7740_v21 = vpop.f32.mrb[142].mxu1 }
 0x30a   : > { %v6303_v13 = vadd.f32 %v7769_v48, %v6271_v57  ;;  %v6214_v5 = vpop.f32.mrb[137].mxu0  ;;  %v5739_v34 = vadd.f32 %v5707_v38, %v5664_v51  ;;  %5773 = vst.msk [vmem:[#allocation3 + $0xf0] sm:$0xff] %vm1389_vm1, %v5741_v15  ;;  %v5742_v37 = vadd.f32 %v7740_v21, %v5710_v10  ;;  %v5667_v41 = vpop.f32.mrb[143].mxu1 }
 0x30b   : > { %6591 = vst.msk [vmem:[%s10195_s26 + $0x48] sm:$0xf] %vm6572_vm2, %v7222_v63  ;;  %v7223_v14 = vpack.c.bf16 %v6431_v60, %v6431_v60  ;;  %6589 = vst.msk [vmem:[%s10195_s26 + $0x40] sm:$0xf] %vm6572_vm2, %v7220_v39  ;;  %v7221_v30 = vpack.c.bf16 %v6429_v12, %v6429_v12  ;;  %v6301_v31 = vadd.f32 %v6269_v9, %v6214_v5  ;;  %v7770_v3 = vpop.f32.mrb[138].mxu0 }
 0x30c   : > { %v6363_v11 = vld [vmem:[#allocation3 + $0xb0] sm:$0xff]  ;;  %v6361_v1 = vld [vmem:[#allocation3 + $0xa0] sm:$0xff]  ;;  %6335 = vst.msk [vmem:[#allocation3 + $0xd0] sm:$0xff] %vm1389_vm1, %v6303_v13  ;;  %5771 = vst.msk [vmem:[#allocation3 + $0xe0] sm:$0xff] %vm1389_vm1, %v5739_v34  ;;  %v6304_v2 = vadd.f32 %v7770_v3, %v6272_v4  ;;  %v6217_v6 = vpop.f32.mrb[139].mxu0  ;;  %v5740_v35 = vadd.f32 %v5708_v24, %v5667_v41 }
 0x30d   : > { %6592 = vst.msk [vmem:[%s10195_s26 + $0x4c] sm:$0xf] %vm6572_vm2, %v7223_v14  ;;  %v6402_v50 = vadd.f32 %v10179_v25, %v6363_v11  ;;  %6590 = vst.msk [vmem:[%s10195_s26 + $0x44] sm:$0xf] %vm6572_vm2, %v7221_v30  ;;  %v6400_v20 = vadd.f32 %v10179_v25, %v6361_v1  ;;  %v6302_v23 = vadd.f32 %v6270_v28, %v6217_v6 }
 0x30e   : > { %v6364_v27 = vld [vmem:[#allocation3 + $0xb8] sm:$0xff]  ;;  %6333 = vst.msk [vmem:[#allocation3 + $0xc0] sm:$0xff] %vm1389_vm1, %v6301_v31  ;;  %5774 = vst.msk [vmem:[#allocation3 + $0xf8] sm:$0xff] %vm1389_vm1, %v5742_v37  ;;  %v6362_v56 = vld [vmem:[#allocation3 + $0xa8] sm:$0xff] }
 0x30f   : > { %v6434_v0 = vmax.f32 %v6402_v50, 0.0  ;;  %v6403_v49 = vadd.f32 %v10179_v25, %v6364_v27  ;;  %6336 = vst.msk [vmem:[#allocation3 + $0xd8] sm:$0xff] %vm1389_vm1, %v6304_v2  ;;  %5772 = vst.msk [vmem:[#allocation3 + $0xe8] sm:$0xff] %vm1389_vm1, %v5740_v35  ;;  %v6432_v55 = vmax.f32 %v6400_v20, 0.0  ;;  %v6401_v40 = vadd.f32 %v10179_v25, %v6362_v56 }
 0x310   : > { %6334 = vst.msk [vmem:[#allocation3 + $0xc8] sm:$0xff] %vm1389_vm1, %v6302_v23 }
 0x311   : > { %v7226_v17 = vpack.c.bf16 %v6434_v0, %v6434_v0  ;;  %v6435_v58 = vmax.f32 %v6403_v49, 0.0  ;;  %v7224_v29 = vpack.c.bf16 %v6432_v55, %v6432_v55  ;;  %v6433_v42 = vmax.f32 %v6401_v40, 0.0  ;;  %v7773_v36 = vpop.f32.mrb[140].mxu0  ;;  %v6275_v32 = vld [vmem:[#allocation3 + $0xf0] sm:$0xff] }
 0x312   : > { %v6230_v44 = vpop.f32.mrb[141].mxu0  ;;  %v6307_v7 = vadd.f32 %v7773_v36, %v6275_v32 }
 0x313   : > { %6595 = vst.msk [vmem:[%s10195_s26 + $0x58] sm:$0xf] %vm6572_vm2, %v7226_v17  ;;  %v7227_v22 = vpack.c.bf16 %v6435_v58, %v6435_v58  ;;  %6593 = vst.msk [vmem:[%s10195_s26 + $0x50] sm:$0xf] %vm6572_vm2, %v7224_v29  ;;  %v7225_v59 = vpack.c.bf16 %v6433_v42, %v6433_v42  ;;  %v6367_v47 = vld [vmem:[#allocation3 + $0xd0] sm:$0xff]  ;;  %v6273_v61 = vld [vmem:[#allocation3 + $0xe0] sm:$0xff] }
 0x314   : > { %v7774_v19 = vpop.f32.mrb[142].mxu0  ;;  %v6406_v53 = vadd.f32 %v10179_v25, %v6367_v47  ;;  %v6305_v52 = vadd.f32 %v6273_v61, %v6230_v44  ;;  %6339 = vst.msk [vmem:[#allocation3 + $0xf0] sm:$0xff] %vm1389_vm1, %v6307_v7 }
 0x315   : > { %6596 = vst.msk [vmem:[%s10195_s26 + $0x5c] sm:$0xf] %vm6572_vm2, %v7227_v22  ;;  %v6365_v26 = vld [vmem:[#allocation3 + $0xc0] sm:$0xff]  ;;  %v6276_v46 = vld [vmem:[#allocation3 + $0xf8] sm:$0xff]  ;;  %v6233_v16 = vpop.f32.mrb[143].mxu0 }
 0x316   : > { %6594 = vst.msk [vmem:[%s10195_s26 + $0x54] sm:$0xf] %vm6572_vm2, %v7225_v59  ;;  %v6404_v33 = vadd.f32 %v10179_v25, %v6365_v26  ;;  %v6368_v18 = vld [vmem:[#allocation3 + $0xd8] sm:$0xff]  ;;  %v6308_v8 = vadd.f32 %v7774_v19, %v6276_v46  ;;  %v6274_v45 = vld [vmem:[#allocation3 + $0xe8] sm:$0xff]  ;;  %v6438_v54 = vmax.f32 %v6406_v53, 0.0 }
 0x317   : > { %v6407_v63 = vadd.f32 %v10179_v25, %v6368_v18  ;;  %v6366_v60 = vld [vmem:[#allocation3 + $0xc8] sm:$0xff]  ;;  %6337 = vst.msk [vmem:[#allocation3 + $0xe0] sm:$0xff] %vm1389_vm1, %v6305_v52  ;;  %v6306_v43 = vadd.f32 %v6274_v45, %v6233_v16 }
 0x318   : > { %v6436_v62 = vmax.f32 %v6404_v33, 0.0  ;;  %v6405_v39 = vadd.f32 %v10179_v25, %v6366_v60  ;;  %6340 = vst.msk [vmem:[#allocation3 + $0xf8] sm:$0xff] %vm1389_vm1, %v6308_v8  ;;  %v7230_v12 = vpack.c.bf16 %v6438_v54, %v6438_v54 }
 0x319   : > { %v6439_v48 = vmax.f32 %v6407_v63, 0.0  ;;  %6338 = vst.msk [vmem:[#allocation3 + $0xe8] sm:$0xff] %vm1389_vm1, %v6306_v43 }
 0x31a   : > { %v7228_v57 = vpack.c.bf16 %v6436_v62, %v6436_v62  ;;  %v6437_v15 = vmax.f32 %v6405_v39, 0.0  ;;  %6599 = vst.msk [vmem:[%s10195_s26 + $0x68] sm:$0xf] %vm6572_vm2, %v7230_v12 }
 0x31b   : > { %v7231_v51 = vpack.c.bf16 %v6439_v48, %v6439_v48  ;;  %v6371_v14 = vld [vmem:[#allocation3 + $0xf0] sm:$0xff] }
 0x31c   : > { %6597 = vst.msk [vmem:[%s10195_s26 + $0x60] sm:$0xf] %vm6572_vm2, %v7228_v57  ;;  %v7229_v38 = vpack.c.bf16 %v6437_v15, %v6437_v15  ;;  %v6410_v13 = vadd.f32 %v10179_v25, %v6371_v14 }
 0x31d   : > { %6600 = vst.msk [vmem:[%s10195_s26 + $0x6c] sm:$0xf] %vm6572_vm2, %v7231_v51 }
 0x31e   : > { %6598 = vst.msk [vmem:[%s10195_s26 + $0x64] sm:$0xf] %vm6572_vm2, %v7229_v38  ;;  %v6369_v5 = vld [vmem:[#allocation3 + $0xe0] sm:$0xff]  ;;  %v6442_v21 = vmax.f32 %v6410_v13, 0.0 }
 0x31f   : > { %v6408_v9 = vadd.f32 %v10179_v25, %v6369_v5  ;;  %v6372_v34 = vld [vmem:[#allocation3 + $0xf8] sm:$0xff] }
 0x320   : > { %v6411_v10 = vadd.f32 %v10179_v25, %v6372_v34  ;;  %v6370_v30 = vld [vmem:[#allocation3 + $0xe8] sm:$0xff]  ;;  %v7234_v3 = vpack.c.bf16 %v6442_v21, %v6442_v21 }
 0x321   : > { %v6440_v11 = vmax.f32 %v6408_v9, 0.0  ;;  %v6409_v31 = vadd.f32 %v10179_v25, %v6370_v30 }
 0x322   : > { %v6443_v4 = vmax.f32 %v6411_v10, 0.0  ;;  %6603 = vst.msk [vmem:[%s10195_s26 + $0x78] sm:$0xf] %vm6572_vm2, %v7234_v3 }
 0x323   : > { %v7232_v37 = vpack.c.bf16 %v6440_v11, %v6440_v11  ;;  %v6441_v41 = vmax.f32 %v6409_v31, 0.0 }
 0x324   : > { %v7235_v24 = vpack.c.bf16 %v6443_v4, %v6443_v4 }
 0x325   : > { %6601 = vst.msk [vmem:[%s10195_s26 + $0x70] sm:$0xf] %vm6572_vm2, %v7232_v37  ;;  %v7233_v25 = vpack.c.bf16 %v6441_v41, %v6441_v41 }
 0x326   : > { %6604 = vst.msk [vmem:[%s10195_s26 + $0x7c] sm:$0xf] %vm6572_vm2, %v7235_v24 }
 0x327   : > { %6602 = vst.msk [vmem:[%s10195_s26 + $0x74] sm:$0xf] %vm6572_vm2, %v7233_v25 }
 0x328   : > { %8093 = shalt.err (!%p8090_p5)
}
 0x329   : > { %s8094_s14 = scalar_lea.hbm %s10332_s9, 2048  ;;  %s8098_s11 = scalar_lea.hbm %s10394_s5, 4096 }
 0x32a   : > { %p8095_p10 = scmp.ne.s32.totalorder %s10332_s9, %s8094_s14  ;;  %p8099_p3 = scmp.lt.u32.totalorder %s10332_s9, %s10394_s5 }
 0x32b   : > { %p8100_p7 = scmp.lt.u32.totalorder %s8098_s11, %s8094_s14  ;;  %p8102_p12 = scmp.lt.u32.totalorder %s8094_s14, %s10332_s9 }
 0x32c   : > { %p8096_p13 = pnand %p8095_p10, %p8381_p6 }
 0x32d   : > { %p8101_p11 = por %p8100_p7, %p8099_p3 }
 0x32e   : > { %p8097_p9 = pneg %p8096_p13 }
 0x32f   : > { %p8103_p1 = por %p8102_p12, %p8101_p11 }
 0x331   : > { %p8104_p2 = pnand %p8103_p1, %p8097_p9 }
 0x333   : > { %8107 = shalt.err (!%p8104_p2)
}
 0x334   : > { %s8184_s28 = smov 64   ;;  %s8185_s15 = smov 4  }
 0x335   : > { %7795 = dma.vmem_to_hbm [thread:$0]  (%p8381_p6), %s10334_s30, 2048, %s10332_s9, %s6606_s21, %s8184_s28, %s8184_s28, %s8185_s15  }
 0x336 PF: > { %s6635_s12 = sand.u32 1, %s8150_s18   ;;  %p10430_p4 = scmp.ne.s32.totalorder %s10403_s29, 0 }
 0x337   : > { %p10431_p8 = scmp.ge.s32.totalorder %s8170_s23, 2  ;;  %s6636_s13 = scalar_lea.sflag [#allocation6], %s6635_s12 }
 0x339   : > { %p7815_p0 = pnand %p10431_p8, %p10430_p4 }
 0x33b   : > { %8145 = dma.done.wait (!%p7815_p0), %s6636_s13, 2048  }
 0x33c   : > { %8147 = vsyncadd (!%p7815_p0), %s6636_s13, 4294965248  ;;  %s23_s23 = sadd.s32 1, %s8170_s23   ;;  %s10432_s18 = smov %s8154_s19 }
 0x33d   : > { %p20_p5 = scmp.ge.s32.totalorder %s23_s23, 4   ;;  %s10433_s19 = smov %s8158_s20 }
 0x33e   : > { %s10434_s20 = smov %s8390_s8  ;;  %s10435_s21 = smov %s8166_s22 }
 0x33f   : > { %s10436_s22 = smov %s10438_s24  ;;  %22 = sbr.rel (!%p20_p5) target bundleno = 10 (0xa), region = 113 }
 0x346   :  { %6641 = vsyncpa [#allocation5], 1 }
 0x347   :  { %6643 = vsyncpa [#allocation5 + $0x1], 1 }
 0x348   :  { %6644 = vsyncpa [#allocation8], 1 }
 0x349   :  { %6645 = vsyncpa [#allocation11], 1 }
 0x34a   :  { %6646 = vsyncpa [#allocation6], 1 }
 0x34b   :  { %6648 = vsyncpa [#allocation6 + $0x1], 1 }

</bundles_post_ra>
